<compile_context>
chip_gen: v6e
topology: v6e:2x2x1
jax: 0.10.0
libtpu: 0.0.40
codegen_flags: <defaults>
</compile_context>

<pallas_src>
import functools

import jax
import jax.numpy as jnp
from jax.experimental import pallas as pl
from jax.experimental.pallas import tpu as pltpu

_TB = 128  # batch tile: multiple of the sublane tiling and a full 128-lane output row


def _leaky_relu(x, slope=0.2):
    # max(x, slope*x) == LeakyReLU for 0 < slope < 1; cheaper than where().
    return jnp.maximum(x, slope * x)


def disc_kernel(x_ref, w1_ref, b1_ref, w2_ref, b2_ref, w3_ref, b3_ref,
                w4_ref, b4_ref, o_ref):
    # Layer 1: (TB, D) bf16 @ (D, 512) bf16 -> f32 accum; bias + activation in f32.
    h = jnp.dot(x_ref[...], w1_ref[...], preferred_element_type=jnp.float32)
    h = _leaky_relu(h + b1_ref[...])
    # Layer 2: (TB, 512) @ (512, 256)
    h = jnp.dot(h.astype(jnp.bfloat16), w2_ref[...], preferred_element_type=jnp.float32)
    h = _leaky_relu(h + b2_ref[...])
    # Layer 3: (TB, 256) @ (256, 128)
    h = jnp.dot(h.astype(jnp.bfloat16), w3_ref[...], preferred_element_type=jnp.float32)
    h = _leaky_relu(h + b3_ref[...])
    # Layer 4: Linear(128, 1). An N=1 MXU matmul wastes nearly all output lanes,
    # so do it on the VPU/XLU: square (TB,128)->(128,TB) transpose, multiply by the
    # (128, 1) weight column, reduce over sublanes -> lane-dense (1, TB) row.
    hT = jnp.transpose(h, (1, 0))                                  # (128, TB) f32
    logits = jnp.sum(hT * w4_ref[...], axis=0, keepdims=True) + b4_ref[...]
    o_ref[...] = logits.astype(o_ref.dtype)                        # (1, TB) unmasked store


@jax.jit
def discriminator_forward(image, params):
    B = image.shape[0]
    x_flat = image.reshape(B, -1)          # matches torch .view(B, -1) for contiguous NCHW
    D = x_flat.shape[1]
    (w1, b1), (w2, b2), (w3, b3), (w4, b4) = params

    num_tiles = (B + _TB - 1) // _TB
    B_pad = num_tiles * _TB                 # pad M so each tile fills the MXU height

    x_pad = jnp.zeros((B_pad, D), jnp.bfloat16).at[:B].set(x_flat.astype(jnp.bfloat16))
    w1b, w2b, w3b = (w.astype(jnp.bfloat16) for w in (w1, w2, w3))
    # TODO(synk): for much larger img_shape (huge in_dim), add a K-axis grid over D with an
    # f32 accumulator so w1 need not be fully VMEM-resident (v7x has only 64 MiB VMEM).

    const = lambda i: (0, 0)                # weights/biases: same block every step -> stay resident
    out_rows = pl.pallas_call(
        disc_kernel,
        out_shape=jax.ShapeDtypeStruct((num_tiles, _TB), jnp.float32),
        grid=(num_tiles,),
        in_specs=[
            pl.BlockSpec((_TB, D), lambda i: (i, 0)),   # x: one batch tile per grid step
            pl.BlockSpec((D, 512), const),              # w1 (bf16)
            pl.BlockSpec((1, 512), const),              # b1 (f32)
            pl.BlockSpec((512, 256), const),            # w2 (bf16)
            pl.BlockSpec((1, 256), const),              # b2 (f32)
            pl.BlockSpec((256, 128), const),            # w3 (bf16)
            pl.BlockSpec((1, 128), const),              # b3 (f32)
            pl.BlockSpec((128, 1), const),              # w4 column (f32)
            pl.BlockSpec((1, 1), const),                # b4 scalar (f32)
        ],
        out_specs=pl.BlockSpec((1, _TB), lambda i: (i, 0)),  # lane-dense output rows
        compiler_params=pltpu.CompilerParams(
            dimension_semantics=("parallel",)),         # shard batch tiles across TCs (v7x)
    )(x_pad, w1b, b1, w2b, b2, w3b, b3, w4, b4)

    return out_rows.reshape(B_pad, 1)[:B]


def init_params(key, in_dim):
    """PyTorch nn.Linear default init: U(-1/sqrt(fan_in), 1/sqrt(fan_in)).

    Weights stored as (in_dim, out_dim) so the kernel computes x @ W + b
    (equivalent to torch's x @ W^T). Biases stored as (1, out_dim).
    """
    dims = [(in_dim, 512), (512, 256), (256, 128), (128, 1)]
    params = []
    for i, (din, dout) in enumerate(dims):
        kw, kb = jax.random.split(jax.random.fold_in(key, i))
        bound = 1.0 / jnp.sqrt(float(din))
        w = jax.random.uniform(kw, (din, dout), jnp.float32, -bound, bound)
        b = jax.random.uniform(kb, (1, dout), jnp.float32, -bound, bound)
        params.append((w, b))
    return params


def _reference_forward_f32(image, params):
    x = image.reshape(image.shape[0], -1)
    (w1, b1), (w2, b2), (w3, b3), (w4, b4) = params
    h = jax.nn.leaky_relu(x @ w1 + b1, 0.2)
    h = jax.nn.leaky_relu(h @ w2 + b2, 0.2)
    h = jax.nn.leaky_relu(h @ w3 + b3, 0.2)
    return h @ w4 + b4


def _reference_forward_bf16(image, params):
    # Mirrors the kernel's quantization choices (bf16 matmul inputs, f32 accum).
    x = image.reshape(image.shape[0], -1).astype(jnp.bfloat16)
    (w1, b1), (w2, b2), (w3, b3), (w4, b4) = params
    h = jax.nn.leaky_relu(
        jnp.dot(x, w1.astype(jnp.bfloat16), preferred_element_type=jnp.float32) + b1, 0.2)
    h = jax.nn.leaky_relu(
        jnp.dot(h.astype(jnp.bfloat16), w2.astype(jnp.bfloat16),
                preferred_element_type=jnp.float32) + b2, 0.2)
    h = jax.nn.leaky_relu(
        jnp.dot(h.astype(jnp.bfloat16), w3.astype(jnp.bfloat16),
                preferred_element_type=jnp.float32) + b3, 0.2)
    return h @ w4 + b4


if __name__ == "__main__":
    key = jax.random.PRNGKey(0)
    k_img, k_par = jax.random.split(key)

    # Small image consistent with the module: img_shape = (4, 16, 16) -> flat dim 1024
    B, C, H, W = 2, 4, 16, 16
    image = jax.random.normal(k_img, (B, C, H, W), jnp.float32)

    params = init_params(k_par, C * H * W)

    out = discriminator_forward(image, params)
    out = jax.block_until_ready(out)

    ref_bf16 = _reference_forward_bf16(image, params)
    ref_f32 = _reference_forward_f32(image, params)

    assert out.shape == (B, 1), out.shape
    # Tight check against a reference mirroring the kernel's bf16/f32 mixed precision.
    assert jnp.allclose(out, ref_bf16, atol=1e-2, rtol=1e-2), (out, ref_bf16)
    # Loose semantic check against the full-f32 PyTorch-equivalent forward.
    assert jnp.allclose(out, ref_f32, atol=1e-1, rtol=1e-1), (out, ref_f32)

    print("KERNEL_OK")
</pallas_src>

<mosaic_0001>
module attributes {stable_mosaic.version = 11 : i64} {
  func.func @disc_kernel(%arg0: i32, %arg1: memref<128x1024xbf16, #tpu.memory_space<vmem>>, %arg2: memref<1024x512xbf16, #tpu.memory_space<vmem>>, %arg3: memref<1x512xf32, #tpu.memory_space<vmem>>, %arg4: memref<512x256xbf16, #tpu.memory_space<vmem>>, %arg5: memref<1x256xf32, #tpu.memory_space<vmem>>, %arg6: memref<256x128xbf16, #tpu.memory_space<vmem>>, %arg7: memref<1x128xf32, #tpu.memory_space<vmem>>, %arg8: memref<128x1xf32, #tpu.memory_space<vmem>>, %arg9: memref<1x1xf32, #tpu.memory_space<vmem>>, %arg10: memref<1x128xf32, #tpu.memory_space<vmem>>) attributes {dimension_semantics = [#tpu.dimension_semantics<parallel>], iteration_bounds = array<i64: 1>, scalar_prefetch = 0 : i64, scratch_operands = 0 : i64, tpu.core_type = #tpu.core_type<tc>, window_params = [{transform_indices = @transform_0, window_bounds = array<i64: 128, 1024>}, {pipeline_mode = #tpu.pipeline_mode<synchronous>, transform_indices = @transform_1, window_bounds = array<i64: 1024, 512>}, {pipeline_mode = #tpu.pipeline_mode<synchronous>, transform_indices = @transform_2, window_bounds = array<i64: 1, 512>}, {pipeline_mode = #tpu.pipeline_mode<synchronous>, transform_indices = @transform_3, window_bounds = array<i64: 512, 256>}, {pipeline_mode = #tpu.pipeline_mode<synchronous>, transform_indices = @transform_4, window_bounds = array<i64: 1, 256>}, {pipeline_mode = #tpu.pipeline_mode<synchronous>, transform_indices = @transform_5, window_bounds = array<i64: 256, 128>}, {pipeline_mode = #tpu.pipeline_mode<synchronous>, transform_indices = @transform_6, window_bounds = array<i64: 1, 128>}, {pipeline_mode = #tpu.pipeline_mode<synchronous>, transform_indices = @transform_7, window_bounds = array<i64: 128, 1>}, {pipeline_mode = #tpu.pipeline_mode<synchronous>, transform_indices = @transform_8, window_bounds = array<i64: 1, 1>}, {transform_indices = @transform_9, window_bounds = array<i64: 1, 128>}]} {
    %c0 = arith.constant 0 : index
    %c0_0 = arith.constant 0 : index
    %0 = vector.load %arg1[%c0, %c0_0] : memref<128x1024xbf16, #tpu.memory_space<vmem>>, vector<128x1024xbf16>
    %c0_1 = arith.constant 0 : index
    %c0_2 = arith.constant 0 : index
    %1 = vector.load %arg2[%c0_1, %c0_2] : memref<1024x512xbf16, #tpu.memory_space<vmem>>, vector<1024x512xbf16>
    %cst = arith.constant dense<0.000000e+00> : vector<128x512xf32>
    %2 = tpu.matmul %0, %1, %cst {dimension_numbers = #tpu.dot_dimension_numbers<[1], [0], [0], [1], [0, 0, 1, 1], [], []>} : vector<128x1024xbf16>, vector<1024x512xbf16>, vector<128x512xf32> -> vector<128x512xf32>
    %c0_3 = arith.constant 0 : index
    %c0_4 = arith.constant 0 : index
    %3 = vector.load %arg3[%c0_3, %c0_4] : memref<1x512xf32, #tpu.memory_space<vmem>>, vector<1x512xf32>
    %4 = vector.broadcast %3 : vector<1x512xf32> to vector<128x512xf32>
    %5 = arith.addf %2, %4 : vector<128x512xf32>
    %cst_5 = arith.constant 2.000000e-01 : f32
    %6 = vector.broadcast %cst_5 : f32 to vector<128x512xf32>
    %7 = arith.mulf %6, %5 : vector<128x512xf32>
    %8 = arith.maximumf %5, %7 : vector<128x512xf32>
    %9 = arith.truncf %8 : vector<128x512xf32> to vector<128x512xbf16>
    %c0_6 = arith.constant 0 : index
    %c0_7 = arith.constant 0 : index
    %10 = vector.load %arg4[%c0_6, %c0_7] : memref<512x256xbf16, #tpu.memory_space<vmem>>, vector<512x256xbf16>
    %cst_8 = arith.constant dense<0.000000e+00> : vector<128x256xf32>
    %11 = tpu.matmul %9, %10, %cst_8 {dimension_numbers = #tpu.dot_dimension_numbers<[1], [0], [0], [1], [0, 0, 1, 1], [], []>} : vector<128x512xbf16>, vector<512x256xbf16>, vector<128x256xf32> -> vector<128x256xf32>
    %c0_9 = arith.constant 0 : index
    %c0_10 = arith.constant 0 : index
    %12 = vector.load %arg5[%c0_9, %c0_10] : memref<1x256xf32, #tpu.memory_space<vmem>>, vector<1x256xf32>
    %13 = vector.broadcast %12 : vector<1x256xf32> to vector<128x256xf32>
    %14 = arith.addf %11, %13 : vector<128x256xf32>
    %cst_11 = arith.constant 2.000000e-01 : f32
    %15 = vector.broadcast %cst_11 : f32 to vector<128x256xf32>
    %16 = arith.mulf %15, %14 : vector<128x256xf32>
    %17 = arith.maximumf %14, %16 : vector<128x256xf32>
    %18 = arith.truncf %17 : vector<128x256xf32> to vector<128x256xbf16>
    %c0_12 = arith.constant 0 : index
    %c0_13 = arith.constant 0 : index
    %19 = vector.load %arg6[%c0_12, %c0_13] : memref<256x128xbf16, #tpu.memory_space<vmem>>, vector<256x128xbf16>
    %cst_14 = arith.constant dense<0.000000e+00> : vector<128x128xf32>
    %20 = tpu.matmul %18, %19, %cst_14 {dimension_numbers = #tpu.dot_dimension_numbers<[1], [0], [0], [1], [0, 0, 1, 1], [], []>} : vector<128x256xbf16>, vector<256x128xbf16>, vector<128x128xf32> -> vector<128x128xf32>
    %c0_15 = arith.constant 0 : index
    %c0_16 = arith.constant 0 : index
    %21 = vector.load %arg7[%c0_15, %c0_16] : memref<1x128xf32, #tpu.memory_space<vmem>>, vector<1x128xf32>
    %22 = vector.broadcast %21 : vector<1x128xf32> to vector<128x128xf32>
    %23 = arith.addf %20, %22 : vector<128x128xf32>
    %cst_17 = arith.constant 2.000000e-01 : f32
    %24 = vector.broadcast %cst_17 : f32 to vector<128x128xf32>
    %25 = arith.mulf %24, %23 : vector<128x128xf32>
    %26 = arith.maximumf %23, %25 : vector<128x128xf32>
    %27 = tpu.transpose %26, [1, 0] : vector<128x128xf32> -> vector<128x128xf32>
    %c0_18 = arith.constant 0 : index
    %c0_19 = arith.constant 0 : index
    %28 = vector.load %arg8[%c0_18, %c0_19] : memref<128x1xf32, #tpu.memory_space<vmem>>, vector<128x1xf32>
    %29 = vector.broadcast %28 : vector<128x1xf32> to vector<128x128xf32>
    %30 = arith.mulf %27, %29 : vector<128x128xf32>
    %cst_20 = arith.constant dense<0.000000e+00> : vector<128xf32>
    %31 = vector.multi_reduction <add>, %30, %cst_20 [0] : vector<128x128xf32> to vector<128xf32>
    %32 = vector.shape_cast %31 : vector<128xf32> to vector<1x128xf32>
    %c0_21 = arith.constant 0 : index
    %c0_22 = arith.constant 0 : index
    %33 = vector.load %arg9[%c0_21, %c0_22] : memref<1x1xf32, #tpu.memory_space<vmem>>, vector<1x1xf32>
    %34 = vector.broadcast %33 : vector<1x1xf32> to vector<1x128xf32>
    %35 = arith.addf %32, %34 : vector<1x128xf32>
    %c0_23 = arith.constant 0 : index
    %c0_24 = arith.constant 0 : index
    %36 = vector.load %arg10[%c0_23, %c0_24] : memref<1x128xf32, #tpu.memory_space<vmem>>, vector<1x128xf32>
    tpu.vector_store %arg10[%c0_23, %c0_24], %35 {strides = array<i32>} : memref<1x128xf32, #tpu.memory_space<vmem>>, vector<1x128xf32>,
    return
  }
  func.func @transform_0(%arg0: i32) -> (i32, i32) {
    %c0_i32 = arith.constant 0 : i32
    %c0_i32_0 = arith.constant 0 : i32
    return %arg0, %c0_i32 : i32, i32
  }
  func.func @transform_1(%arg0: i32) -> (i32, i32) {
    %c0_i32 = arith.constant 0 : i32
    %c0_i32_0 = arith.constant 0 : i32
    %c0_i32_1 = arith.constant 0 : i32
    return %c0_i32, %c0_i32_0 : i32, i32
  }
  func.func @transform_2(%arg0: i32) -> (i32, i32) {
    %c0_i32 = arith.constant 0 : i32
    %c0_i32_0 = arith.constant 0 : i32
    %c0_i32_1 = arith.constant 0 : i32
    return %c0_i32, %c0_i32_0 : i32, i32
  }
  func.func @transform_3(%arg0: i32) -> (i32, i32) {
    %c0_i32 = arith.constant 0 : i32
    %c0_i32_0 = arith.constant 0 : i32
    %c0_i32_1 = arith.constant 0 : i32
    return %c0_i32, %c0_i32_0 : i32, i32
  }
  func.func @transform_4(%arg0: i32) -> (i32, i32) {
    %c0_i32 = arith.constant 0 : i32
    %c0_i32_0 = arith.constant 0 : i32
    %c0_i32_1 = arith.constant 0 : i32
    return %c0_i32, %c0_i32_0 : i32, i32
  }
  func.func @transform_5(%arg0: i32) -> (i32, i32) {
    %c0_i32 = arith.constant 0 : i32
    %c0_i32_0 = arith.constant 0 : i32
    %c0_i32_1 = arith.constant 0 : i32
    return %c0_i32, %c0_i32_0 : i32, i32
  }
  func.func @transform_6(%arg0: i32) -> (i32, i32) {
    %c0_i32 = arith.constant 0 : i32
    %c0_i32_0 = arith.constant 0 : i32
    %c0_i32_1 = arith.constant 0 : i32
    return %c0_i32, %c0_i32_0 : i32, i32
  }
  func.func @transform_7(%arg0: i32) -> (i32, i32) {
    %c0_i32 = arith.constant 0 : i32
    %c0_i32_0 = arith.constant 0 : i32
    %c0_i32_1 = arith.constant 0 : i32
    return %c0_i32, %c0_i32_0 : i32, i32
  }
  func.func @transform_8(%arg0: i32) -> (i32, i32) {
    %c0_i32 = arith.constant 0 : i32
    %c0_i32_0 = arith.constant 0 : i32
    %c0_i32_1 = arith.constant 0 : i32
    return %c0_i32, %c0_i32_0 : i32, i32
  }
  func.func @transform_9(%arg0: i32) -> (i32, i32) {
    %c0_i32 = arith.constant 0 : i32
    %c0_i32_0 = arith.constant 0 : i32
    return %arg0, %c0_i32 : i32, i32
  }
}

</mosaic_0001>

<bundles_post_ra>
// kernel: discriminator_forward.1
= control target key start
LH: loop header
LB: loop body
LE: loop exit
PB: predicated region body
PF: predicated region fallthrough
CT: control target
= control target key end

     0   :  { %s7172_s1 = inlined_call_operand.vmem [shape: bf16[1024,512], index: 1, kind: input, shape index: {}]   ;;  %s7173_s0 = inlined_call_operand.vmem [shape: bf16[128,1024], index: 0, kind: input, shape index: {}]   ;;  %s7174_s3 = inlined_call_operand.vmem [shape: bf16[512,256], index: 3, kind: input, shape index: {}]   ;;  %s7175_s2 = inlined_call_operand.vmem [shape: f32[1,512], index: 2, kind: input, shape index: {}]   ;;  %s7176_s5 = inlined_call_operand.vmem [shape: bf16[256,128], index: 5, kind: input, shape index: {}]   ;;  %s7177_s7 = inlined_call_operand.vmem [shape: f32[128,1], index: 7, kind: input, shape index: {}]   ;;  %s7178_s4 = inlined_call_operand.vmem [shape: f32[1,256], index: 4, kind: input, shape index: {}]   ;;  %s7179_s8 = inlined_call_operand.<no memory space> [shape: f32[1,1], index: 8, kind: input, shape index: {}]   ;;  %s7180_s6 = inlined_call_operand.vmem [shape: f32[1,128], index: 6, kind: input, shape index: {}]   ;;  %s7181_s9 = inlined_call_operand.vmem [shape: f32[1,128], index: 9, kind: output, shape index: {}]  }
   0x1   :  { %v4672_v0 = vld [vmem:[%s7172_s1 + $0xe4] ss:$16 sps:$4 sm:$0xff]   ;;  %v4676_v2 = vld [vmem:[%s7172_s1 + $0xe0] ss:$16 sps:$4 sm:$0xff]   ;;  %v36_v50 = vld [vmem:[%s7173_s0 + $0x8] sm:$0xff] }
   0x2   :  { %v4674_v1 = vld [vmem:[%s7172_s1 + $0x2e4] ss:$16 sps:$4 sm:$0xff]   ;;  %1977 = vmatprep.subr.bf16.mxu0 %v4672_v0  ;;  %v4677_v3 = vld [vmem:[%s7172_s1 + $0x2e0] ss:$16 sps:$4 sm:$0xff]   ;;  %v40_v51 = vld [vmem:[%s7173_s0 + $0x28] sm:$0xff] }
   0x3   :  { %2090 = vmatprep.subr.bf16.mxu1 %v4674_v1  ;;  %v4678_v4 = vld [vmem:[%s7172_s1 + $0xc4] ss:$16 sps:$4 sm:$0xff]   ;;  %1978 = vmatpush1.bf16.msra.mxu0 %v4676_v2  ;;  %v4682_v6 = vld [vmem:[%s7172_s1 + $0xc0] ss:$16 sps:$4 sm:$0xff]   ;;  %v5383_v55 = vcombine.high %v36_v50, %v40_v51 }
   0x4   :  { %2091 = vmatpush1.bf16.msra.mxu1 %v4677_v3  ;;  %v4680_v5 = vld [vmem:[%s7172_s1 + $0x2c4] ss:$16 sps:$4 sm:$0xff]   ;;  %1979 = vmatprep.subr.bf16.mxu0 %v4678_v4  ;;  %v4683_v7 = vld [vmem:[%s7172_s1 + $0x2c0] ss:$16 sps:$4 sm:$0xff]  }
   0x5   :  { %2092 = vmatprep.subr.bf16.mxu1 %v4680_v5  ;;  %v4684_v8 = vld [vmem:[%s7172_s1 + $0xa4] ss:$16 sps:$4 sm:$0xff]   ;;  %v4688_v10 = vld [vmem:[%s7172_s1 + $0xa0] ss:$16 sps:$4 sm:$0xff]   ;;  %2122 = vmatprep.mubr.bf16.mxu1 %v5383_v55 }
   0x6   :  { %v4686_v9 = vld [vmem:[%s7172_s1 + $0x2a4] ss:$16 sps:$4 sm:$0xff]   ;;  %v4689_v11 = vld [vmem:[%s7172_s1 + $0x2a0] ss:$16 sps:$4 sm:$0xff]  }
   0x7   :  { %1980 = vmatpush1.bf16.msra.mxu0 %v4682_v6  ;;  %v4690_v12 = vld [vmem:[%s7172_s1 + $0x84] ss:$16 sps:$4 sm:$0xff]   ;;  %v4694_v14 = vld [vmem:[%s7172_s1 + $0x80] ss:$16 sps:$4 sm:$0xff]  }
   0x8   :  { %2093 = vmatpush1.bf16.msra.mxu1 %v4683_v7  ;;  %1981 = vmatprep.subr.bf16.mxu0 %v4684_v8  ;;  %v4692_v13 = vld [vmem:[%s7172_s1 + $0x284] ss:$16 sps:$4 sm:$0xff]   ;;  %v4695_v15 = vld [vmem:[%s7172_s1 + $0x280] ss:$16 sps:$4 sm:$0xff]  }
   0x9   :  { %2094 = vmatprep.subr.bf16.mxu1 %v4686_v9  ;;  %v4696_v16 = vld [vmem:[%s7172_s1 + $0x64] ss:$16 sps:$4 sm:$0xff]   ;;  %v4700_v18 = vld [vmem:[%s7172_s1 + $0x60] ss:$16 sps:$4 sm:$0xff]  }
   0xa   :  { %v4698_v17 = vld [vmem:[%s7172_s1 + $0x264] ss:$16 sps:$4 sm:$0xff]   ;;  %v4701_v19 = vld [vmem:[%s7172_s1 + $0x260] ss:$16 sps:$4 sm:$0xff]  }
   0xb   :  { %1982 = vmatpush1.bf16.msra.mxu0 %v4688_v10  ;;  %v4702_v20 = vld [vmem:[%s7172_s1 + $0x44] ss:$16 sps:$4 sm:$0xff]   ;;  %v4706_v22 = vld [vmem:[%s7172_s1 + $0x40] ss:$16 sps:$4 sm:$0xff]  }
   0xc   :  { %2095 = vmatpush1.bf16.msra.mxu1 %v4689_v11  ;;  %1983 = vmatprep.subr.bf16.mxu0 %v4690_v12  ;;  %v4704_v21 = vld [vmem:[%s7172_s1 + $0x244] ss:$16 sps:$4 sm:$0xff]   ;;  %v4707_v23 = vld [vmem:[%s7172_s1 + $0x240] ss:$16 sps:$4 sm:$0xff]   ;;  %v5446_v12 = vcombine.low %v36_v50, %v40_v51 }
   0xd   :  { %2096 = vmatprep.subr.bf16.mxu1 %v4692_v13  ;;  %v4708_v24 = vld [vmem:[%s7172_s1 + $0x24] ss:$16 sps:$4 sm:$0xff]   ;;  %v4712_v26 = vld [vmem:[%s7172_s1 + $0x20] ss:$16 sps:$4 sm:$0xff]  }
   0xe   :  { %v4710_v25 = vld [vmem:[%s7172_s1 + $0x224] ss:$16 sps:$4 sm:$0xff]   ;;  %v4713_v27 = vld [vmem:[%s7172_s1 + $0x220] ss:$16 sps:$4 sm:$0xff]  }
   0xf   :  { %1984 = vmatpush1.bf16.msra.mxu0 %v4694_v14  ;;  %v4714_v28 = vld [vmem:[%s7172_s1 + $0x4] ss:$16 sps:$4 sm:$0xff]   ;;  %v4718_v30 = vld [vmem:[%s7172_s1] ss:$16 sps:$4 sm:$0xff]   ;;  %v44_v14 = vld [vmem:[%s7173_s0 + $0x48] sm:$0xff] }
  0x10   :  { %2097 = vmatpush1.bf16.msra.mxu1 %v4695_v15  ;;  %1985 = vmatprep.subr.bf16.mxu0 %v4696_v16  ;;  %v4716_v29 = vld [vmem:[%s7172_s1 + $0x204] ss:$16 sps:$4 sm:$0xff]   ;;  %v4719_v31 = vld [vmem:[%s7172_s1 + $0x200] ss:$16 sps:$4 sm:$0xff]   ;;  %v48_v15 = vld [vmem:[%s7173_s0 + $0x68] sm:$0xff] }
  0x11   :  { %2098 = vmatprep.subr.bf16.mxu1 %v4698_v17  ;;  %v4720_v32 = vld [vmem:[%s7172_s1 + $0x1e4] ss:$16 sps:$4 sm:$0xff]   ;;  %v4724_v34 = vld [vmem:[%s7172_s1 + $0x1e0] ss:$16 sps:$4 sm:$0xff]  }
  0x12   :  { %v4722_v33 = vld [vmem:[%s7172_s1 + $0x3e4] ss:$16 sps:$4 sm:$0xff]   ;;  %v4725_v35 = vld [vmem:[%s7172_s1 + $0x3e0] ss:$16 sps:$4 sm:$0xff]  }
  0x13   :  { %1986 = vmatpush1.bf16.msra.mxu0 %v4700_v18  ;;  %v4726_v36 = vld [vmem:[%s7172_s1 + $0x1c4] ss:$16 sps:$4 sm:$0xff]   ;;  %v4730_v38 = vld [vmem:[%s7172_s1 + $0x1c0] ss:$16 sps:$4 sm:$0xff]  }
  0x14   :  { %2099 = vmatpush1.bf16.msra.mxu1 %v4701_v19  ;;  %1987 = vmatprep.subr.bf16.mxu0 %v4702_v20  ;;  %v4728_v37 = vld [vmem:[%s7172_s1 + $0x3c4] ss:$16 sps:$4 sm:$0xff]   ;;  %v4731_v39 = vld [vmem:[%s7172_s1 + $0x3c0] ss:$16 sps:$4 sm:$0xff]   ;;  %v5465_v19 = vcombine.high %v44_v14, %v48_v15 }
  0x15   :  { %2100 = vmatprep.subr.bf16.mxu1 %v4704_v21  ;;  %v4732_v40 = vld [vmem:[%s7172_s1 + $0x1a4] ss:$16 sps:$4 sm:$0xff]   ;;  %v4736_v42 = vld [vmem:[%s7172_s1 + $0x1a0] ss:$16 sps:$4 sm:$0xff]  }
  0x16   :  { %v4734_v41 = vld [vmem:[%s7172_s1 + $0x3a4] ss:$16 sps:$4 sm:$0xff]   ;;  %v4737_v43 = vld [vmem:[%s7172_s1 + $0x3a0] ss:$16 sps:$4 sm:$0xff]  }
  0x17   :  { %1988 = vmatpush1.bf16.msra.mxu0 %v4706_v22  ;;  %v4738_v44 = vld [vmem:[%s7172_s1 + $0x184] ss:$16 sps:$4 sm:$0xff]   ;;  %v4742_v46 = vld [vmem:[%s7172_s1 + $0x180] ss:$16 sps:$4 sm:$0xff]  }
  0x18   :  { %2101 = vmatpush1.bf16.msra.mxu1 %v4707_v23  ;;  %1989 = vmatprep.subr.bf16.mxu0 %v4708_v24  ;;  %v4740_v45 = vld [vmem:[%s7172_s1 + $0x384] ss:$16 sps:$4 sm:$0xff]   ;;  %v4743_v47 = vld [vmem:[%s7172_s1 + $0x380] ss:$16 sps:$4 sm:$0xff]  }
  0x19   :  { %2102 = vmatprep.subr.bf16.mxu1 %v4710_v25  ;;  %v35_v48 = vld [vmem:[%s7173_s0] sm:$0xff] }
  0x1a   :  { %v39_v49 = vld [vmem:[%s7173_s0 + $0x20] sm:$0xff] }
  0x1b   :  { %1990 = vmatpush1.bf16.msra.mxu0 %v4712_v26  ;;  %v4744_v52 = vld [vmem:[%s7172_s1 + $0x164] ss:$16 sps:$4 sm:$0xff]   ;;  %v5378_v53 = vcombine.high %v35_v48, %v39_v49  ;;  %v4748_v56 = vld [vmem:[%s7172_s1 + $0x160] ss:$16 sps:$4 sm:$0xff]   ;;  %v5444_v11 = vcombine.low %v35_v48, %v39_v49 }
  0x1c   :  { %2103 = vmatpush1.bf16.msra.mxu1 %v4713_v27  ;;  %1991 = vmatprep.subr.bf16.mxu0 %v4714_v28  ;;  %v4746_v54 = vld [vmem:[%s7172_s1 + $0x364] ss:$16 sps:$4 sm:$0xff]   ;;  %v4749_v57 = vld [vmem:[%s7172_s1 + $0x360] ss:$16 sps:$4 sm:$0xff]  }
  0x1d   :  { %2104 = vmatprep.subr.bf16.mxu1 %v4716_v29  ;;  %2009 = vmatprep.mubr.bf16.mxu0 %v5378_v53  ;;  %v4750_v58 = vld [vmem:[%s7172_s1 + $0x144] ss:$16 sps:$4 sm:$0xff]   ;;  %v4754_v60 = vld [vmem:[%s7172_s1 + $0x140] ss:$16 sps:$4 sm:$0xff]   ;;  %v5497_v29 = vcombine.low %v44_v14, %v48_v15 }
  0x1e   :  { %v4752_v59 = vld [vmem:[%s7172_s1 + $0x344] ss:$16 sps:$4 sm:$0xff]   ;;  %v4755_v61 = vld [vmem:[%s7172_s1 + $0x340] ss:$16 sps:$4 sm:$0xff]  }
  0x1f   :  { %1992 = vmatpush1.bf16.msra.mxu0 %v4718_v30  ;;  %v4756_v62 = vld [vmem:[%s7172_s1 + $0x124] ss:$16 sps:$4 sm:$0xff]   ;;  %v4760_v0 = vld [vmem:[%s7172_s1 + $0x120] ss:$16 sps:$4 sm:$0xff]   ;;  %v52_v30 = vld [vmem:[%s7173_s0 + $0x88] sm:$0xff] }
  0x20   :  { %2105 = vmatpush1.bf16.msra.mxu1 %v4719_v31  ;;  %1993 = vmatprep.subr.bf16.mxu0 %v4720_v32  ;;  %v4758_v63 = vld [vmem:[%s7172_s1 + $0x324] ss:$16 sps:$4 sm:$0xff]   ;;  %v4761_v1 = vld [vmem:[%s7172_s1 + $0x320] ss:$16 sps:$4 sm:$0xff]   ;;  %v56_v31 = vld [vmem:[%s7173_s0 + $0xa8] sm:$0xff] }
  0x21   :  { %2106 = vmatprep.subr.bf16.mxu1 %v4722_v33  ;;  %v4762_v2 = vld [vmem:[%s7172_s1 + $0x104] ss:$16 sps:$4 sm:$0xff]   ;;  %v4766_v4 = vld [vmem:[%s7172_s1 + $0x100] ss:$16 sps:$4 sm:$0xff]  }
  0x22   :  { %v4764_v3 = vld [vmem:[%s7172_s1 + $0x304] ss:$16 sps:$4 sm:$0xff]   ;;  %v4767_v5 = vld [vmem:[%s7172_s1 + $0x300] ss:$16 sps:$4 sm:$0xff]  }
  0x23   :  { %1994 = vmatpush2.bf16.msra.mxu0 %v4724_v34  ;;  %v4770_v6 = vld [vmem:[%s7172_s1 + $0x4e4] ss:$16 sps:$4 sm:$0xff]   ;;  %v4768_v8 = vld [vmem:[%s7172_s1 + $0x4e0] ss:$16 sps:$4 sm:$0xff]  }
  0x24   :  { %2107 = vmatpush2.bf16.msra.mxu1 %v4725_v35  ;;  %1995 = vmatprep.subr.bf16.mxu0 %v4726_v36  ;;  %v4773_v7 = vld [vmem:[%s7172_s1 + $0x6e4] ss:$16 sps:$4 sm:$0xff]   ;;  %v4771_v9 = vld [vmem:[%s7172_s1 + $0x6e0] ss:$16 sps:$4 sm:$0xff]   ;;  %v5513_v35 = vcombine.high %v52_v30, %v56_v31 }
  0x25   :  { %2108 = vmatprep.subr.bf16.mxu1 %v4728_v37  ;;  %v43_v10 = vld [vmem:[%s7173_s0 + $0x40] sm:$0xff] }
  0x26   :  { %v47_v13 = vld [vmem:[%s7173_s0 + $0x60] sm:$0xff] }
  0x27   :  { %1996 = vmatpush2.bf16.msra.mxu0 %v4730_v38  ;;  %v4776_v16 = vld [vmem:[%s7172_s1 + $0x4c4] ss:$16 sps:$4 sm:$0xff]   ;;  %v5463_v18 = vcombine.high %v43_v10, %v47_v13  ;;  %v4774_v20 = vld [vmem:[%s7172_s1 + $0x4c0] ss:$16 sps:$4 sm:$0xff]   ;;  %v5495_v28 = vcombine.low %v43_v10, %v47_v13 }
  0x28   :  { %2109 = vmatpush2.bf16.msra.mxu1 %v4731_v39  ;;  %1997 = vmatprep.subr.bf16.mxu0 %v4732_v40  ;;  %v4779_v17 = vld [vmem:[%s7172_s1 + $0x6c4] ss:$16 sps:$4 sm:$0xff]   ;;  %v4777_v21 = vld [vmem:[%s7172_s1 + $0x6c0] ss:$16 sps:$4 sm:$0xff]  }
  0x29   :  { %2110 = vmatprep.subr.bf16.mxu1 %v4734_v41  ;;  %v4782_v22 = vld [vmem:[%s7172_s1 + $0x4a4] ss:$16 sps:$4 sm:$0xff]   ;;  %v4780_v24 = vld [vmem:[%s7172_s1 + $0x4a0] ss:$16 sps:$4 sm:$0xff]  }
  0x2a   :  { %v4785_v23 = vld [vmem:[%s7172_s1 + $0x6a4] ss:$16 sps:$4 sm:$0xff]   ;;  %v4783_v25 = vld [vmem:[%s7172_s1 + $0x6a0] ss:$16 sps:$4 sm:$0xff]  }
  0x2b   :  { %1998 = vmatpush2.bf16.msra.mxu0 %v4736_v42  ;;  %v51_v26 = vld [vmem:[%s7173_s0 + $0x80] sm:$0xff] }
  0x2c   :  { %2111 = vmatpush2.bf16.msra.mxu1 %v4737_v43  ;;  %1999 = vmatprep.subr.bf16.mxu0 %v4738_v44  ;;  %v55_v27 = vld [vmem:[%s7173_s0 + $0xa0] sm:$0xff] }
  0x2d   :  { %2112 = vmatprep.subr.bf16.mxu1 %v4740_v45  ;;  %v4788_v32 = vld [vmem:[%s7172_s1 + $0x484] ss:$16 sps:$4 sm:$0xff]   ;;  %v5511_v34 = vcombine.high %v51_v26, %v55_v27  ;;  %v4786_v36 = vld [vmem:[%s7172_s1 + $0x480] ss:$16 sps:$4 sm:$0xff]   ;;  %v5543_v44 = vcombine.low %v51_v26, %v55_v27  ;;  %v5545_v45 = vcombine.low %v52_v30, %v56_v31 }
  0x2e   :  { %v4791_v33 = vld [vmem:[%s7172_s1 + $0x684] ss:$16 sps:$4 sm:$0xff]   ;;  %v4789_v37 = vld [vmem:[%s7172_s1 + $0x680] ss:$16 sps:$4 sm:$0xff]  }
  0x2f   :  { %2000 = vmatpush2.bf16.msra.mxu0 %v4742_v46  ;;  %v4794_v38 = vld [vmem:[%s7172_s1 + $0x464] ss:$16 sps:$4 sm:$0xff]   ;;  %v4792_v40 = vld [vmem:[%s7172_s1 + $0x460] ss:$16 sps:$4 sm:$0xff]   ;;  %v60_v46 = vld [vmem:[%s7173_s0 + $0xc8] sm:$0xff] }
  0x30   :  { %2113 = vmatpush2.bf16.msra.mxu1 %v4743_v47  ;;  %2001 = vmatprep.subr.bf16.mxu0 %v4744_v52  ;;  %v4797_v39 = vld [vmem:[%s7172_s1 + $0x664] ss:$16 sps:$4 sm:$0xff]   ;;  %v4795_v41 = vld [vmem:[%s7172_s1 + $0x660] ss:$16 sps:$4 sm:$0xff]   ;;  %v64_v47 = vld [vmem:[%s7173_s0 + $0xe8] sm:$0xff] }
  0x31   :  { %2114 = vmatprep.subr.bf16.mxu1 %v4746_v54  ;;  %v59_v42 = vld [vmem:[%s7173_s0 + $0xc0] sm:$0xff]  ;;  %v5561_v51 = vcombine.high %v60_v46, %v64_v47 }
  0x32   :  { %v63_v43 = vld [vmem:[%s7173_s0 + $0xe0] sm:$0xff] }
  0x33   :  { %2002 = vmatpush2.bf16.msra.mxu0 %v4748_v56  ;;  %v4800_v48 = vld [vmem:[%s7172_s1 + $0x444] ss:$16 sps:$4 sm:$0xff]   ;;  %v5559_v50 = vcombine.high %v59_v42, %v63_v43  ;;  %v4798_v52 = vld [vmem:[%s7172_s1 + $0x440] ss:$16 sps:$4 sm:$0xff]  }
  0x34   :  { %2115 = vmatpush2.bf16.msra.mxu1 %v4749_v57  ;;  %2003 = vmatprep.subr.bf16.mxu0 %v4750_v58  ;;  %v4803_v49 = vld [vmem:[%s7172_s1 + $0x644] ss:$16 sps:$4 sm:$0xff]   ;;  %v4801_v54 = vld [vmem:[%s7172_s1 + $0x640] ss:$16 sps:$4 sm:$0xff]  }
  0x35   :  { %2116 = vmatprep.subr.bf16.mxu1 %v4752_v59  ;;  %v4806_v56 = vld [vmem:[%s7172_s1 + $0x424] ss:$16 sps:$4 sm:$0xff]   ;;  %v4804_v58 = vld [vmem:[%s7172_s1 + $0x420] ss:$16 sps:$4 sm:$0xff]  }
  0x36   :  { %v4809_v57 = vld [vmem:[%s7172_s1 + $0x624] ss:$16 sps:$4 sm:$0xff]   ;;  %v4822_v26 = vld [vmem:[%s7172_s1 + $0x5c0] ss:$16 sps:$4 sm:$0xff]  }
  0x37   :  { %2004 = vmatpush2.bf16.msra.mxu0 %v4754_v60  ;;  %v67_v59 = vld [vmem:[%s7173_s0 + $0x100] sm:$0xff] }
  0x38   :  { %2117 = vmatpush2.bf16.msra.mxu1 %v4755_v61  ;;  %2005 = vmatprep.subr.bf16.mxu0 %v4756_v62  ;;  %v71_v60 = vld [vmem:[%s7173_s0 + $0x120] sm:$0xff]  ;;  %v5588_v61 = vcombine.low %v59_v42, %v63_v43  ;;  %v5590_v62 = vcombine.low %v60_v46, %v64_v47 }
  0x39   :  { %2118 = vmatprep.subr.bf16.mxu1 %v4758_v63  ;;  %v68_v63 = vld [vmem:[%s7173_s0 + $0x108] sm:$0xff]  ;;  %v75_v10 = vld [vmem:[%s7173_s0 + $0x140] sm:$0xff]  ;;  %v5633_v14 = vcombine.low %v67_v59, %v71_v60 }
  0x3a   :  { %v79_v13 = vld [vmem:[%s7173_s0 + $0x160] sm:$0xff] }
  0x3b   :  { %2006 = vmatpush2.bf16.msra.mxu0 %v4760_v0  ;;  %v72_v0 = vld [vmem:[%s7173_s0 + $0x128] sm:$0xff]  ;;  %v4825_v27 = vld [vmem:[%s7172_s1 + $0x7c0] ss:$16 sps:$4 sm:$0xff]   ;;  %v4830_v30 = vld [vmem:[%s7172_s1 + $0x5a4] ss:$16 sps:$4 sm:$0xff]  }
  0x3c   :  { %2119 = vmatpush2.bf16.msra.mxu1 %v4761_v1  ;;  %2007 = vmatprep.subr.bf16.mxu0 %v4762_v2  ;;  %v4807_v1 = vld [vmem:[%s7172_s1 + $0x620] ss:$16 sps:$4 sm:$0xff]   ;;  %v4812_v2 = vld [vmem:[%s7172_s1 + $0x404] ss:$16 sps:$4 sm:$0xff]   ;;  %v5635_v15 = vcombine.low %v68_v63, %v72_v0 }
  0x3d   :  { %2120 = vmatprep.subr.bf16.mxu1 %v4764_v3  ;;  %v4815_v3 = vld [vmem:[%s7172_s1 + $0x604] ss:$16 sps:$4 sm:$0xff]  }
  0x3e   :  { %v4833_v31 = vld [vmem:[%s7172_s1 + $0x7a4] ss:$16 sps:$4 sm:$0xff]  }
  0x3f   :  { %2008 = vmatpush2.bf16.msra.mxu0 %v4766_v4  ;;  %v5607_v4 = vcombine.high %v67_v59, %v71_v60  ;;  %v4836_v42 = vld [vmem:[%s7172_s1 + $0x584] ss:$16 sps:$4 sm:$0xff]  }
  0x40   :  { %2121 = vmatpush2.bf16.msra.mxu1 %v4767_v5  ;;  %2203 = vmatprep.subr.bf16.mxu0 %v4770_v6  ;;  %v5609_v5 = vcombine.high %v68_v63, %v72_v0  ;;  %v4810_v6 = vld [vmem:[%s7172_s1 + $0x400] ss:$16 sps:$4 sm:$0xff]   ;;  %v4839_v43 = vld [vmem:[%s7172_s1 + $0x784] ss:$16 sps:$4 sm:$0xff]   ;;  %v92_v0 = vld [vmem:[%s7173_s0 + $0x1c8] sm:$0xff] }
  0x41   :  { %2316 = vmatprep.subr.bf16.mxu1 %v4773_v7  ;;  %v4813_v7 = vld [vmem:[%s7172_s1 + $0x600] ss:$16 sps:$4 sm:$0xff]  }
  0x42   :  { %2010 = vmatmul.mubr.bf16.vlgmr.msra.gmra.mxu0 %v5444_v11  ;;  %v95_v59 = vld [vmem:[%s7173_s0 + $0x1e0] sm:$0xff] }
  0x43   :  { %2123 = vmatmul.mubr.bf16.vlgmr.msra.gmra.mxu1 %v5446_v12  ;;  %2204 = vmatpush1.bf16.msra.mxu0 %v4768_v8  ;;  %v4818_v8 = vld [vmem:[%s7172_s1 + $0x5e4] ss:$16 sps:$4 sm:$0xff]  }
  0x44   :  { %2317 = vmatpush1.bf16.msra.mxu1 %v4771_v9  ;;  %2205 = vmatprep.subr.bf16.mxu0 %v4776_v16  ;;  %v4821_v9 = vld [vmem:[%s7172_s1 + $0x7e4] ss:$16 sps:$4 sm:$0xff]   ;;  %v76_v16 = vld [vmem:[%s7173_s0 + $0x148] sm:$0xff] }
  0x45   :  { %2318 = vmatprep.subr.bf16.mxu1 %v4779_v17  ;;  %2019 = vmatprep.mubr.bf16.mxu0 %v5463_v18  ;;  %v80_v17 = vld [vmem:[%s7173_s0 + $0x168] sm:$0xff] }
  0x46   :  { %2132 = vmatprep.mubr.bf16.mxu1 %v5465_v19 }
  0x47   :  { %2206 = vmatpush1.bf16.msra.mxu0 %v4774_v20  ;;  %v4816_v20 = vld [vmem:[%s7172_s1 + $0x5e0] ss:$16 sps:$4 sm:$0xff]  }
  0x48   :  { %2319 = vmatpush1.bf16.msra.mxu1 %v4777_v21  ;;  %2207 = vmatprep.subr.bf16.mxu0 %v4782_v22  ;;  %v4819_v21 = vld [vmem:[%s7172_s1 + $0x7e0] ss:$16 sps:$4 sm:$0xff]   ;;  %v4824_v22 = vld [vmem:[%s7172_s1 + $0x5c4] ss:$16 sps:$4 sm:$0xff]  }
  0x49   :  { %2320 = vmatprep.subr.bf16.mxu1 %v4785_v23  ;;  %v4827_v23 = vld [vmem:[%s7172_s1 + $0x7c4] ss:$16 sps:$4 sm:$0xff]  }
  0x4a   :  { %2020 = vmatmul.mubr.bf16.gmra.mxu0 %v5495_v28 }
  0x4b   :  { %2133 = vmatmul.mubr.bf16.gmra.mxu1 %v5497_v29  ;;  %2208 = vmatpush1.bf16.msra.mxu0 %v4780_v24  ;;  %v5655_v24 = vcombine.high %v75_v10, %v79_v13 }
  0x4c   :  { %2321 = vmatpush1.bf16.msra.mxu1 %v4783_v25  ;;  %2209 = vmatprep.subr.bf16.mxu0 %v4788_v32  ;;  %v5657_v25 = vcombine.high %v76_v16, %v80_v17  ;;  %v4828_v32 = vld [vmem:[%s7172_s1 + $0x5a0] ss:$16 sps:$4 sm:$0xff]  }
  0x4d   :  { %2322 = vmatprep.subr.bf16.mxu1 %v4791_v33  ;;  %2029 = vmatprep.mubr.bf16.mxu0 %v5511_v34  ;;  %v4831_v33 = vld [vmem:[%s7172_s1 + $0x7a0] ss:$16 sps:$4 sm:$0xff]  }
  0x4e   :  { %2142 = vmatprep.mubr.bf16.mxu1 %v5513_v35 }
  0x4f   :  { %2210 = vmatpush1.bf16.msra.mxu0 %v4786_v36  ;;  %v83_v36 = vld [vmem:[%s7173_s0 + $0x180] sm:$0xff] }
  0x50   :  { %2323 = vmatpush1.bf16.msra.mxu1 %v4789_v37  ;;  %2211 = vmatprep.subr.bf16.mxu0 %v4794_v38  ;;  %v5684_v37 = vcombine.low %v75_v10, %v79_v13  ;;  %v5686_v38 = vcombine.low %v76_v16, %v80_v17  ;;  %v4854_v10 = vld [vmem:[%s7172_s1 + $0x524] ss:$16 sps:$4 sm:$0xff]   ;;  %v4852_v16 = vld [vmem:[%s7172_s1 + $0x520] ss:$16 sps:$4 sm:$0xff]  }
  0x51   :  { %2324 = vmatprep.subr.bf16.mxu1 %v4797_v39  ;;  %v87_v39 = vld [vmem:[%s7173_s0 + $0x1a0] sm:$0xff] }
  0x52   :  { %2030 = vmatmul.mubr.bf16.gmra.mxu0 %v5543_v44  ;;  %v5703_v46 = vcombine.high %v83_v36, %v87_v39  ;;  %v5735_v60 = vcombine.low %v83_v36, %v87_v39  ;;  %v4857_v13 = vld [vmem:[%s7172_s1 + $0x724] ss:$16 sps:$4 sm:$0xff]   ;;  %v4855_v17 = vld [vmem:[%s7172_s1 + $0x720] ss:$16 sps:$4 sm:$0xff]  }
  0x53   :  { %2143 = vmatmul.mubr.bf16.gmra.mxu1 %v5545_v45  ;;  %2212 = vmatpush1.bf16.msra.mxu0 %v4792_v40  ;;  %v84_v40 = vld [vmem:[%s7173_s0 + $0x188] sm:$0xff]  ;;  %v4858_v36 = vld [vmem:[%s7172_s1 + $0x500] ss:$16 sps:$4 sm:$0xff]  }
  0x54   :  { %2325 = vmatpush1.bf16.msra.mxu1 %v4795_v41  ;;  %2213 = vmatprep.subr.bf16.mxu0 %v4800_v48  ;;  %v88_v41 = vld [vmem:[%s7173_s0 + $0x1a8] sm:$0xff]  ;;  %v4834_v48 = vld [vmem:[%s7172_s1 + $0x580] ss:$16 sps:$4 sm:$0xff]  }
  0x55   :  { %2326 = vmatprep.subr.bf16.mxu1 %v4803_v49  ;;  %2039 = vmatprep.mubr.bf16.mxu0 %v5559_v50  ;;  %v5705_v47 = vcombine.high %v84_v40, %v88_v41  ;;  %v4837_v49 = vld [vmem:[%s7172_s1 + $0x780] ss:$16 sps:$4 sm:$0xff]   ;;  %v5737_v63 = vcombine.low %v84_v40, %v88_v41  ;;  %v4866_v40 = vld [vmem:[%s7172_s1 + $0xec] ss:$16 sps:$4 sm:$0xff]  }
  0x56   :  { %2152 = vmatprep.mubr.bf16.mxu1 %v5561_v51  ;;  %v4861_v39 = vld [vmem:[%s7172_s1 + $0x700] ss:$16 sps:$4 sm:$0xff]   ;;  %v4869_v41 = vld [vmem:[%s7172_s1 + $0x2ec] ss:$16 sps:$4 sm:$0xff]  }
  0x57   :  { %2214 = vmatpush1.bf16.msra.mxu0 %v4798_v52  ;;  %v4842_v52 = vld [vmem:[%s7172_s1 + $0x564] ss:$16 sps:$4 sm:$0xff]  }
  0x58   :  { %2327 = vmatpush1.bf16.msra.mxu1 %v4801_v54  ;;  %2215 = vmatprep.subr.bf16.mxu0 %v4806_v56  ;;  %v4845_v54 = vld [vmem:[%s7172_s1 + $0x764] ss:$16 sps:$4 sm:$0xff]   ;;  %v4840_v56 = vld [vmem:[%s7172_s1 + $0x560] ss:$16 sps:$4 sm:$0xff]  }
  0x59   :  { %2328 = vmatprep.subr.bf16.mxu1 %v4809_v57  ;;  %v4843_v57 = vld [vmem:[%s7172_s1 + $0x760] ss:$16 sps:$4 sm:$0xff]  }
  0x5a   :  { %2040 = vmatmul.mubr.bf16.gmra.mxu0 %v5588_v61 }
  0x5b   :  { %2153 = vmatmul.mubr.bf16.gmra.mxu1 %v5590_v62  ;;  %2216 = vmatpush1.bf16.msra.mxu0 %v4804_v58  ;;  %v91_v58 = vld [vmem:[%s7173_s0 + $0x1c0] sm:$0xff] }
  0x5c   :  { %2329 = vmatpush1.bf16.msra.mxu1 %v4807_v1  ;;  %2217 = vmatprep.subr.bf16.mxu0 %v4812_v2  ;;  %v96_v1 = vld [vmem:[%s7173_s0 + $0x1e8] sm:$0xff]  ;;  %v4848_v2 = vld [vmem:[%s7172_s1 + $0x544] ss:$16 sps:$4 sm:$0xff]  }
  0x5d   :  { %2330 = vmatprep.subr.bf16.mxu1 %v4815_v3  ;;  %2049 = vmatprep.mubr.bf16.mxu0 %v5607_v4  ;;  %v4851_v3 = vld [vmem:[%s7172_s1 + $0x744] ss:$16 sps:$4 sm:$0xff]  }
  0x5e   :  { %2162 = vmatprep.mubr.bf16.mxu1 %v5609_v5 }
  0x5f   :  { %2218 = vmatpush1.bf16.msra.mxu0 %v4810_v6  ;;  %v5751_v6 = vcombine.high %v91_v58, %v95_v59 }
  0x60   :  { %2331 = vmatpush1.bf16.msra.mxu1 %v4813_v7  ;;  %2219 = vmatprep.subr.bf16.mxu0 %v4818_v8  ;;  %v5753_v7 = vcombine.high %v92_v0, %v96_v1  ;;  %v4846_v8 = vld [vmem:[%s7172_s1 + $0x540] ss:$16 sps:$4 sm:$0xff]  }
  0x61   :  { %2332 = vmatprep.subr.bf16.mxu1 %v4821_v9  ;;  %v4849_v9 = vld [vmem:[%s7172_s1 + $0x740] ss:$16 sps:$4 sm:$0xff]  }
  0x62   :  { %2050 = vmatmul.mubr.bf16.gmra.mxu0 %v5633_v14 }
  0x63   :  { %2163 = vmatmul.mubr.bf16.gmra.mxu1 %v5635_v15  ;;  %2220 = vmatpush2.bf16.msra.mxu0 %v4816_v20  ;;  %v37_v20 = vld [vmem:[%s7173_s0 + $0x10] sm:$0xff] }
  0x64   :  { %2333 = vmatpush2.bf16.msra.mxu1 %v4819_v21  ;;  %2221 = vmatprep.subr.bf16.mxu0 %v4824_v22  ;;  %v41_v21 = vld [vmem:[%s7173_s0 + $0x30] sm:$0xff]  ;;  %v5783_v22 = vcombine.low %v91_v58, %v95_v59  ;;  %v4872_v58 = vld [vmem:[%s7172_s1 + $0xcc] ss:$16 sps:$4 sm:$0xff]  }
  0x65   :  { %2334 = vmatprep.subr.bf16.mxu1 %v4827_v23  ;;  %2059 = vmatprep.mubr.bf16.mxu0 %v5655_v24  ;;  %v5785_v23 = vcombine.low %v92_v0, %v96_v1  ;;  %v4875_v59 = vld [vmem:[%s7172_s1 + $0x2cc] ss:$16 sps:$4 sm:$0xff]  }
  0x66   :  { %2172 = vmatprep.mubr.bf16.mxu1 %v5657_v25 }
  0x67   :  { %2222 = vmatpush2.bf16.msra.mxu0 %v4822_v26  ;;  %v38_v26 = vld [vmem:[%s7173_s0 + $0x18] sm:$0xff] }
  0x68   :  { %2335 = vmatpush2.bf16.msra.mxu1 %v4825_v27  ;;  %2223 = vmatprep.subr.bf16.mxu0 %v4830_v30  ;;  %v42_v27 = vld [vmem:[%s7173_s0 + $0x38] sm:$0xff]  ;;  %v4860_v30 = vld [vmem:[%s7172_s1 + $0x504] ss:$16 sps:$4 sm:$0xff]  }
  0x69   :  { %2336 = vmatprep.subr.bf16.mxu1 %v4833_v31  ;;  %v4863_v31 = vld [vmem:[%s7172_s1 + $0x704] ss:$16 sps:$4 sm:$0xff]  }
  0x6a   :  { %2060 = vmatmul.mubr.bf16.gmra.mxu0 %v5684_v37 }
  0x6b   :  { %2173 = vmatmul.mubr.bf16.gmra.mxu1 %v5686_v38  ;;  %2224 = vmatpush2.bf16.msra.mxu0 %v4828_v32  ;;  %v5799_v32 = vcombine.high %v37_v20, %v41_v21 }
  0x6c   :  { %2337 = vmatpush2.bf16.msra.mxu1 %v4831_v33  ;;  %2225 = vmatprep.subr.bf16.mxu0 %v4836_v42  ;;  %v5801_v33 = vcombine.high %v38_v26, %v42_v27  ;;  %v4864_v42 = vld [vmem:[%s7172_s1 + $0xe8] ss:$16 sps:$4 sm:$0xff]  }
  0x6d   :  { %2338 = vmatprep.subr.bf16.mxu1 %v4839_v43  ;;  %2069 = vmatprep.mubr.bf16.mxu0 %v5703_v46  ;;  %v45_v43 = vld [vmem:[%s7173_s0 + $0x50] sm:$0xff] }
  0x6e   :  { %2182 = vmatprep.mubr.bf16.mxu1 %v5705_v47 }
  0x6f   :  { %2226 = vmatpush2.bf16.msra.mxu0 %v4834_v48  ;;  %v49_v48 = vld [vmem:[%s7173_s0 + $0x70] sm:$0xff] }
  0x70   :  { %2339 = vmatpush2.bf16.msra.mxu1 %v4837_v49  ;;  %2227 = vmatprep.subr.bf16.mxu0 %v4842_v52  ;;  %v5828_v49 = vcombine.low %v37_v20, %v41_v21  ;;  %v5830_v52 = vcombine.low %v38_v26, %v42_v27  ;;  %v5847_v0 = vcombine.high %v45_v43, %v49_v48  ;;  %v54_v20 = vld [vmem:[%s7173_s0 + $0x98] sm:$0xff] }
  0x71   :  { %2340 = vmatprep.subr.bf16.mxu1 %v4845_v54  ;;  %v46_v54 = vld [vmem:[%s7173_s0 + $0x58] sm:$0xff] }
  0x72   :  { %2070 = vmatmul.mubr.bf16.gmra.mxu0 %v5735_v60  ;;  %v58_v21 = vld [vmem:[%s7173_s0 + $0xb8] sm:$0xff] }
  0x73   :  { %2183 = vmatmul.mubr.bf16.gmra.mxu1 %v5737_v63  ;;  %2228 = vmatpush2.bf16.msra.mxu0 %v4840_v56  ;;  %v50_v56 = vld [vmem:[%s7173_s0 + $0x78] sm:$0xff] }
  0x74   :  { %2341 = vmatpush2.bf16.msra.mxu1 %v4843_v57  ;;  %2229 = vmatprep.subr.bf16.mxu0 %v4848_v2  ;;  %v4867_v57 = vld [vmem:[%s7172_s1 + $0x2e8] ss:$16 sps:$4 sm:$0xff]   ;;  %v5849_v1 = vcombine.high %v46_v54, %v50_v56 }
  0x75   :  { %2342 = vmatprep.subr.bf16.mxu1 %v4851_v3  ;;  %2079 = vmatprep.mubr.bf16.mxu0 %v5751_v6  ;;  %v4870_v2 = vld [vmem:[%s7172_s1 + $0xc8] ss:$16 sps:$4 sm:$0xff]  }
  0x76   :  { %2192 = vmatprep.mubr.bf16.mxu1 %v5753_v7  ;;  %v4873_v3 = vld [vmem:[%s7172_s1 + $0x2c8] ss:$16 sps:$4 sm:$0xff]  }
  0x77   :  { %2230 = vmatpush2.bf16.msra.mxu0 %v4846_v8  ;;  %v4878_v8 = vld [vmem:[%s7172_s1 + $0xac] ss:$16 sps:$4 sm:$0xff]   ;;  %v4876_v26 = vld [vmem:[%s7172_s1 + $0xa8] ss:$16 sps:$4 sm:$0xff]  }
  0x78   :  { %2343 = vmatpush2.bf16.msra.mxu1 %v4849_v9  ;;  %2231 = vmatprep.subr.bf16.mxu0 %v4854_v10  ;;  %v4881_v9 = vld [vmem:[%s7172_s1 + $0x2ac] ss:$16 sps:$4 sm:$0xff]   ;;  %v53_v10 = vld [vmem:[%s7173_s0 + $0x90] sm:$0xff]  ;;  %v4879_v27 = vld [vmem:[%s7172_s1 + $0x2a8] ss:$16 sps:$4 sm:$0xff]  }
  0x79   :  { %2344 = vmatprep.subr.bf16.mxu1 %v4857_v13  ;;  %v57_v13 = vld [vmem:[%s7173_s0 + $0xb0] sm:$0xff] }
  0x7a   :  { %2080 = vmatmul.mubr.bf16.gmra.mxu0 %v5783_v22 }
  0x7b   :  { %2193 = vmatmul.mubr.bf16.gmra.mxu1 %v5785_v23  ;;  %2232 = vmatpush2.bf16.msra.mxu0 %v4852_v16  ;;  %v5873_v16 = vcombine.low %v45_v43, %v49_v48  ;;  %v4893_v43 = vld [vmem:[%s7172_s1 + $0x26c] ss:$16 sps:$4 sm:$0xff]   ;;  %v4888_v48 = vld [vmem:[%s7172_s1 + $0x68] ss:$16 sps:$4 sm:$0xff]  }
  0x7c   :  { %2345 = vmatpush2.bf16.msra.mxu1 %v4855_v17  ;;  %2233 = vmatprep.subr.bf16.mxu0 %v4860_v30  ;;  %v5875_v17 = vcombine.low %v46_v54, %v50_v56  ;;  %v4884_v30 = vld [vmem:[%s7172_s1 + $0x8c] ss:$16 sps:$4 sm:$0xff]   ;;  %v4891_v54 = vld [vmem:[%s7172_s1 + $0x268] ss:$16 sps:$4 sm:$0xff]   ;;  %v61_v56 = vld [vmem:[%s7173_s0 + $0xd0] sm:$0xff] }
  0x7d   :  { %2346 = vmatprep.subr.bf16.mxu1 %v4863_v31  ;;  %2235 = vmatprep.mubr.bf16.mxu0 %v5799_v32  ;;  %v4887_v31 = vld [vmem:[%s7172_s1 + $0x28c] ss:$16 sps:$4 sm:$0xff]  }
  0x7e   :  { %2348 = vmatprep.mubr.bf16.mxu1 %v5801_v33 }
  0x7f   :  { %2234 = vmatpush2.bf16.msra.mxu0 %v4858_v36  ;;  %v5895_v36 = vcombine.high %v53_v10, %v57_v13 }
  0x80   :  { %2347 = vmatpush2.bf16.msra.mxu1 %v4861_v39  ;;  %2429 = vmatprep.subr.bf16.mxu0 %v4866_v40  ;;  %v5897_v39 = vcombine.high %v54_v20, %v58_v21  ;;  %v4882_v40 = vld [vmem:[%s7172_s1 + $0x88] ss:$16 sps:$4 sm:$0xff]  }
  0x81   :  { %2542 = vmatprep.subr.bf16.mxu1 %v4869_v41  ;;  %v4885_v41 = vld [vmem:[%s7172_s1 + $0x288] ss:$16 sps:$4 sm:$0xff]  }
  0x82   :  { %2236 = vmatmul.mubr.bf16.vlgmr.msra.gmra.mxu0 %v5828_v49 }
  0x83   :  { %2349 = vmatmul.mubr.bf16.vlgmr.msra.gmra.mxu1 %v5830_v52  ;;  %2430 = vmatpush1.bf16.msra.mxu0 %v4864_v42  ;;  %v4890_v42 = vld [vmem:[%s7172_s1 + $0x6c] ss:$16 sps:$4 sm:$0xff]  }
  0x84   :  { %2543 = vmatpush1.bf16.msra.mxu1 %v4867_v57  ;;  %2431 = vmatprep.subr.bf16.mxu0 %v4872_v58  ;;  %v5924_v57 = vcombine.low %v53_v10, %v57_v13  ;;  %v5926_v58 = vcombine.low %v54_v20, %v58_v21  ;;  %v4894_v20 = vld [vmem:[%s7172_s1 + $0x48] ss:$16 sps:$4 sm:$0xff]  }
  0x85   :  { %2544 = vmatprep.subr.bf16.mxu1 %v4875_v59  ;;  %2245 = vmatprep.mubr.bf16.mxu0 %v5847_v0  ;;  %v65_v59 = vld [vmem:[%s7173_s0 + $0xf0] sm:$0xff]  ;;  %v4897_v21 = vld [vmem:[%s7172_s1 + $0x248] ss:$16 sps:$4 sm:$0xff]  }
  0x86   :  { %2358 = vmatprep.mubr.bf16.mxu1 %v5849_v1  ;;  %v5943_v10 = vcombine.high %v61_v56, %v65_v59 }
  0x87   :  { %2432 = vmatpush1.bf16.msra.mxu0 %v4870_v2  ;;  %v62_v2 = vld [vmem:[%s7173_s0 + $0xd8] sm:$0xff] }
  0x88   :  { %2545 = vmatpush1.bf16.msra.mxu1 %v4873_v3  ;;  %2433 = vmatprep.subr.bf16.mxu0 %v4878_v8  ;;  %v66_v3 = vld [vmem:[%s7173_s0 + $0xf8] sm:$0xff] }
  0x89   :  { %2546 = vmatprep.subr.bf16.mxu1 %v4881_v9  ;;  %v4896_v8 = vld [vmem:[%s7172_s1 + $0x4c] ss:$16 sps:$4 sm:$0xff]   ;;  %v5945_v13 = vcombine.high %v62_v2, %v66_v3 }
  0x8a   :  { %2246 = vmatmul.mubr.bf16.gmra.mxu0 %v5873_v16  ;;  %v4899_v9 = vld [vmem:[%s7172_s1 + $0x24c] ss:$16 sps:$4 sm:$0xff]  }
  0x8b   :  { %2359 = vmatmul.mubr.bf16.gmra.mxu1 %v5875_v17  ;;  %2434 = vmatpush1.bf16.msra.mxu0 %v4876_v26  ;;  %v4902_v26 = vld [vmem:[%s7172_s1 + $0x2c] ss:$16 sps:$4 sm:$0xff]  }
  0x8c   :  { %2547 = vmatpush1.bf16.msra.mxu1 %v4879_v27  ;;  %2435 = vmatprep.subr.bf16.mxu0 %v4884_v30  ;;  %v4905_v27 = vld [vmem:[%s7172_s1 + $0x22c] ss:$16 sps:$4 sm:$0xff]   ;;  %v4900_v30 = vld [vmem:[%s7172_s1 + $0x28] ss:$16 sps:$4 sm:$0xff]  }
  0x8d   :  { %2548 = vmatprep.subr.bf16.mxu1 %v4887_v31  ;;  %2255 = vmatprep.mubr.bf16.mxu0 %v5895_v36  ;;  %v4903_v31 = vld [vmem:[%s7172_s1 + $0x228] ss:$16 sps:$4 sm:$0xff]  }
  0x8e   :  { %2368 = vmatprep.mubr.bf16.mxu1 %v5897_v39 }
  0x8f   :  { %2436 = vmatpush1.bf16.msra.mxu0 %v4882_v40  ;;  %v69_v40 = vld [vmem:[%s7173_s0 + $0x110] sm:$0xff] }
  0x90   :  { %2549 = vmatpush1.bf16.msra.mxu1 %v4885_v41  ;;  %2437 = vmatprep.subr.bf16.mxu0 %v4890_v42  ;;  %v73_v41 = vld [vmem:[%s7173_s0 + $0x130] sm:$0xff]  ;;  %v5975_v42 = vcombine.low %v61_v56, %v65_v59  ;;  %v4911_v56 = vld [vmem:[%s7172_s1 + $0x20c] ss:$16 sps:$4 sm:$0xff]  }
  0x91   :  { %2550 = vmatprep.subr.bf16.mxu1 %v4893_v43  ;;  %v5977_v43 = vcombine.low %v62_v2, %v66_v3  ;;  %v5991_v59 = vcombine.high %v69_v40, %v73_v41  ;;  %v4906_v3 = vld [vmem:[%s7172_s1 + $0x8] ss:$16 sps:$4 sm:$0xff]  }
  0x92   :  { %2256 = vmatmul.mubr.bf16.gmra.mxu0 %v5924_v57 }
  0x93   :  { %2369 = vmatmul.mubr.bf16.gmra.mxu1 %v5926_v58  ;;  %2438 = vmatpush1.bf16.msra.mxu0 %v4888_v48  ;;  %7197 = vst [vmem:[#allocation3_spill] sm:$0xff] %v5977_v43  ;;  %v70_v48 = vld [vmem:[%s7173_s0 + $0x118] sm:$0xff]  ;;  %7198 = vst [vmem:[#allocation4_spill] sm:$0xff] %v5991_v59 }
  0x94   :  { %2551 = vmatpush1.bf16.msra.mxu1 %v4891_v54  ;;  %2439 = vmatprep.subr.bf16.mxu0 %v4896_v8  ;;  %v74_v54 = vld [vmem:[%s7173_s0 + $0x138] sm:$0xff] }
  0x95   :  { %2552 = vmatprep.subr.bf16.mxu1 %v4899_v9  ;;  %2265 = vmatprep.mubr.bf16.mxu0 %v5943_v10  ;;  %v4908_v8 = vld [vmem:[%s7172_s1 + $0xc] ss:$16 sps:$4 sm:$0xff]   ;;  %v5993_v2 = vcombine.high %v70_v48, %v74_v54  ;;  %v4909_v9 = vld [vmem:[%s7172_s1 + $0x208] ss:$16 sps:$4 sm:$0xff]  }
  0x96   :  { %2378 = vmatprep.mubr.bf16.mxu1 %v5945_v13 }
  0x97   :  { %2440 = vmatpush1.bf16.msra.mxu0 %v4894_v20  ;;  %7199 = vst [vmem:[#allocation5_spill] sm:$0xff] %v5993_v2  ;;  %v4914_v20 = vld [vmem:[%s7172_s1 + $0x1ec] ss:$16 sps:$4 sm:$0xff]  }
  0x98   :  { %2553 = vmatpush1.bf16.msra.mxu1 %v4897_v21  ;;  %2441 = vmatprep.subr.bf16.mxu0 %v4902_v26  ;;  %v4917_v21 = vld [vmem:[%s7172_s1 + $0x3ec] ss:$16 sps:$4 sm:$0xff]   ;;  %v4912_v26 = vld [vmem:[%s7172_s1 + $0x1e8] ss:$16 sps:$4 sm:$0xff]  }
  0x99   :  { %2554 = vmatprep.subr.bf16.mxu1 %v4905_v27  ;;  %v4915_v27 = vld [vmem:[%s7172_s1 + $0x3e8] ss:$16 sps:$4 sm:$0xff]  }
  0x9a   :  { %2266 = vmatmul.mubr.bf16.gmra.mxu0 %v5975_v42 }
  0x9b   :  { %2379 = vmatmul.mubr.bf16.gmra.mxu1 %v5977_v43  ;;  %2442 = vmatpush1.bf16.msra.mxu0 %v4900_v30  ;;  %v77_v30 = vld [vmem:[%s7173_s0 + $0x150] sm:$0xff]  ;;  %v4920_v43 = vld [vmem:[%s7172_s1 + $0x1cc] ss:$16 sps:$4 sm:$0xff]  }
  0x9c   :  { %2555 = vmatpush1.bf16.msra.mxu1 %v4903_v31  ;;  %2443 = vmatprep.subr.bf16.mxu0 %v4908_v8  ;;  %v81_v31 = vld [vmem:[%s7173_s0 + $0x170] sm:$0xff]  ;;  %v6023_v8 = vcombine.low %v69_v40, %v73_v41  ;;  %v4923_v40 = vld [vmem:[%s7172_s1 + $0x3cc] ss:$16 sps:$4 sm:$0xff]  }
  0x9d   :  { %2556 = vmatprep.subr.bf16.mxu1 %v4911_v56  ;;  %2275 = vmatprep.mubr.bf16.mxu0 %v5991_v59  ;;  %v6025_v56 = vcombine.low %v70_v48, %v74_v54  ;;  %v82_v59 = vld [vmem:[%s7173_s0 + $0x178] sm:$0xff]  ;;  %v6039_v41 = vcombine.high %v77_v30, %v81_v31 }
  0x9e   :  { %2388 = vmatprep.mubr.bf16.mxu1 %v5993_v2  ;;  %7200 = vst [vmem:[#allocation6_spill] sm:$0xff] %v6023_v8  ;;  %v78_v2 = vld [vmem:[%s7173_s0 + $0x158] sm:$0xff] }
  0x9f   :  { %7201 = vst [vmem:[#allocation7_spill] sm:$0xff] %v6025_v56  ;;  %2444 = vmatpush1.bf16.msra.mxu0 %v4906_v3  ;;  %7202 = vst [vmem:[#allocation8_spill] sm:$0xff] %v6039_v41  ;;  %v6041_v48 = vcombine.high %v78_v2, %v82_v59  ;;  %v4918_v54 = vld [vmem:[%s7172_s1 + $0x1c8] ss:$16 sps:$4 sm:$0xff]  }
  0xa0   :  { %2557 = vmatpush1.bf16.msra.mxu1 %v4909_v9  ;;  %2445 = vmatprep.subr.bf16.mxu0 %v4914_v20  ;;  %v4921_v3 = vld [vmem:[%s7172_s1 + $0x3c8] ss:$16 sps:$4 sm:$0xff]   ;;  %v4926_v9 = vld [vmem:[%s7172_s1 + $0x1ac] ss:$16 sps:$4 sm:$0xff]  }
  0xa1   :  { %2558 = vmatprep.subr.bf16.mxu1 %v4917_v21  ;;  %7203 = vst [vmem:[#allocation9_spill] sm:$0xff] %v6041_v48  ;;  %v4929_v20 = vld [vmem:[%s7172_s1 + $0x3ac] ss:$16 sps:$4 sm:$0xff]   ;;  %v4924_v21 = vld [vmem:[%s7172_s1 + $0x1a8] ss:$16 sps:$4 sm:$0xff]  }
  0xa2   :  { %2276 = vmatmul.mubr.bf16.gmra.mxu0 %v6023_v8  ;;  %v4932_v8 = vld [vmem:[%s7172_s1 + $0x18c] ss:$16 sps:$4 sm:$0xff]  }
  0xa3   :  { %2389 = vmatmul.mubr.bf16.gmra.mxu1 %v6025_v56  ;;  %2446 = vmatpush2.bf16.msra.mxu0 %v4912_v26  ;;  %v4927_v26 = vld [vmem:[%s7172_s1 + $0x3a8] ss:$16 sps:$4 sm:$0xff]  }
  0xa4   :  { %2559 = vmatpush2.bf16.msra.mxu1 %v4915_v27  ;;  %2447 = vmatprep.subr.bf16.mxu0 %v4920_v43  ;;  %v85_v43 = vld [vmem:[%s7173_s0 + $0x190] sm:$0xff]  ;;  %v90_v56 = vld [vmem:[%s7173_s0 + $0x1b8] sm:$0xff] }
  0xa5   :  { %2560 = vmatprep.subr.bf16.mxu1 %v4923_v40  ;;  %2285 = vmatprep.mubr.bf16.mxu0 %v6039_v41  ;;  %v89_v27 = vld [vmem:[%s7173_s0 + $0x1b0] sm:$0xff]  ;;  %v6071_v40 = vcombine.low %v77_v30, %v81_v31  ;;  %v6073_v41 = vcombine.low %v78_v2, %v82_v59  ;;  %v4935_v59 = vld [vmem:[%s7172_s1 + $0x38c] ss:$16 sps:$4 sm:$0xff]   ;;  %v4930_v31 = vld [vmem:[%s7172_s1 + $0x188] ss:$16 sps:$4 sm:$0xff]  }
  0xa6   :  { %2398 = vmatprep.mubr.bf16.mxu1 %v6041_v48  ;;  %v86_v48 = vld [vmem:[%s7173_s0 + $0x198] sm:$0xff]  ;;  %v6087_v2 = vcombine.high %v85_v43, %v89_v27 }
  0xa7   :  { %7204 = vst [vmem:[#allocation10_spill] sm:$0xff] %v6071_v40  ;;  %7205 = vst [vmem:[#allocation11_spill] sm:$0xff] %v6073_v41  ;;  %2448 = vmatpush2.bf16.msra.mxu0 %v4918_v54  ;;  %v6089_v30 = vcombine.high %v86_v48, %v90_v56  ;;  %v4933_v54 = vld [vmem:[%s7172_s1 + $0x388] ss:$16 sps:$4 sm:$0xff]  }
  0xa8   :  { %2561 = vmatpush2.bf16.msra.mxu1 %v4921_v3  ;;  %2449 = vmatprep.subr.bf16.mxu0 %v4926_v9  ;;  %7206 = vst [vmem:[#allocation12_spill] sm:$0xff] %v6087_v2  ;;  %v4938_v3 = vld [vmem:[%s7172_s1 + $0x16c] ss:$16 sps:$4 sm:$0xff]  }
  0xa9   :  { %2562 = vmatprep.subr.bf16.mxu1 %v4929_v20  ;;  %7207 = vst [vmem:[#allocation13_spill] sm:$0xff] %v6089_v30  ;;  %v4941_v9 = vld [vmem:[%s7172_s1 + $0x36c] ss:$16 sps:$4 sm:$0xff]   ;;  %v4936_v20 = vld [vmem:[%s7172_s1 + $0x168] ss:$16 sps:$4 sm:$0xff]  }
  0xaa   :  { %2286 = vmatmul.mubr.bf16.gmra.mxu0 %v6071_v40  ;;  %v4944_v40 = vld [vmem:[%s7172_s1 + $0x14c] ss:$16 sps:$4 sm:$0xff]  }
  0xab   :  { %2399 = vmatmul.mubr.bf16.gmra.mxu1 %v6073_v41  ;;  %2450 = vmatpush2.bf16.msra.mxu0 %v4924_v21  ;;  %v4939_v21 = vld [vmem:[%s7172_s1 + $0x368] ss:$16 sps:$4 sm:$0xff]  }
  0xac   :  { %2563 = vmatpush2.bf16.msra.mxu1 %v4927_v26  ;;  %2451 = vmatprep.subr.bf16.mxu0 %v4932_v8  ;;  %v93_v8 = vld [vmem:[%s7173_s0 + $0x1d0] sm:$0xff]  ;;  %v98_v41 = vld [vmem:[%s7173_s0 + $0x1f8] sm:$0xff] }
  0xad   :  { %2564 = vmatprep.subr.bf16.mxu1 %v4935_v59  ;;  %2295 = vmatprep.mubr.bf16.mxu0 %v6087_v2  ;;  %v97_v26 = vld [vmem:[%s7173_s0 + $0x1f0] sm:$0xff]  ;;  %v6119_v59 = vcombine.low %v85_v43, %v89_v27  ;;  %v6121_v2 = vcombine.low %v86_v48, %v90_v56  ;;  %v4947_v56 = vld [vmem:[%s7172_s1 + $0x34c] ss:$16 sps:$4 sm:$0xff]   ;;  %v4942_v27 = vld [vmem:[%s7172_s1 + $0x148] ss:$16 sps:$4 sm:$0xff]  }
  0xae   :  { %2408 = vmatprep.mubr.bf16.mxu1 %v6089_v30  ;;  %v94_v30 = vld [vmem:[%s7173_s0 + $0x1d8] sm:$0xff]  ;;  %v6135_v48 = vcombine.high %v93_v8, %v97_v26 }
  0xaf   :  { %7208 = vst [vmem:[#allocation14_spill] sm:$0xff] %v6121_v2  ;;  %2452 = vmatpush2.bf16.msra.mxu0 %v4930_v31  ;;  %v6137_v43 = vcombine.high %v94_v30, %v98_v41  ;;  %v4945_v31 = vld [vmem:[%s7172_s1 + $0x348] ss:$16 sps:$4 sm:$0xff]  }
  0xb0   :  { %2565 = vmatpush2.bf16.msra.mxu1 %v4933_v54  ;;  %2453 = vmatprep.subr.bf16.mxu0 %v4938_v3  ;;  %v4950_v54 = vld [vmem:[%s7172_s1 + $0x12c] ss:$16 sps:$4 sm:$0xff]  }
  0xb1   :  { %2566 = vmatprep.subr.bf16.mxu1 %v4941_v9  ;;  %v4953_v3 = vld [vmem:[%s7172_s1 + $0x32c] ss:$16 sps:$4 sm:$0xff]   ;;  %v6155_v9 = vcombine.low %v93_v8, %v97_v26  ;;  %v4957_v8 = vld [vmem:[%s7172_s1 + $0x308] ss:$16 sps:$4 sm:$0xff]  }
  0xb2   :  { %2296 = vmatmul.mubr.bf16.gmra.mxu0 %v6119_v59  ;;  %v4962_v26 = vld [vmem:[%s7172_s1 + $0x4ec] ss:$16 sps:$4 sm:$0xff]  }
  0xb3   :  { %2409 = vmatmul.mubr.bf16.gmra.mxu1 %v6121_v2  ;;  %2454 = vmatpush2.bf16.msra.mxu0 %v4936_v20  ;;  %v6157_v2 = vcombine.low %v94_v30, %v98_v41  ;;  %v4948_v20 = vld [vmem:[%s7172_s1 + $0x128] ss:$16 sps:$4 sm:$0xff]   ;;  %v4959_v41 = vld [vmem:[%s7172_s1 + $0x30c] ss:$16 sps:$4 sm:$0xff]  }
  0xb4   :  { %2567 = vmatpush2.bf16.msra.mxu1 %v4939_v21  ;;  %2455 = vmatprep.subr.bf16.mxu0 %v4944_v40  ;;  %v4951_v40 = vld [vmem:[%s7172_s1 + $0x328] ss:$16 sps:$4 sm:$0xff]   ;;  %v4956_v21 = vld [vmem:[%s7172_s1 + $0x10c] ss:$16 sps:$4 sm:$0xff]  }
  0xb5   :  { %2568 = vmatprep.subr.bf16.mxu1 %v4947_v56  ;;  %2305 = vmatprep.mubr.bf16.mxu0 %v6135_v48  ;;  %v4954_v30 = vld [vmem:[%s7172_s1 + $0x108] ss:$16 sps:$4 sm:$0xff]   ;;  %v4965_v56 = vld [vmem:[%s7172_s1 + $0x6ec] ss:$16 sps:$4 sm:$0xff]  }
  0xb6   :  { %2418 = vmatprep.mubr.bf16.mxu1 %v6137_v43 }
  0xb7   :  { %2456 = vmatpush2.bf16.msra.mxu0 %v4942_v27  ;;  %v4960_v27 = vld [vmem:[%s7172_s1 + $0x4e8] ss:$16 sps:$4 sm:$0xff]  }
  0xb8   :  { %2569 = vmatpush2.bf16.msra.mxu1 %v4945_v31  ;;  %2457 = vmatprep.subr.bf16.mxu0 %v4950_v54  ;;  %v4963_v31 = vld [vmem:[%s7172_s1 + $0x6e8] ss:$16 sps:$4 sm:$0xff]   ;;  %v4968_v54 = vld [vmem:[%s7172_s1 + $0x4cc] ss:$16 sps:$4 sm:$0xff]  }
  0xb9   :  { %2570 = vmatprep.subr.bf16.mxu1 %v4953_v3  ;;  %v4969_v3 = vld [vmem:[%s7172_s1 + $0x6c8] ss:$16 sps:$4 sm:$0xff]  }
  0xba   :  { %2306 = vmatmul.mubr.bf16.gmra.mxu0 %v6155_v9 }
  0xbb   :  { %2419 = vmatmul.mubr.bf16.gmra.mxu1 %v6157_v2  ;;  %2458 = vmatpush2.bf16.msra.mxu0 %v4948_v20  ;;  %v4974_v20 = vld [vmem:[%s7172_s1 + $0x4ac] ss:$16 sps:$4 sm:$0xff]  }
  0xbc   :  { %2571 = vmatpush2.bf16.msra.mxu1 %v4951_v40  ;;  %2459 = vmatprep.subr.bf16.mxu0 %v4956_v21  ;;  %v4975_v40 = vld [vmem:[%s7172_s1 + $0x6a8] ss:$16 sps:$4 sm:$0xff]   ;;  %v4980_v21 = vld [vmem:[%s7172_s1 + $0x48c] ss:$16 sps:$4 sm:$0xff]  }
  0xbd   :  { %2572 = vmatprep.subr.bf16.mxu1 %v4959_v41  ;;  %2461 = vmatprep.mubr.bf16.mxu0 %v5378_v53  ;;  %v4971_v53 = vld [vmem:[%s7172_s1 + $0x6cc] ss:$16 sps:$4 sm:$0xff]   ;;  %v4981_v41 = vld [vmem:[%s7172_s1 + $0x688] ss:$16 sps:$4 sm:$0xff]  }
  0xbe   :  { %2574 = vmatprep.mubr.bf16.mxu1 %v5383_v55  ;;  %v4966_v55 = vld [vmem:[%s7172_s1 + $0x4c8] ss:$16 sps:$4 sm:$0xff]  }
  0xbf   :  { %2460 = vmatpush2.bf16.msra.mxu0 %v4954_v30  ;;  %v4986_v30 = vld [vmem:[%s7172_s1 + $0x46c] ss:$16 sps:$4 sm:$0xff]  }
  0xc0   :  { %2573 = vmatpush2.bf16.msra.mxu1 %v4957_v8  ;;  %2655 = vmatprep.subr.bf16.mxu0 %v4962_v26  ;;  %v4987_v8 = vld [vmem:[%s7172_s1 + $0x668] ss:$16 sps:$4 sm:$0xff]   ;;  %v4992_v26 = vld [vmem:[%s7172_s1 + $0x44c] ss:$16 sps:$4 sm:$0xff]  }
  0xc1   :  { %2768 = vmatprep.subr.bf16.mxu1 %v4965_v56  ;;  %v4993_v56 = vld [vmem:[%s7172_s1 + $0x648] ss:$16 sps:$4 sm:$0xff]  }
  0xc2   :  { %2462 = vmatmul.mubr.bf16.vlgmr.msra.gmra.mxu0 %v5444_v11  ;;  %v4977_v11 = vld [vmem:[%s7172_s1 + $0x6ac] ss:$16 sps:$4 sm:$0xff]  }
  0xc3   :  { %2575 = vmatmul.mubr.bf16.vlgmr.msra.gmra.mxu1 %v5446_v12  ;;  %2656 = vmatpush1.bf16.msra.mxu0 %v4960_v27  ;;  %v4972_v12 = vld [vmem:[%s7172_s1 + $0x4a8] ss:$16 sps:$4 sm:$0xff]   ;;  %v4998_v27 = vld [vmem:[%s7172_s1 + $0x42c] ss:$16 sps:$4 sm:$0xff]  }
  0xc4   :  { %2769 = vmatpush1.bf16.msra.mxu1 %v4963_v31  ;;  %2657 = vmatprep.subr.bf16.mxu0 %v4968_v54  ;;  %v4999_v31 = vld [vmem:[%s7172_s1 + $0x628] ss:$16 sps:$4 sm:$0xff]   ;;  %v5004_v54 = vld [vmem:[%s7172_s1 + $0x40c] ss:$16 sps:$4 sm:$0xff]  }
  0xc5   :  { %2770 = vmatprep.subr.bf16.mxu1 %v4971_v53  ;;  %2471 = vmatprep.mubr.bf16.mxu0 %v5463_v18  ;;  %v4983_v18 = vld [vmem:[%s7172_s1 + $0x68c] ss:$16 sps:$4 sm:$0xff]  }
  0xc6   :  { %2584 = vmatprep.mubr.bf16.mxu1 %v5465_v19  ;;  %v4978_v19 = vld [vmem:[%s7172_s1 + $0x488] ss:$16 sps:$4 sm:$0xff]   ;;  %v5007_v53 = vld [vmem:[%s7172_s1 + $0x60c] ss:$16 sps:$4 sm:$0xff]  }
  0xc7   :  { %2658 = vmatpush1.bf16.msra.mxu0 %v4966_v55  ;;  %v5010_v55 = vld [vmem:[%s7172_s1 + $0x5ec] ss:$16 sps:$4 sm:$0xff]  }
  0xc8   :  { %2771 = vmatpush1.bf16.msra.mxu1 %v4969_v3  ;;  %2659 = vmatprep.subr.bf16.mxu0 %v4974_v20  ;;  %v5013_v3 = vld [vmem:[%s7172_s1 + $0x7ec] ss:$16 sps:$4 sm:$0xff]  }
  0xc9   :  { %2772 = vmatprep.subr.bf16.mxu1 %v4977_v11  ;;  %v5016_v20 = vld [vmem:[%s7172_s1 + $0x5cc] ss:$16 sps:$4 sm:$0xff]   ;;  %v5017_v11 = vld [vmem:[%s7172_s1 + $0x7c8] ss:$16 sps:$4 sm:$0xff]  }
  0xca   :  { %2472 = vmatmul.mubr.bf16.gmra.mxu0 %v5495_v28  ;;  %v4989_v28 = vld [vmem:[%s7172_s1 + $0x66c] ss:$16 sps:$4 sm:$0xff]  }
  0xcb   :  { %2585 = vmatmul.mubr.bf16.gmra.mxu1 %v5497_v29  ;;  %2660 = vmatpush1.bf16.msra.mxu0 %v4972_v12  ;;  %v4984_v29 = vld [vmem:[%s7172_s1 + $0x468] ss:$16 sps:$4 sm:$0xff]   ;;  %v5022_v12 = vld [vmem:[%s7172_s1 + $0x5ac] ss:$16 sps:$4 sm:$0xff]  }
  0xcc   :  { %2773 = vmatpush1.bf16.msra.mxu1 %v4975_v40  ;;  %2661 = vmatprep.subr.bf16.mxu0 %v4980_v21  ;;  %v5023_v40 = vld [vmem:[%s7172_s1 + $0x7a8] ss:$16 sps:$4 sm:$0xff]   ;;  %v5028_v21 = vld [vmem:[%s7172_s1 + $0x58c] ss:$16 sps:$4 sm:$0xff]  }
  0xcd   :  { %2774 = vmatprep.subr.bf16.mxu1 %v4983_v18  ;;  %2481 = vmatprep.mubr.bf16.mxu0 %v5511_v34  ;;  %v4995_v34 = vld [vmem:[%s7172_s1 + $0x64c] ss:$16 sps:$4 sm:$0xff]   ;;  %v5029_v18 = vld [vmem:[%s7172_s1 + $0x788] ss:$16 sps:$4 sm:$0xff]  }
  0xce   :  { %2594 = vmatprep.mubr.bf16.mxu1 %v5513_v35  ;;  %v4990_v35 = vld [vmem:[%s7172_s1 + $0x448] ss:$16 sps:$4 sm:$0xff]  }
  0xcf   :  { %2662 = vmatpush1.bf16.msra.mxu0 %v4978_v19  ;;  %v5034_v19 = vld [vmem:[%s7172_s1 + $0x56c] ss:$16 sps:$4 sm:$0xff]  }
  0xd0   :  { %2775 = vmatpush1.bf16.msra.mxu1 %v4981_v41  ;;  %2663 = vmatprep.subr.bf16.mxu0 %v4986_v30  ;;  %v5035_v41 = vld [vmem:[%s7172_s1 + $0x768] ss:$16 sps:$4 sm:$0xff]   ;;  %v5040_v30 = vld [vmem:[%s7172_s1 + $0x54c] ss:$16 sps:$4 sm:$0xff]  }
  0xd1   :  { %2776 = vmatprep.subr.bf16.mxu1 %v4989_v28  ;;  %v5041_v28 = vld [vmem:[%s7172_s1 + $0x748] ss:$16 sps:$4 sm:$0xff]  }
  0xd2   :  { %2482 = vmatmul.mubr.bf16.gmra.mxu0 %v5543_v44  ;;  %v5001_v44 = vld [vmem:[%s7172_s1 + $0x62c] ss:$16 sps:$4 sm:$0xff]  }
  0xd3   :  { %2595 = vmatmul.mubr.bf16.gmra.mxu1 %v5545_v45  ;;  %2664 = vmatpush1.bf16.msra.mxu0 %v4984_v29  ;;  %v4996_v45 = vld [vmem:[%s7172_s1 + $0x428] ss:$16 sps:$4 sm:$0xff]   ;;  %v357_v29 = vlaneseq }
  0xd4   :  { %2777 = vmatpush1.bf16.msra.mxu1 %v4987_v8  ;;  %2665 = vmatprep.subr.bf16.mxu0 %v4992_v26  ;;  %v5046_v8 = vld [vmem:[%s7172_s1 + $0x52c] ss:$16 sps:$4 sm:$0xff]   ;;  %v5047_v26 = vld [vmem:[%s7172_s1 + $0x728] ss:$16 sps:$4 sm:$0xff]  }
  0xd5   :  { %2778 = vmatprep.subr.bf16.mxu1 %v4995_v34  ;;  %2491 = vmatprep.mubr.bf16.mxu0 %v5559_v50  ;;  %v5002_v50 = vld [vmem:[%s7172_s1 + $0x408] ss:$16 sps:$4 sm:$0xff]   ;;  %v6389_v34 = vshrl.u32 %v357_v29, 7 }
  0xd6   :  { %2604 = vmatprep.mubr.bf16.mxu1 %v5561_v51  ;;  %v5005_v51 = vld [vmem:[%s7172_s1 + $0x608] ss:$16 sps:$4 sm:$0xff]  }
  0xd7   :  { %2666 = vmatpush1.bf16.msra.mxu0 %v4990_v35  ;;  %v5050_v35 = vld [vmem:[%s7172_s1 + $0x508] ss:$16 sps:$4 sm:$0xff]  }
  0xd8   :  { %2779 = vmatpush1.bf16.msra.mxu1 %v4993_v56  ;;  %2667 = vmatprep.subr.bf16.mxu0 %v4998_v27  ;;  %v5053_v56 = vld [vmem:[%s7172_s1 + $0x708] ss:$16 sps:$4 sm:$0xff]   ;;  %v6406_v27 = vsub.s32 0, %v6389_v34 }
  0xd9   :  { %2780 = vmatprep.subr.bf16.mxu1 %v5001_v44  ;;  %v7194_v44 = vsub.s32 1, %v6389_v34 }
  0xda   :  { %2492 = vmatmul.mubr.bf16.gmra.mxu0 %v5588_v61  ;;  %v5008_v61 = vld [vmem:[%s7172_s1 + $0x5e8] ss:$16 sps:$4 sm:$0xff]   ;;  %7209 = vst [vmem:[#allocation15_spill] sm:$0xff] %v6406_v27 }
  0xdb   :  { %2605 = vmatmul.mubr.bf16.gmra.mxu1 %v5590_v62  ;;  %2668 = vmatpush1.bf16.msra.mxu0 %v4996_v45  ;;  %v5011_v62 = vld [vmem:[%s7172_s1 + $0x7e8] ss:$16 sps:$4 sm:$0xff]  }
  0xdc   :  { %2781 = vmatpush1.bf16.msra.mxu1 %v4999_v31  ;;  %2669 = vmatprep.subr.bf16.mxu0 %v5004_v54  ;;  %v5056_v31 = vld [vmem:[%s7174_s3 + $0x70] ss:$8 sps:$4 sm:$0xff]  }
  0xdd   :  { %2782 = vmatprep.subr.bf16.mxu1 %v5007_v53  ;;  %2501 = vmatprep.mubr.bf16.mxu0 %v5607_v4  ;;  %v5019_v4 = vld [vmem:[%s7172_s1 + $0x7cc] ss:$16 sps:$4 sm:$0xff]  }
  0xde   :  { %2614 = vmatprep.mubr.bf16.mxu1 %v5609_v5  ;;  %v5014_v5 = vld [vmem:[%s7172_s1 + $0x5c8] ss:$16 sps:$4 sm:$0xff]  }
  0xdf   :  { %2670 = vmatpush1.bf16.msra.mxu0 %v5002_v50 }
  0xe0   :  { %2783 = vmatpush1.bf16.msra.mxu1 %v5005_v51  ;;  %2671 = vmatprep.subr.bf16.mxu0 %v5010_v55 }
  0xe1   :  { %2784 = vmatprep.subr.bf16.mxu1 %v5013_v3  ;;  %v5059_v3 = vld [vmem:[%s7174_s3 + $0x60] ss:$8 sps:$4 sm:$0xff]  }
  0xe2   :  { %2502 = vmatmul.mubr.bf16.gmra.mxu0 %v5633_v14  ;;  %v5025_v14 = vld [vmem:[%s7172_s1 + $0x7ac] ss:$16 sps:$4 sm:$0xff]  }
  0xe3   :  { %2615 = vmatmul.mubr.bf16.gmra.mxu1 %v5635_v15  ;;  %2672 = vmatpush2.bf16.msra.mxu0 %v5008_v61  ;;  %v5020_v15 = vld [vmem:[%s7172_s1 + $0x5a8] ss:$16 sps:$4 sm:$0xff]  }
  0xe4   :  { %2785 = vmatpush2.bf16.msra.mxu1 %v5011_v62  ;;  %2673 = vmatprep.subr.bf16.mxu0 %v5016_v20 }
  0xe5   :  { %2786 = vmatprep.subr.bf16.mxu1 %v5019_v4  ;;  %2511 = vmatprep.mubr.bf16.mxu0 %v5655_v24  ;;  %v5031_v24 = vld [vmem:[%s7172_s1 + $0x78c] ss:$16 sps:$4 sm:$0xff]  }
  0xe6   :  { %2624 = vmatprep.mubr.bf16.mxu1 %v5657_v25  ;;  %v5026_v25 = vld [vmem:[%s7172_s1 + $0x588] ss:$16 sps:$4 sm:$0xff]  }
  0xe7   :  { %2674 = vmatpush2.bf16.msra.mxu0 %v5014_v5  ;;  %v5062_v5 = vld [vmem:[%s7174_s3 + $0x50] ss:$8 sps:$4 sm:$0xff]  }
  0xe8   :  { %2787 = vmatpush2.bf16.msra.mxu1 %v5017_v11  ;;  %2675 = vmatprep.subr.bf16.mxu0 %v5022_v12  ;;  %v5067_v11 = vld [vmem:[%s7174_s3 + $0x44] ss:$8 sps:$4 sm:$0xff]  }
  0xe9   :  { %2788 = vmatprep.subr.bf16.mxu1 %v5025_v14 }
  0xea   :  { %2512 = vmatmul.mubr.bf16.gmra.mxu0 %v5684_v37  ;;  %v5037_v37 = vld [vmem:[%s7172_s1 + $0x76c] ss:$16 sps:$4 sm:$0xff]  }
  0xeb   :  { %2625 = vmatmul.mubr.bf16.gmra.mxu1 %v5686_v38  ;;  %2676 = vmatpush2.bf16.msra.mxu0 %v5020_v15  ;;  %v5032_v38 = vld [vmem:[%s7172_s1 + $0x568] ss:$16 sps:$4 sm:$0xff]  }
  0xec   :  { %2789 = vmatpush2.bf16.msra.mxu1 %v5023_v40  ;;  %2677 = vmatprep.subr.bf16.mxu0 %v5028_v21 }
  0xed   :  { %2790 = vmatprep.subr.bf16.mxu1 %v5031_v24  ;;  %2521 = vmatprep.mubr.bf16.mxu0 %v5703_v46  ;;  %v5043_v46 = vld [vmem:[%s7172_s1 + $0x74c] ss:$16 sps:$4 sm:$0xff]   ;;  %v5065_v24 = vld [vmem:[%s7174_s3 + $0x40] ss:$8 sps:$4 sm:$0xff]  }
  0xee   :  { %2634 = vmatprep.mubr.bf16.mxu1 %v5705_v47  ;;  %v5038_v47 = vld [vmem:[%s7172_s1 + $0x548] ss:$16 sps:$4 sm:$0xff]  }
  0xef   :  { %2678 = vmatpush2.bf16.msra.mxu0 %v5026_v25 }
  0xf0   :  { %2791 = vmatpush2.bf16.msra.mxu1 %v5029_v18  ;;  %2679 = vmatprep.subr.bf16.mxu0 %v5034_v19 }
  0xf1   :  { %2792 = vmatprep.subr.bf16.mxu1 %v5037_v37 }
  0xf2   :  { %2522 = vmatmul.mubr.bf16.gmra.mxu0 %v5735_v60  ;;  %v5049_v60 = vld [vmem:[%s7172_s1 + $0x72c] ss:$16 sps:$4 sm:$0xff]  }
  0xf3   :  { %2635 = vmatmul.mubr.bf16.gmra.mxu1 %v5737_v63  ;;  %2680 = vmatpush2.bf16.msra.mxu0 %v5032_v38  ;;  %v5044_v63 = vld [vmem:[%s7172_s1 + $0x528] ss:$16 sps:$4 sm:$0xff]  }
  0xf4   :  { %2793 = vmatpush2.bf16.msra.mxu1 %v5035_v41  ;;  %2681 = vmatprep.subr.bf16.mxu0 %v5040_v30  ;;  %v5068_v41 = vld [vmem:[%s7174_s3 + $0x30] ss:$8 sps:$4 sm:$0xff]  }
  0xf5   :  { %2794 = vmatprep.subr.bf16.mxu1 %v5043_v46  ;;  %2531 = vmatprep.mubr.bf16.mxu0 %v5751_v6  ;;  %v5052_v6 = vld [vmem:[%s7172_s1 + $0x50c] ss:$16 sps:$4 sm:$0xff]  }
  0xf6   :  { %2644 = vmatprep.mubr.bf16.mxu1 %v5753_v7  ;;  %v5055_v7 = vld [vmem:[%s7172_s1 + $0x70c] ss:$16 sps:$4 sm:$0xff]  }
  0xf7   :  { %2682 = vmatpush2.bf16.msra.mxu0 %v5038_v47  ;;  %v5073_v46 = vld [vmem:[%s7174_s3 + $0x24] ss:$8 sps:$4 sm:$0xff]  }
  0xf8   :  { %2795 = vmatpush2.bf16.msra.mxu1 %v5041_v28  ;;  %2683 = vmatprep.subr.bf16.mxu0 %v5046_v8  ;;  %v5106_v8 = vld [vmem:[%s7174_s3 + $0x174] ss:$8 sps:$4 sm:$0xff]  }
  0xf9   :  { %2796 = vmatprep.subr.bf16.mxu1 %v5049_v60 }
  0xfa   :  { %2532 = vmatmul.mubr.bf16.gmra.mxu0 %v5783_v22  ;;  %v6411_v22 = vld [vmem:[%s7175_s2] sm:$0xf] }
  0xfb   :  { %2645 = vmatmul.mubr.bf16.gmra.mxu1 %v5785_v23  ;;  %2684 = vmatpush2.bf16.msra.mxu0 %v5044_v63  ;;  %v5058_v23 = vld [vmem:[%s7174_s3 + $0x74] ss:$8 sps:$4 sm:$0xff]   ;;  %v6421_v45 = vrot.slane %v6411_v22, %v6406_v27  ;;  %v6429_v54 = vrot.slane %v6411_v22, %v7194_v44 }
  0xfc   :  { %2797 = vmatpush2.bf16.msra.mxu1 %v5047_v26  ;;  %2685 = vmatprep.subr.bf16.mxu0 %v5052_v6  ;;  %v5071_v26 = vld [vmem:[%s7174_s3 + $0x20] ss:$8 sps:$4 sm:$0xff]  }
  0xfd   :  { %2798 = vmatprep.subr.bf16.mxu1 %v5055_v7  ;;  %2687 = vmatprep.mubr.bf16.mxu0 %v5799_v32  ;;  %v5061_v32 = vld [vmem:[%s7174_s3 + $0x64] ss:$8 sps:$4 sm:$0xff]  }
  0xfe   :  { %2800 = vmatprep.mubr.bf16.mxu1 %v5801_v33 }
  0xff   :  { %2686 = vmatpush2.bf16.msra.mxu0 %v5050_v35 }
 0x100   :  { %2799 = vmatpush2.bf16.msra.mxu1 %v5053_v56  ;;  %3437 = vmatprep.subr.bf16.mxu0 %v5058_v23  ;;  %v5109_v23 = vld [vmem:[%s7174_s3 + $0x164] ss:$8 sps:$4 sm:$0xff]  }
 0x101   :  { %3550 = vmatprep.subr.bf16.mxu1 %v5106_v8 }
 0x102   :  { %v2011_v33 = vpop.f32.mrf.mxu0  ;;  %2688 = vmatmul.mubr.bf16.vlgmr.msra.gmra.mxu0 %v5828_v49  ;;  %v5064_v49 = vld [vmem:[%s7174_s3 + $0x54] ss:$8 sps:$4 sm:$0xff]  }
 0x103   :  { %v2124_v53 = vpop.f32.mrf.mxu1  ;;  %2801 = vmatmul.mubr.bf16.vlgmr.msra.gmra.mxu1 %v5830_v52  ;;  %v2012_v50 = vadd.f32 %v2011_v33, %v6421_v45  ;;  %2697 = vmatprep.mubr.bf16.mxu0 %v5847_v0  ;;  %v5074_v33 = vld [vmem:[%s7174_s3 + $0x10] ss:$8 sps:$4 sm:$0xff]  }
 0x104   :  { %2810 = vmatprep.mubr.bf16.mxu1 %v5849_v1  ;;  %v2013_v51 = vpop.f32.mrf.mxu0  ;;  %3438 = vmatpush1.bf16.msra.mxu0 %v5056_v31 }
 0x105   :  { %v2126_v55 = vpop.f32.mrf.mxu1  ;;  %v6442_v61 = vadd.f32 %v2124_v53, %v2012_v50  ;;  %v2014_v62 = vadd.f32 %v2013_v51, %v6429_v54  ;;  %3439 = vmatprep.subr.bf16.mxu0 %v5061_v32  ;;  %v5107_v53 = vld [vmem:[%s7174_s3 + $0x160] ss:$8 sps:$4 sm:$0xff]   ;;  %v5079_v51 = vld [vmem:[%s7174_s3 + $0x4] ss:$8 sps:$4 sm:$0xff]  }
 0x106   :  { %v6448_v52 = vpop.f32.mrf.mxu0 }
 0x107   :  { %v6450_v0 = vpop.f32.mrf.mxu1  ;;  %v6452_v1 = vadd.f32 %v2126_v55, %v2014_v62  ;;  %v7210_v62 = vld [vmem:[#allocation3_spill] sm:$0xff] }
 0x108   :  { %v6454_v20 = vpop.f32.mrf.mxu0  ;;  %3440 = vmatpush1.bf16.msra.mxu0 %v5059_v3 }
 0x109   :  { %v6456_v4 = vpop.f32.mrf.mxu1  ;;  %3441 = vmatprep.subr.bf16.mxu0 %v5064_v49 }
 0x10a   :  { %v2021_v12 = vpop.f32.mrf.mxu0  ;;  %2698 = vmatmul.mubr.bf16.gmra.mxu0 %v5873_v16  ;;  %v5070_v16 = vld [vmem:[%s7174_s3 + $0x34] ss:$8 sps:$4 sm:$0xff]  }
 0x10b   :  { %v2134_v14 = vpop.f32.mrf.mxu1  ;;  %2811 = vmatmul.mubr.bf16.gmra.mxu1 %v5875_v17  ;;  %v2022_v15 = vadd.f32 %v2021_v12, %v6421_v45  ;;  %2707 = vmatprep.mubr.bf16.mxu0 %v5895_v36  ;;  %v5112_v12 = vld [vmem:[%s7174_s3 + $0x154] ss:$8 sps:$4 sm:$0xff]  }
 0x10c   :  { %2820 = vmatprep.mubr.bf16.mxu1 %v5897_v39  ;;  %v2023_v40 = vpop.f32.mrf.mxu0  ;;  %3442 = vmatpush1.bf16.msra.mxu0 %v5062_v5  ;;  %v7211_v5 = vld [vmem:[#allocation4_spill] sm:$0xff] }
 0x10d   :  { %v2136_v21 = vpop.f32.mrf.mxu1  ;;  %v6472_v25 = vadd.f32 %v2134_v14, %v2022_v15  ;;  %v2024_v18 = vadd.f32 %v2023_v40, %v6429_v54  ;;  %3443 = vmatprep.subr.bf16.mxu0 %v5067_v11  ;;  %v7212_v11 = vld [vmem:[#allocation5_spill] sm:$0xff]  ;;  %v5077_v40 = vld [vmem:[%s7174_s3] ss:$8 sps:$4 sm:$0xff]  }
 0x10e   :  { %v2025_v17 = vpop.f32.mrf.mxu0 }
 0x10f   :  { %v2138_v36 = vpop.f32.mrf.mxu1  ;;  %v6478_v19 = vadd.f32 %v2136_v21, %v2024_v18  ;;  %v2026_v39 = vadd.f32 %v2025_v17, %v6421_v45  ;;  %v5082_v18 = vld [vmem:[%s7174_s3 + $0xf4] ss:$8 sps:$4 sm:$0xff]  }
 0x110   :  { %v6481_v37 = vpop.f32.mrf.mxu0  ;;  %3444 = vmatpush1.bf16.msra.mxu0 %v5065_v24 }
 0x111   :  { %v6483_v38 = vpop.f32.mrf.mxu1  ;;  %v6488_v30 = vadd.f32 %v2138_v36, %v2026_v39  ;;  %3445 = vmatprep.subr.bf16.mxu0 %v5070_v16 }
 0x112   :  { %v2031_v47 = vpop.f32.mrf.mxu0  ;;  %2708 = vmatmul.mubr.bf16.gmra.mxu0 %v5924_v57  ;;  %v5104_v57 = vld [vmem:[%s7174_s3 + $0x170] ss:$8 sps:$4 sm:$0xff]  }
 0x113   :  { %v2144_v28 = vpop.f32.mrf.mxu1  ;;  %2821 = vmatmul.mubr.bf16.gmra.mxu1 %v5926_v58  ;;  %v2032_v29 = vadd.f32 %v2031_v47, %v6421_v45  ;;  %2717 = vmatprep.mubr.bf16.mxu0 %v5943_v10 }
 0x114   :  { %2830 = vmatprep.mubr.bf16.mxu1 %v5945_v13  ;;  %v2033_v60 = vpop.f32.mrf.mxu0  ;;  %3446 = vmatpush1.bf16.msra.mxu0 %v5068_v41  ;;  %v5076_v13 = vld [vmem:[%s7174_s3 + $0x14] ss:$8 sps:$4 sm:$0xff]   ;;  %v5115_v41 = vld [vmem:[%s7174_s3 + $0x144] ss:$8 sps:$4 sm:$0xff]  }
 0x115   :  { %v2146_v63 = vpop.f32.mrf.mxu1  ;;  %v6507_v58 = vadd.f32 %v2144_v28, %v2032_v29  ;;  %v2034_v10 = vadd.f32 %v2033_v60, %v6429_v54  ;;  %3447 = vmatprep.subr.bf16.mxu0 %v5073_v46  ;;  %3551 = vmatpush1.bf16.msra.mxu1 %v5104_v57  ;;  %v5080_v28 = vld [vmem:[%s7174_s3 + $0xf0] ss:$8 sps:$4 sm:$0xff]   ;;  %v5113_v29 = vld [vmem:[%s7174_s3 + $0x140] ss:$8 sps:$4 sm:$0xff]   ;;  %v5085_v60 = vld [vmem:[%s7174_s3 + $0xe4] ss:$8 sps:$4 sm:$0xff]  }
 0x116   :  { %v2035_v6 = vpop.f32.mrf.mxu0  ;;  %3552 = vmatprep.subr.bf16.mxu1 %v5109_v23  ;;  %v7213_v57 = vld [vmem:[#allocation6_spill] sm:$0xff] }
 0x117   :  { %v2148_v7 = vpop.f32.mrf.mxu1  ;;  %v6513_v35 = vadd.f32 %v2146_v63, %v2034_v10  ;;  %v2036_v56 = vadd.f32 %v2035_v6, %v6421_v45  ;;  %v7214_v10 = vld [vmem:[#allocation7_spill] sm:$0xff]  ;;  %v7215_v6 = vld [vmem:[#allocation8_spill] sm:$0xff] }
 0x118   :  { %v6519_v31 = vpop.f32.mrf.mxu0  ;;  %3448 = vmatpush1.bf16.msra.mxu0 %v5071_v26 }
 0x119   :  { %v6521_v32 = vpop.f32.mrf.mxu1  ;;  %v6529_v50 = vadd.f32 %v2148_v7, %v2036_v56  ;;  %3449 = vmatprep.subr.bf16.mxu0 %v5076_v13  ;;  %3553 = vmatpush1.bf16.msra.mxu1 %v5107_v53  ;;  %v7216_v7 = vld [vmem:[#allocation9_spill] sm:$0xff]  ;;  %v5083_v53 = vld [vmem:[%s7174_s3 + $0xe0] ss:$8 sps:$4 sm:$0xff]  }
 0x11a   :  { %v2041_v55 = vpop.f32.mrf.mxu0  ;;  %2718 = vmatmul.mubr.bf16.gmra.mxu0 %v5975_v42  ;;  %v5110_v42 = vld [vmem:[%s7174_s3 + $0x150] ss:$8 sps:$4 sm:$0xff]   ;;  %3554 = vmatprep.subr.bf16.mxu1 %v5112_v12  ;;  %v5118_v56 = vld [vmem:[%s7174_s3 + $0x134] ss:$8 sps:$4 sm:$0xff]  }
 0x11b   :  { %v2154_v3 = vpop.f32.mrf.mxu1  ;;  %2831 = vmatmul.mubr.bf16.gmra.mxu1 %v7210_v62  ;;  %v2042_v49 = vadd.f32 %v2041_v55, %v6421_v45  ;;  %2727 = vmatprep.mubr.bf16.mxu0 %v7211_v5  ;;  %v5088_v62 = vld [vmem:[%s7174_s3 + $0xd4] ss:$8 sps:$4 sm:$0xff]  }
 0x11c   :  { %2840 = vmatprep.mubr.bf16.mxu1 %v7212_v11  ;;  %v2043_v14 = vpop.f32.mrf.mxu0  ;;  %3450 = vmatpush1.bf16.msra.mxu0 %v5074_v33 }
 0x11d   :  { %v2156_v15 = vpop.f32.mrf.mxu1  ;;  %v6548_v21 = vadd.f32 %v2154_v3, %v2042_v49  ;;  %v2044_v24 = vadd.f32 %v2043_v14, %v6429_v54  ;;  %3451 = vmatprep.subr.bf16.mxu0 %v5079_v51  ;;  %3555 = vmatpush1.bf16.msra.mxu1 %v5110_v42  ;;  %v5116_v51 = vld [vmem:[%s7174_s3 + $0x130] ss:$8 sps:$4 sm:$0xff]   ;;  %v5121_v14 = vld [vmem:[%s7174_s3 + $0x124] ss:$8 sps:$4 sm:$0xff]  }
 0x11e   :  { %v2045_v16 = vpop.f32.mrf.mxu0  ;;  %3556 = vmatprep.subr.bf16.mxu1 %v5115_v41  ;;  %v5086_v42 = vld [vmem:[%s7174_s3 + $0xd0] ss:$8 sps:$4 sm:$0xff]  }
 0x11f   :  { %v2158_v17 = vpop.f32.mrf.mxu1  ;;  %v6554_v36 = vadd.f32 %v2156_v15, %v2044_v24  ;;  %v2046_v39 = vadd.f32 %v2045_v16, %v6421_v45  ;;  %v5119_v24 = vld [vmem:[%s7174_s3 + $0x120] ss:$8 sps:$4 sm:$0xff]   ;;  %v5091_v16 = vld [vmem:[%s7174_s3 + $0xc4] ss:$8 sps:$4 sm:$0xff]  }
 0x120   :  { %v6560_v46 = vpop.f32.mrf.mxu0  ;;  %3452 = vmatpush1.bf16.msra.mxu0 %v5077_v40  ;;  %v7217_v41 = vld [vmem:[#allocation10_spill] sm:$0xff] }
 0x121   :  { %v6562_v47 = vpop.f32.mrf.mxu1  ;;  %v6570_v8 = vadd.f32 %v2158_v17, %v2046_v39  ;;  %3453 = vmatprep.subr.bf16.mxu0 %v5082_v18  ;;  %3557 = vmatpush1.bf16.msra.mxu1 %v5113_v29 }
 0x122   :  { %v2051_v63 = vpop.f32.mrf.mxu0  ;;  %2728 = vmatmul.mubr.bf16.gmra.mxu0 %v7213_v57  ;;  %3558 = vmatprep.subr.bf16.mxu1 %v5118_v56 }
 0x123   :  { %v2164_v26 = vpop.f32.mrf.mxu1  ;;  %2841 = vmatmul.mubr.bf16.gmra.mxu1 %v7214_v10  ;;  %v2052_v13 = vadd.f32 %v2051_v63, %v6421_v45  ;;  %2737 = vmatprep.mubr.bf16.mxu0 %v7215_v6  ;;  %v7220_v63 = vld [vmem:[#allocation13_spill] sm:$0xff] }
 0x124   :  { %2850 = vmatprep.mubr.bf16.mxu1 %v7216_v7  ;;  %v2053_v23 = vpop.f32.mrf.mxu0  ;;  %3454 = vmatpush2.bf16.msra.mxu0 %v5080_v28  ;;  %v7218_v28 = vld [vmem:[#allocation11_spill] sm:$0xff]  ;;  %v5122_v6 = vld [vmem:[%s7174_s3 + $0x110] ss:$8 sps:$4 sm:$0xff]  }
 0x125   :  { %v2166_v33 = vpop.f32.mrf.mxu1  ;;  %v6589_v55 = vadd.f32 %v2164_v26, %v2052_v13  ;;  %v2054_v3 = vadd.f32 %v2053_v23, %v6429_v54  ;;  %3455 = vmatprep.subr.bf16.mxu0 %v5085_v60  ;;  %3559 = vmatpush1.bf16.msra.mxu1 %v5116_v51  ;;  %v7219_v60 = vld [vmem:[#allocation12_spill] sm:$0xff]  ;;  %v5124_v26 = vld [vmem:[%s7174_s3 + $0x114] ss:$8 sps:$4 sm:$0xff]  }
 0x126   :  { %v2055_v49 = vpop.f32.mrf.mxu0  ;;  %3560 = vmatprep.subr.bf16.mxu1 %v5121_v14  ;;  %v5089_v13 = vld [vmem:[%s7174_s3 + $0xc0] ss:$8 sps:$4 sm:$0xff]   ;;  %v5094_v23 = vld [vmem:[%s7174_s3 + $0xb4] ss:$8 sps:$4 sm:$0xff]  }
 0x127   :  { %v2168_v5 = vpop.f32.mrf.mxu1  ;;  %v6595_v11 = vadd.f32 %v2166_v33, %v2054_v3  ;;  %v2056_v12 = vadd.f32 %v2055_v49, %v6421_v45  ;;  %v5125_v14 = vld [vmem:[%s7174_s3 + $0x100] ss:$8 sps:$4 sm:$0xff]  }
 0x128   :  { %v6601_v15 = vpop.f32.mrf.mxu0  ;;  %3456 = vmatpush2.bf16.msra.mxu0 %v5083_v53 }
 0x129   :  { %v6603_v40 = vpop.f32.mrf.mxu1  ;;  %v6611_v18 = vadd.f32 %v2168_v5, %v2056_v12  ;;  %3457 = vmatprep.subr.bf16.mxu0 %v5088_v62  ;;  %3561 = vmatpush1.bf16.msra.mxu1 %v5119_v24  ;;  %v5127_v62 = vld [vmem:[%s7174_s3 + $0x104] ss:$8 sps:$4 sm:$0xff]   ;;  %v5092_v12 = vld [vmem:[%s7174_s3 + $0xb0] ss:$8 sps:$4 sm:$0xff]  }
 0x12a   :  { %v2061_v17 = vpop.f32.mrf.mxu0  ;;  %2738 = vmatmul.mubr.bf16.gmra.mxu0 %v7217_v41  ;;  %3562 = vmatprep.subr.bf16.mxu1 %v5124_v26  ;;  %v5097_v24 = vld [vmem:[%s7174_s3 + $0xa4] ss:$8 sps:$4 sm:$0xff]  }
 0x12b   :  { %v2174_v39 = vpop.f32.mrf.mxu1  ;;  %2851 = vmatmul.mubr.bf16.gmra.mxu1 %v7218_v28  ;;  %v2062_v29 = vadd.f32 %v2061_v17, %v6421_v45  ;;  %2747 = vmatprep.mubr.bf16.mxu0 %v7219_v60  ;;  %v5130_v28 = vld [vmem:[%s7174_s3 + $0x1f4] ss:$8 sps:$4 sm:$0xff]  }
 0x12c   :  { %2860 = vmatprep.mubr.bf16.mxu1 %v7220_v63  ;;  %v2063_v57 = vpop.f32.mrf.mxu0  ;;  %3458 = vmatpush2.bf16.msra.mxu0 %v5086_v42  ;;  %v5095_v63 = vld [vmem:[%s7174_s3 + $0xa0] ss:$8 sps:$4 sm:$0xff]  }
 0x12d   :  { %v2176_v10 = vpop.f32.mrf.mxu1  ;;  %v6630_v7 = vadd.f32 %v2174_v39, %v2062_v29  ;;  %v2064_v56 = vadd.f32 %v2063_v57, %v6429_v54  ;;  %3459 = vmatprep.subr.bf16.mxu0 %v5091_v16  ;;  %3563 = vmatpush1.bf16.msra.mxu1 %v5122_v6  ;;  %v7221_v39 = vld [vmem:[#allocation14_spill] sm:$0xff] }
 0x12e   :  { %v2065_v33 = vpop.f32.mrf.mxu0  ;;  %3564 = vmatprep.subr.bf16.mxu1 %v5127_v62 }
 0x12f   :  { %v2178_v53 = vpop.f32.mrf.mxu1  ;;  %v6636_v51 = vadd.f32 %v2176_v10, %v2064_v56  ;;  %v2066_v3 = vadd.f32 %v2065_v33, %v6421_v45  ;;  %v5133_v56 = vld [vmem:[%s7174_s3 + $0x1e4] ss:$8 sps:$4 sm:$0xff]  }
 0x130   :  { %v6642_v49 = vpop.f32.mrf.mxu0  ;;  %3460 = vmatpush2.bf16.msra.mxu0 %v5089_v13 }
 0x131   :  { %v6644_v5 = vpop.f32.mrf.mxu1  ;;  %v6652_v42 = vadd.f32 %v2178_v53, %v2066_v3  ;;  %3461 = vmatprep.subr.bf16.mxu0 %v5094_v23  ;;  %3565 = vmatpush1.bf16.msra.mxu1 %v5125_v14  ;;  %v5098_v53 = vld [vmem:[%s7174_s3 + $0x90] ss:$8 sps:$4 sm:$0xff]   ;;  %v5131_v3 = vld [vmem:[%s7174_s3 + $0x1e0] ss:$8 sps:$4 sm:$0xff]  }
 0x132   :  { %v2071_v16 = vpop.f32.mrf.mxu0  ;;  %2748 = vmatmul.mubr.bf16.gmra.mxu0 %v6119_v59  ;;  %v5128_v59 = vld [vmem:[%s7174_s3 + $0x1f0] ss:$8 sps:$4 sm:$0xff]   ;;  %3566 = vmatprep.subr.bf16.mxu1 %v5130_v28  ;;  %v5101_v28 = vld [vmem:[%s7174_s3 + $0x80] ss:$8 sps:$4 sm:$0xff]  }
 0x133   :  { %v2184_v17 = vpop.f32.mrf.mxu1  ;;  %2861 = vmatmul.mubr.bf16.gmra.mxu1 %v7221_v39  ;;  %v2072_v41 = vadd.f32 %v2071_v16, %v6421_v45  ;;  %2757 = vmatprep.mubr.bf16.mxu0 %v6135_v48 }
 0x134   :  { %2870 = vmatprep.mubr.bf16.mxu1 %v6137_v43  ;;  %v2073_v29 = vpop.f32.mrf.mxu0  ;;  %3462 = vmatpush2.bf16.msra.mxu0 %v5092_v12  ;;  %v5100_v43 = vld [vmem:[%s7174_s3 + $0x94] ss:$8 sps:$4 sm:$0xff]   ;;  %v5103_v12 = vld [vmem:[%s7174_s3 + $0x84] ss:$8 sps:$4 sm:$0xff]  }
 0x135   :  { %v2186_v60 = vpop.f32.mrf.mxu1  ;;  %v6671_v26 = vadd.f32 %v2184_v17, %v2072_v41  ;;  %v2074_v48 = vadd.f32 %v2073_v29, %v6429_v54  ;;  %3463 = vmatprep.subr.bf16.mxu0 %v5097_v24  ;;  %3567 = vmatpush2.bf16.msra.mxu1 %v5128_v59  ;;  %v5136_v17 = vld [vmem:[%s7174_s3 + $0x1d4] ss:$8 sps:$4 sm:$0xff]  }
 0x136   :  { %v2075_v57 = vpop.f32.mrf.mxu0  ;;  %3568 = vmatprep.subr.bf16.mxu1 %v5133_v56  ;;  %v2016_v56 = vadd.f32 %v6448_v52, %v6421_v45 }
 0x137   :  { %v2188_v10 = vpop.f32.mrf.mxu1  ;;  %v6677_v13 = vadd.f32 %v2186_v60, %v2074_v48  ;;  %v2076_v6 = vadd.f32 %v2075_v57, %v6421_v45 }
 0x138   :  { %v6683_v23 = vpop.f32.mrf.mxu0  ;;  %3464 = vmatpush2.bf16.msra.mxu0 %v5095_v63  ;;  %v2129_v52 = vadd.f32 %v6450_v0, %v2016_v56  ;;  %v5143_v0 = vld [vmem:[%s7174_s3 + $0x1a0] ss:$8 sps:$4 sm:$0xff]  }
 0x139   :  { %v6685_v33 = vpop.f32.mrf.mxu1  ;;  %v6693_v62 = vadd.f32 %v2188_v10, %v2076_v6  ;;  %3465 = vmatprep.subr.bf16.mxu0 %v5100_v43  ;;  %3569 = vmatpush2.bf16.msra.mxu1 %v5131_v3  ;;  %v5139_v43 = vld [vmem:[%s7174_s3 + $0x1c4] ss:$8 sps:$4 sm:$0xff]   ;;  %v5137_v6 = vld [vmem:[%s7174_s3 + $0x1c0] ss:$8 sps:$4 sm:$0xff]  }
 0x13a   :  { %v2081_v14 = vpop.f32.mrf.mxu0  ;;  %2758 = vmatmul.mubr.bf16.gmra.mxu0 %v6155_v9  ;;  %v5134_v9 = vld [vmem:[%s7174_s3 + $0x1d0] ss:$8 sps:$4 sm:$0xff]   ;;  %3570 = vmatprep.subr.bf16.mxu1 %v5136_v17 }
 0x13b   :  { %v2194_v24 = vpop.f32.mrf.mxu1  ;;  %2871 = vmatmul.mubr.bf16.gmra.mxu1 %v6157_v2  ;;  %v2082_v16 = vadd.f32 %v2081_v14, %v6421_v45  ;;  %v2018_v14 = vadd.f32 %v6454_v20, %v6429_v54 }
 0x13c   :  { %v2083_v39 = vpop.f32.mrf.mxu0  ;;  %3466 = vmatpush2.bf16.msra.mxu0 %v5098_v53 }
 0x13d   :  { %v2196_v41 = vpop.f32.mrf.mxu1  ;;  %v6710_v29 = vadd.f32 %v2194_v24, %v2082_v16  ;;  %v2084_v2 = vadd.f32 %v2083_v39, %v6429_v54  ;;  %3467 = vmatprep.subr.bf16.mxu0 %v5103_v12  ;;  %3571 = vmatpush2.bf16.msra.mxu1 %v5134_v9  ;;  %v5142_v24 = vld [vmem:[%s7174_s3 + $0x1b4] ss:$8 sps:$4 sm:$0xff]   ;;  %v2131_v9 = vadd.f32 %v6456_v4, %v2018_v14 }
 0x13e   :  { %v2085_v60 = vpop.f32.mrf.mxu0  ;;  %3572 = vmatprep.subr.bf16.mxu1 %v5139_v43  ;;  %v2028_v4 = vadd.f32 %v6481_v37, %v6429_v54 }
 0x13f   :  { %v2198_v63 = vpop.f32.mrf.mxu1  ;;  %v6713_v59 = vadd.f32 %v2196_v41, %v2084_v2  ;;  %v2086_v48 = vadd.f32 %v2085_v60, %v6421_v45  ;;  %v5140_v45 = vld [vmem:[%s7174_s3 + $0x1b0] ss:$8 sps:$4 sm:$0xff]  }
 0x140   :  { %v6719_v57 = vpop.f32.mrf.mxu0  ;;  %3468 = vmatpush2.bf16.msra.mxu0 %v5101_v28 }
 0x141   :  { %v6721_v10 = vpop.f32.mrf.mxu1  ;;  %v6728_v53 = vadd.f32 %v2198_v63, %v2086_v48  ;;  %3573 = vmatpush2.bf16.msra.mxu1 %v5137_v6 }
 0x142   :  { %v2237_v3 = vpop.f32.mrf.mxu0  ;;  %3574 = vmatprep.subr.bf16.mxu1 %v5142_v24 }
 0x143   :  { %7222 = vst [vmem:[#allocation3_spill] sm:$0xff] %v6728_v53  ;;  %v2350_v12 = vpop.f32.mrf.mxu1  ;;  %v2238_v16 = vadd.f32 %v2237_v3, %v6442_v61  ;;  %v5145_v61 = vld [vmem:[%s7174_s3 + $0x1a4] ss:$8 sps:$4 sm:$0xff]  }
 0x144   :  { %v2239_v17 = vpop.f32.mrf.mxu0 }
 0x145   :  { %v2352_v39 = vpop.f32.mrf.mxu1  ;;  %v2240_v41 = vadd.f32 %v2239_v17, %v6452_v1  ;;  %v2351_v63 = vadd.f32 %v2350_v12, %v2238_v16  ;;  %3575 = vmatpush2.bf16.msra.mxu1 %v5140_v45  ;;  %v5148_v16 = vld [vmem:[%s7174_s3 + $0x194] ss:$8 sps:$4 sm:$0xff]  }
 0x146   :  { %v2241_v28 = vpop.f32.mrf.mxu0  ;;  %3576 = vmatprep.subr.bf16.mxu1 %v5145_v61  ;;  %v2141_v61 = vadd.f32 %v6483_v38, %v2028_v4 }
 0x147   :  { %v2354_v20 = vpop.f32.mrf.mxu1  ;;  %v2353_v2 = vadd.f32 %v2352_v39, %v2240_v41  ;;  %v2242_v60 = vadd.f32 %v2241_v28, %v2129_v52  ;;  %v2881_v39 = vmul.f32 0.2, %v2351_v63  ;;  %v5146_v41 = vld [vmem:[%s7174_s3 + $0x190] ss:$8 sps:$4 sm:$0xff]  }
 0x148   :  { %v2243_v48 = vpop.f32.mrf.mxu0 }
 0x149   :  { %v2356_v43 = vpop.f32.mrf.mxu1  ;;  %v2355_v1 = vadd.f32 %v2354_v20, %v2242_v60  ;;  %v2244_v6 = vadd.f32 %v2243_v48, %v2131_v9  ;;  %v2882_v14 = vmul.f32 0.2, %v2353_v2  ;;  %3577 = vmatpush2.bf16.msra.mxu1 %v5143_v0  ;;  %v5151_v0 = vld [vmem:[%s7174_s3 + $0x184] ss:$8 sps:$4 sm:$0xff]  }
 0x14a   :  { %v2247_v56 = vpop.f32.mrf.mxu0  ;;  %3578 = vmatprep.subr.bf16.mxu1 %v5148_v16 }
 0x14b   :  { %v2360_v3 = vpop.f32.mrf.mxu1  ;;  %v2885_v24 = vmul.f32 0.2, %v2355_v1  ;;  %v2357_v17 = vadd.f32 %v2356_v43, %v2244_v6  ;;  %v2248_v12 = vadd.f32 %v2247_v56, %v6472_v25  ;;  %v2946_v48 = vmax.f32 %v2353_v2, %v2882_v14 }
 0x14c   :  { %v2249_v45 = vpop.f32.mrf.mxu0  ;;  %v2945_v6 = vmax.f32 %v2351_v63, %v2881_v39  ;;  %v2038_v63 = vadd.f32 %v6519_v31, %v6429_v54 }
 0x14d   :  { %v2362_v52 = vpop.f32.mrf.mxu1  ;;  %v2886_v37 = vmul.f32 0.2, %v2357_v17  ;;  %v2250_v28 = vadd.f32 %v2249_v45, %v6478_v19  ;;  %v2949_v20 = vmax.f32 %v2355_v1, %v2885_v24  ;;  %v2361_v9 = vadd.f32 %v2360_v3, %v2248_v12  ;;  %3579 = vmatpush2.bf16.msra.mxu1 %v5146_v41  ;;  %v5149_v19 = vld [vmem:[%s7174_s3 + $0x180] ss:$8 sps:$4 sm:$0xff]  }
 0x14e   :  { %v2251_v60 = vpop.f32.mrf.mxu0  ;;  %3580 = vmatprep.subr.bf16.mxu1 %v5151_v0  ;;  %v2151_v31 = vadd.f32 %v6521_v32, %v2038_v63 }
 0x14f   :  { %v2364_v25 = vpop.f32.mrf.mxu1  ;;  %v2950_v43 = vmax.f32 %v2357_v17, %v2886_v37  ;;  %v2363_v56 = vadd.f32 %v2362_v52, %v2250_v28  ;;  %v2252_v44 = vadd.f32 %v2251_v60, %v6488_v30  ;;  %v3009_v38 = vpack.c.bf16 %v2949_v20, %v2945_v6 }
 0x150   :  { %v2253_v27 = vpop.f32.mrf.mxu0  ;;  %v2889_v2 = vmul.f32 0.2, %v2361_v9 }
 0x151   :  { %v2366_v53 = vpop.f32.mrf.mxu1  ;;  %v2254_v1 = vadd.f32 %v2253_v27, %v2141_v61  ;;  %v3010_v3 = vpack.c.bf16 %v2950_v43, %v2946_v48  ;;  %v2365_v4 = vadd.f32 %v2364_v25, %v2252_v44  ;;  %v2890_v12 = vmul.f32 0.2, %v2363_v56  ;;  %3581 = vmatpush2.bf16.msra.mxu1 %v5149_v19 }
 0x152   :  { %v2257_v14 = vpop.f32.mrf.mxu0  ;;  %v2953_v44 = vmax.f32 %v2361_v9, %v2889_v2 }
 0x153   :  { %v2370_v24 = vpop.f32.mrf.mxu1  ;;  %v2367_v17 = vadd.f32 %v2366_v53, %v2254_v1  ;;  %v2258_v30 = vadd.f32 %v2257_v14, %v6507_v58  ;;  %3469 = vmatprep.mubr.bf16.mxu0 %v3010_v3  ;;  %v2893_v16 = vmul.f32 0.2, %v2365_v4  ;;  %v2954_v25 = vmax.f32 %v2363_v56, %v2890_v12 }
 0x154   :  { %v2259_v39 = vpop.f32.mrf.mxu0  ;;  %3470 = vmatmul.mubr.bf16.vlgmr.msra.gmra.mxu0 %v3009_v38 }
 0x155   :  { %v2372_v45 = vpop.f32.mrf.mxu1  ;;  %v2894_v27 = vmul.f32 0.2, %v2367_v17  ;;  %v2371_v52 = vadd.f32 %v2370_v24, %v2258_v30  ;;  %v2260_v41 = vadd.f32 %v2259_v39, %v6513_v35  ;;  %v2957_v37 = vmax.f32 %v2365_v4, %v2893_v16 }
 0x156   :  { %v2261_v28 = vpop.f32.mrf.mxu0  ;;  %v2048_v35 = vadd.f32 %v6560_v46, %v6429_v54 }
 0x157   :  { %v2374_v20 = vpop.f32.mrf.mxu1  ;;  %v2958_v53 = vmax.f32 %v2367_v17, %v2894_v27  ;;  %v2373_v60 = vadd.f32 %v2372_v45, %v2260_v41  ;;  %v2262_v58 = vadd.f32 %v2261_v28, %v6529_v50  ;;  %v3013_v61 = vpack.c.bf16 %v2957_v37, %v2953_v44 }
 0x158   :  { %v2263_v48 = vpop.f32.mrf.mxu0  ;;  %v2897_v0 = vmul.f32 0.2, %v2371_v52  ;;  %v2161_v16 = vadd.f32 %v6562_v47, %v2048_v35 }
 0x159   :  { %v2376_v43 = vpop.f32.mrf.mxu1  ;;  %v2375_v6 = vadd.f32 %v2374_v20, %v2262_v58  ;;  %v2264_v19 = vadd.f32 %v2263_v48, %v2151_v31  ;;  %v3014_v3 = vpack.c.bf16 %v2958_v53, %v2954_v25  ;;  %v2898_v38 = vmul.f32 0.2, %v2373_v60 }
 0x15a   :  { %v2267_v9 = vpop.f32.mrf.mxu0  ;;  %v2961_v14 = vmax.f32 %v2371_v52, %v2897_v0  ;;  %v2058_v58 = vadd.f32 %v6601_v15, %v6429_v54 }
 0x15b   :  { %v2380_v1 = vpop.f32.mrf.mxu1  ;;  %v2901_v2 = vmul.f32 0.2, %v2375_v6  ;;  %v2377_v32 = vadd.f32 %v2376_v43, %v2264_v19  ;;  %v2268_v4 = vadd.f32 %v2267_v9, %v6548_v21  ;;  %3479 = vmatprep.mubr.bf16.mxu0 %v3014_v3  ;;  %v2962_v39 = vmax.f32 %v2373_v60, %v2898_v38 }
 0x15c   :  { %v2269_v50 = vpop.f32.mrf.mxu0  ;;  %3480 = vmatmul.mubr.bf16.gmra.mxu0 %v3013_v61  ;;  %v2171_v3 = vadd.f32 %v6603_v40, %v2058_v58 }
 0x15d   :  { %v2382_v56 = vpop.f32.mrf.mxu1  ;;  %v2965_v24 = vmax.f32 %v2375_v6, %v2901_v2  ;;  %v2902_v63 = vmul.f32 0.2, %v2377_v32  ;;  %v2270_v17 = vadd.f32 %v2269_v50, %v6554_v36  ;;  %v2381_v30 = vadd.f32 %v2380_v1, %v2268_v4 }
 0x15e   :  { %v2271_v12 = vpop.f32.mrf.mxu0 }
 0x15f   :  { %v2384_v46 = vpop.f32.mrf.mxu1  ;;  %v3017_v45 = vpack.c.bf16 %v2965_v24, %v2961_v14  ;;  %v2966_v27 = vmax.f32 %v2377_v32, %v2902_v63  ;;  %v2383_v41 = vadd.f32 %v2382_v56, %v2270_v17  ;;  %v2272_v21 = vadd.f32 %v2271_v12, %v6570_v8 }
 0x160   :  { %v2273_v44 = vpop.f32.mrf.mxu0  ;;  %v2905_v20 = vmul.f32 0.2, %v2381_v30 }
 0x161   :  { %v2386_v37 = vpop.f32.mrf.mxu1  ;;  %v2274_v28 = vadd.f32 %v2273_v44, %v2161_v16  ;;  %v3018_v52 = vpack.c.bf16 %v2966_v27, %v2962_v39  ;;  %v2385_v31 = vadd.f32 %v2384_v46, %v2272_v21  ;;  %v2906_v60 = vmul.f32 0.2, %v2383_v41 }
 0x162   :  { %v2277_v53 = vpop.f32.mrf.mxu0  ;;  %v2969_v19 = vmax.f32 %v2381_v30, %v2905_v20 }
 0x163   :  { %v2390_v36 = vpop.f32.mrf.mxu1  ;;  %v2387_v25 = vadd.f32 %v2386_v37, %v2274_v28  ;;  %v2278_v47 = vadd.f32 %v2277_v53, %v6589_v55  ;;  %3489 = vmatprep.mubr.bf16.mxu0 %v3018_v52  ;;  %v2909_v61 = vmul.f32 0.2, %v2385_v31  ;;  %v2970_v2 = vmax.f32 %v2383_v41, %v2906_v60 }
 0x164   :  { %v2279_v48 = vpop.f32.mrf.mxu0  ;;  %3490 = vmatmul.mubr.bf16.gmra.mxu0 %v3017_v45 }
 0x165   :  { %v2392_v43 = vpop.f32.mrf.mxu1  ;;  %v2910_v8 = vmul.f32 0.2, %v2387_v25  ;;  %v2391_v0 = vadd.f32 %v2390_v36, %v2278_v47  ;;  %v2280_v6 = vadd.f32 %v2279_v48, %v6595_v11  ;;  %v2973_v35 = vmax.f32 %v2385_v31, %v2909_v61 }
 0x166   :  { %v2281_v9 = vpop.f32.mrf.mxu0  ;;  %v2068_v11 = vadd.f32 %v6642_v49, %v6429_v54 }
 0x167   :  { %v2394_v1 = vpop.f32.mrf.mxu1  ;;  %v2974_v15 = vmax.f32 %v2387_v25, %v2910_v8  ;;  %v2393_v38 = vadd.f32 %v2392_v43, %v2280_v6  ;;  %v2282_v55 = vadd.f32 %v2281_v9, %v6611_v18  ;;  %v3021_v32 = vpack.c.bf16 %v2973_v35, %v2969_v19 }
 0x168   :  { %v2283_v4 = vpop.f32.mrf.mxu0  ;;  %v2913_v56 = vmul.f32 0.2, %v2391_v0  ;;  %v2181_v28 = vadd.f32 %v6644_v5, %v2068_v11  ;;  %v2078_v43 = vadd.f32 %v6683_v23, %v6429_v54 }
 0x169   :  { %v2396_v50 = vpop.f32.mrf.mxu1  ;;  %v2395_v14 = vadd.f32 %v2394_v1, %v2282_v55  ;;  %v2284_v24 = vadd.f32 %v2283_v4, %v2171_v3  ;;  %v3022_v30 = vpack.c.bf16 %v2974_v15, %v2970_v2  ;;  %v2914_v12 = vmul.f32 0.2, %v2393_v38 }
 0x16a   :  { %v2287_v63 = vpop.f32.mrf.mxu0  ;;  %v2977_v45 = vmax.f32 %v2391_v0, %v2913_v56  ;;  %v2191_v2 = vadd.f32 %v6685_v33, %v2078_v43 }
 0x16b   :  { %v2400_v17 = vpop.f32.mrf.mxu1  ;;  %v2917_v46 = vmul.f32 0.2, %v2395_v14  ;;  %v2397_v40 = vadd.f32 %v2396_v50, %v2284_v24  ;;  %v2288_v16 = vadd.f32 %v2287_v63, %v6630_v7  ;;  %3499 = vmatprep.mubr.bf16.mxu0 %v3022_v30  ;;  %v2978_v52 = vmax.f32 %v2393_v38, %v2914_v12 }
 0x16c   :  { %v2289_v18 = vpop.f32.mrf.mxu0  ;;  %3500 = vmatmul.mubr.bf16.gmra.mxu0 %v3021_v32 }
 0x16d   :  { %v2402_v39 = vpop.f32.mrf.mxu1  ;;  %v2981_v27 = vmax.f32 %v2395_v14, %v2917_v46  ;;  %v2918_v41 = vmul.f32 0.2, %v2397_v40  ;;  %v2290_v21 = vadd.f32 %v2289_v18, %v6636_v51  ;;  %v2401_v44 = vadd.f32 %v2400_v17, %v2288_v16 }
 0x16e   :  { %v2291_v37 = vpop.f32.mrf.mxu0  ;;  %v367_v46 = vsub.s32 2, %v6389_v34 }
 0x16f   :  { %v2404_v49 = vpop.f32.mrf.mxu1  ;;  %v3025_v20 = vpack.c.bf16 %v2981_v27, %v2977_v45  ;;  %v2982_v31 = vmax.f32 %v2397_v40, %v2918_v41  ;;  %v2403_v53 = vadd.f32 %v2402_v39, %v2290_v21  ;;  %v2292_v7 = vadd.f32 %v2291_v37, %v6652_v42 }
 0x170   :  { %v2293_v36 = vpop.f32.mrf.mxu0  ;;  %v2921_v60 = vmul.f32 0.2, %v2401_v44  ;;  %v371_v45 = vsub.s32 3, %v6389_v34 }
 0x171   :  { %v2406_v58 = vpop.f32.mrf.mxu1  ;;  %v2294_v25 = vadd.f32 %v2293_v36, %v2181_v28  ;;  %v3026_v47 = vpack.c.bf16 %v2982_v31, %v2978_v52  ;;  %v2405_v61 = vadd.f32 %v2404_v49, %v2292_v7  ;;  %v2922_v0 = vmul.f32 0.2, %v2403_v53 }
 0x172   :  { %v2297_v48 = vpop.f32.mrf.mxu0  ;;  %v2985_v3 = vmax.f32 %v2401_v44, %v2921_v60  ;;  %v6804_v28 = vrot.slane %v6411_v22, %v367_v46 }
 0x173   :  { %v2410_v51 = vpop.f32.mrf.mxu1  ;;  %v2407_v8 = vadd.f32 %v2406_v58, %v2294_v25  ;;  %v2298_v5 = vadd.f32 %v2297_v48, %v6671_v26  ;;  %3509 = vmatprep.mubr.bf16.mxu0 %v3026_v47  ;;  %v2925_v6 = vmul.f32 0.2, %v2405_v61  ;;  %v2986_v4 = vmax.f32 %v2403_v53, %v2922_v0  ;;  %v7223_v53 = vld [vmem:[#allocation3_spill] sm:$0xff] }
 0x174   :  { %v2299_v19 = vpop.f32.mrf.mxu0  ;;  %3510 = vmatmul.mubr.bf16.gmra.mxu0 %v3025_v20 }
 0x175   :  { %v2412_v35 = vpop.f32.mrf.mxu1  ;;  %v2926_v42 = vmul.f32 0.2, %v2407_v8  ;;  %v2411_v9 = vadd.f32 %v2410_v51, %v2298_v5  ;;  %v2300_v1 = vadd.f32 %v2299_v19, %v6677_v13  ;;  %v2989_v15 = vmax.f32 %v2405_v61, %v2925_v6 }
 0x176   :  { %v2301_v38 = vpop.f32.mrf.mxu0  ;;  %v2088_v13 = vadd.f32 %v6719_v57, %v6429_v54 }
 0x177   :  { %v2414_v55 = vpop.f32.mrf.mxu1  ;;  %v2990_v23 = vmax.f32 %v2407_v8, %v2926_v42  ;;  %v2413_v32 = vadd.f32 %v2412_v35, %v2300_v1  ;;  %v2302_v26 = vadd.f32 %v2301_v38, %v6693_v62  ;;  %v3029_v50 = vpack.c.bf16 %v2989_v15, %v2985_v3 }
 0x178   :  { %v2303_v56 = vpop.f32.mrf.mxu0  ;;  %v2929_v24 = vmul.f32 0.2, %v2411_v9  ;;  %v2201_v57 = vadd.f32 %v6721_v10, %v2088_v13 }
 0x179   :  { %v2416_v14 = vpop.f32.mrf.mxu1  ;;  %v2415_v11 = vadd.f32 %v2414_v55, %v2302_v26  ;;  %v2304_v63 = vadd.f32 %v2303_v56, %v2191_v2  ;;  %v3030_v12 = vpack.c.bf16 %v2990_v23, %v2986_v4  ;;  %v2930_v33 = vmul.f32 0.2, %v2413_v32 }
 0x17a   :  { %v2307_v17 = vpop.f32.mrf.mxu0  ;;  %v2993_v27 = vmax.f32 %v2411_v9, %v2929_v24 }
 0x17b   :  { %v2420_v30 = vpop.f32.mrf.mxu1  ;;  %v2933_v40 = vmul.f32 0.2, %v2415_v11  ;;  %v2417_v16 = vadd.f32 %v2416_v14, %v2304_v63  ;;  %v2308_v62 = vadd.f32 %v2307_v17, %v6710_v29  ;;  %3519 = vmatprep.mubr.bf16.mxu0 %v3030_v12  ;;  %v2994_v29 = vmax.f32 %v2413_v32, %v2930_v33 }
 0x17c   :  { %v2309_v18 = vpop.f32.mrf.mxu0  ;;  %3520 = vmatmul.mubr.bf16.gmra.mxu0 %v3029_v50 }
 0x17d   :  { %v2422_v39 = vpop.f32.mrf.mxu1  ;;  %v2997_v41 = vmax.f32 %v2415_v11, %v2933_v40  ;;  %v2934_v21 = vmul.f32 0.2, %v2417_v16  ;;  %v2310_v54 = vadd.f32 %v2309_v18, %v6713_v59  ;;  %v2421_v44 = vadd.f32 %v2420_v30, %v2308_v62 }
 0x17e   :  { %v2311_v37 = vpop.f32.mrf.mxu0  ;;  %v6808_v59 = vrot.slane %v6411_v22, %v371_v45 }
 0x17f   :  { %v2424_v49 = vpop.f32.mrf.mxu1  ;;  %v3033_v52 = vpack.c.bf16 %v2997_v41, %v2993_v27  ;;  %v2998_v20 = vmax.f32 %v2417_v16, %v2934_v21  ;;  %v2423_v31 = vadd.f32 %v2422_v39, %v2310_v54  ;;  %v2312_v7 = vadd.f32 %v2311_v37, %v7223_v53 }
 0x180   :  { %v2313_v36 = vpop.f32.mrf.mxu0  ;;  %v2937_v10 = vmul.f32 0.2, %v2421_v44 }
 0x181   :  { %v2426_v58 = vpop.f32.mrf.mxu1  ;;  %v2314_v25 = vadd.f32 %v2313_v36, %v2201_v57  ;;  %v3034_v47 = vpack.c.bf16 %v2998_v20, %v2994_v29  ;;  %v2425_v60 = vadd.f32 %v2424_v49, %v2312_v7  ;;  %v2938_v51 = vmul.f32 0.2, %v2423_v31 }
 0x182   :  { %v2463_v61 = vpop.f32.mrf.mxu0  ;;  %v3001_v22 = vmax.f32 %v2421_v44, %v2937_v10 }
 0x183   :  { %v2576_v48 = vpop.f32.mrf.mxu1  ;;  %v2427_v43 = vadd.f32 %v2426_v58, %v2314_v25  ;;  %v2464_v8 = vadd.f32 %v2463_v61, %v6804_v28  ;;  %3529 = vmatprep.mubr.bf16.mxu0 %v3034_v47  ;;  %v2941_v5 = vmul.f32 0.2, %v2425_v60  ;;  %v3002_v15 = vmax.f32 %v2423_v31, %v2938_v51 }
 0x184   :  { %v2465_v0 = vpop.f32.mrf.mxu0  ;;  %3530 = vmatmul.mubr.bf16.gmra.mxu0 %v3033_v52 }
 0x185   :  { %v2578_v6 = vpop.f32.mrf.mxu1  ;;  %v2942_v19 = vmul.f32 0.2, %v2427_v43  ;;  %v6811_v35 = vadd.f32 %v2576_v48, %v2464_v8  ;;  %v2466_v42 = vadd.f32 %v2465_v0, %v6808_v59  ;;  %v3005_v9 = vmax.f32 %v2425_v60, %v2941_v5 }
 0x186   :  { %v6814_v1 = vpop.f32.mrf.mxu0 }
 0x187   :  { %v6816_v3 = vpop.f32.mrf.mxu1  ;;  %v3006_v38 = vmax.f32 %v2427_v43, %v2942_v19  ;;  %v6818_v55 = vadd.f32 %v2578_v6, %v2466_v42  ;;  %v3037_v2 = vpack.c.bf16 %v3005_v9, %v3001_v22 }
 0x188   :  { %v6820_v23 = vpop.f32.mrf.mxu0 }
 0x189   :  { %v6822_v32 = vpop.f32.mrf.mxu1  ;;  %v3038_v26 = vpack.c.bf16 %v3006_v38, %v3002_v15 }
 0x18a   :  { %v2473_v4 = vpop.f32.mrf.mxu0 }
 0x18b   :  { %v2586_v50 = vpop.f32.mrf.mxu1  ;;  %v2474_v56 = vadd.f32 %v2473_v4, %v6804_v28  ;;  %3539 = vmatprep.mubr.bf16.mxu0 %v3038_v26 }
 0x18c   :  { %v2475_v14 = vpop.f32.mrf.mxu0  ;;  %3540 = vmatmul.mubr.bf16.gmra.mxu0 %v3037_v2 }
 0x18d   :  { %v2588_v24 = vpop.f32.mrf.mxu1  ;;  %v6825_v11 = vadd.f32 %v2586_v50, %v2474_v56  ;;  %v2476_v63 = vadd.f32 %v2475_v14, %v6808_v59 }
 0x18e   :  { %v2477_v13 = vpop.f32.mrf.mxu0 }
 0x18f   :  { %v2590_v17 = vpop.f32.mrf.mxu1  ;;  %v6828_v30 = vadd.f32 %v2588_v24, %v2476_v63  ;;  %v2478_v12 = vadd.f32 %v2477_v13, %v6804_v28 }
 0x190   :  { %v6831_v46 = vpop.f32.mrf.mxu0 }
 0x191   :  { %v6833_v33 = vpop.f32.mrf.mxu1  ;;  %v6835_v40 = vadd.f32 %v2590_v17, %v2478_v12 }
 0x192   :  { %v2483_v16 = vpop.f32.mrf.mxu0 }
 0x193   :  { %v2596_v62 = vpop.f32.mrf.mxu1  ;;  %v2484_v18 = vadd.f32 %v2483_v16, %v6804_v28 }
 0x194   :  { %v2485_v39 = vpop.f32.mrf.mxu0 }
 0x195   :  { %v2598_v45 = vpop.f32.mrf.mxu1  ;;  %v6838_v27 = vadd.f32 %v2596_v62, %v2484_v18  ;;  %v2486_v41 = vadd.f32 %v2485_v39, %v6808_v59 }
 0x196   :  { %v2487_v21 = vpop.f32.mrf.mxu0 }
 0x197   :  { %v2600_v54 = vpop.f32.mrf.mxu1  ;;  %v6841_v57 = vadd.f32 %v2598_v45, %v2486_v41  ;;  %v2488_v44 = vadd.f32 %v2487_v21, %v6804_v28 }
 0x198   :  { %v6844_v37 = vpop.f32.mrf.mxu0 }
 0x199   :  { %v6846_v49 = vpop.f32.mrf.mxu1  ;;  %v6848_v29 = vadd.f32 %v2600_v54, %v2488_v44 }
 0x19a   :  { %v2493_v52 = vpop.f32.mrf.mxu0 }
 0x19b   :  { %v2606_v20 = vpop.f32.mrf.mxu1  ;;  %v2494_v31 = vadd.f32 %v2493_v52, %v6804_v28 }
 0x19c   :  { %v2495_v53 = vpop.f32.mrf.mxu0 }
 0x19d   :  { %v2608_v7 = vpop.f32.mrf.mxu1  ;;  %v6851_v36 = vadd.f32 %v2606_v20, %v2494_v31  ;;  %v2496_v58 = vadd.f32 %v2495_v53, %v6808_v59 }
 0x19e   :  { %v2497_v25 = vpop.f32.mrf.mxu0 }
 0x19f   :  { %v2610_v47 = vpop.f32.mrf.mxu1  ;;  %v6854_v10 = vadd.f32 %v2608_v7, %v2496_v58  ;;  %v2498_v60 = vadd.f32 %v2497_v25, %v6804_v28 }
 0x1a0   :  { %v6857_v61 = vpop.f32.mrf.mxu0 }
 0x1a1   :  { %v6859_v48 = vpop.f32.mrf.mxu1  ;;  %v6861_v51 = vadd.f32 %v2610_v47, %v2498_v60 }
 0x1a2   :  { %v2503_v43 = vpop.f32.mrf.mxu0 }
 0x1a3   :  { %v2616_v8 = vpop.f32.mrf.mxu1  ;;  %v2504_v5 = vadd.f32 %v2503_v43, %v6804_v28 }
 0x1a4   :  { %v2505_v0 = vpop.f32.mrf.mxu0 }
 0x1a5   :  { %v2618_v6 = vpop.f32.mrf.mxu1  ;;  %v6864_v19 = vadd.f32 %v2616_v8, %v2504_v5  ;;  %v2506_v42 = vadd.f32 %v2505_v0, %v6808_v59 }
 0x1a6   :  { %v2507_v22 = vpop.f32.mrf.mxu0 }
 0x1a7   :  { %v2620_v9 = vpop.f32.mrf.mxu1  ;;  %v6867_v15 = vadd.f32 %v2618_v6, %v2506_v42  ;;  %v2508_v38 = vadd.f32 %v2507_v22, %v6804_v28 }
 0x1a8   :  { %v6870_v2 = vpop.f32.mrf.mxu0 }
 0x1a9   :  { %v6872_v26 = vpop.f32.mrf.mxu1  ;;  %v6874_v4 = vadd.f32 %v2620_v9, %v2508_v38 }
 0x1aa   :  { %v2513_v50 = vpop.f32.mrf.mxu0 }
 0x1ab   :  { %v2626_v56 = vpop.f32.mrf.mxu1  ;;  %v2514_v14 = vadd.f32 %v2513_v50, %v6804_v28 }
 0x1ac   :  { %v2515_v24 = vpop.f32.mrf.mxu0 }
 0x1ad   :  { %v2628_v63 = vpop.f32.mrf.mxu1  ;;  %v6877_v13 = vadd.f32 %v2626_v56, %v2514_v14  ;;  %v2516_v17 = vadd.f32 %v2515_v24, %v6808_v59 }
 0x1ae   :  { %v2517_v12 = vpop.f32.mrf.mxu0 }
 0x1af   :  { %v2630_v16 = vpop.f32.mrf.mxu1  ;;  %v6880_v62 = vadd.f32 %v2628_v63, %v2516_v17  ;;  %v2518_v18 = vadd.f32 %v2517_v12, %v6804_v28  ;;  %v2468_v12 = vadd.f32 %v6814_v1, %v6804_v28 }
 0x1b0   :  { %v6883_v39 = vpop.f32.mrf.mxu0 }
 0x1b1   :  { %v6885_v45 = vpop.f32.mrf.mxu1  ;;  %v6887_v41 = vadd.f32 %v2630_v16, %v2518_v18 }
 0x1b2   :  { %v2523_v21 = vpop.f32.mrf.mxu0 }
 0x1b3   :  { %v2636_v54 = vpop.f32.mrf.mxu1  ;;  %v2524_v44 = vadd.f32 %v2523_v21, %v6804_v28 }
 0x1b4   :  { %v2525_v52 = vpop.f32.mrf.mxu0 }
 0x1b5   :  { %v2638_v20 = vpop.f32.mrf.mxu1  ;;  %v6890_v31 = vadd.f32 %v2636_v54, %v2524_v44  ;;  %v2526_v53 = vadd.f32 %v2525_v52, %v6808_v59  ;;  %v2470_v54 = vadd.f32 %v6820_v23, %v6808_v59 }
 0x1b6   :  { %v2527_v7 = vpop.f32.mrf.mxu0 }
 0x1b7   :  { %v2640_v58 = vpop.f32.mrf.mxu1  ;;  %v6893_v25 = vadd.f32 %v2638_v20, %v2526_v53  ;;  %v2528_v47 = vadd.f32 %v2527_v7, %v6804_v28  ;;  %v2581_v53 = vadd.f32 %v6816_v3, %v2468_v12 }
 0x1b8   :  { %v6896_v60 = vpop.f32.mrf.mxu0 }
 0x1b9   :  { %v6898_v43 = vpop.f32.mrf.mxu1  ;;  %v6900_v8 = vadd.f32 %v2640_v58, %v2528_v47 }
 0x1ba   :  { %v2533_v5 = vpop.f32.mrf.mxu0 }
 0x1bb   :  { %v2646_v0 = vpop.f32.mrf.mxu1  ;;  %v2534_v6 = vadd.f32 %v2533_v5, %v6804_v28  ;;  %v2583_v5 = vadd.f32 %v6822_v32, %v2470_v54 }
 0x1bc   :  { %v2535_v42 = vpop.f32.mrf.mxu0 }
 0x1bd   :  { %v2648_v22 = vpop.f32.mrf.mxu1  ;;  %v6903_v9 = vadd.f32 %v2646_v0, %v2534_v6  ;;  %v2536_v38 = vadd.f32 %v2535_v42, %v6808_v59 }
 0x1be   :  { %v2537_v50 = vpop.f32.mrf.mxu0 }
 0x1bf   :  { %v2650_v56 = vpop.f32.mrf.mxu1  ;;  %v6906_v14 = vadd.f32 %v2648_v22, %v2536_v38  ;;  %v2538_v24 = vadd.f32 %v2537_v50, %v6804_v28 }
 0x1c0   :  { %v6909_v63 = vpop.f32.mrf.mxu0 }
 0x1c1   :  { %v6911_v17 = vpop.f32.mrf.mxu1  ;;  %v6915_v16 = vadd.f32 %v2650_v56, %v2538_v24 }
 0x1c2   :  { %v2689_v18 = vpop.f32.mrf.mxu0 }
 0x1c3   :  { %v2802_v21 = vpop.f32.mrf.mxu1  ;;  %v2690_v44 = vadd.f32 %v2689_v18, %v6811_v35  ;;  %v2480_v35 = vadd.f32 %v6831_v46, %v6808_v59 }
 0x1c4   :  { %v2691_v52 = vpop.f32.mrf.mxu0 }
 0x1c5   :  { %v2804_v20 = vpop.f32.mrf.mxu1  ;;  %v2692_v7 = vadd.f32 %v2691_v52, %v6818_v55  ;;  %v2803_v0 = vadd.f32 %v2802_v21, %v2690_v44 }
 0x1c6   :  { %v2693_v58 = vpop.f32.mrf.mxu0 }
 0x1c7   :  { %v2806_v47 = vpop.f32.mrf.mxu1  ;;  %v2805_v28 = vadd.f32 %v2804_v20, %v2692_v7  ;;  %v2694_v1 = vadd.f32 %v2693_v58, %v2581_v53  ;;  %v2883_v12 = vmul.f32 0.2, %v2803_v0  ;;  %v2593_v7 = vadd.f32 %v6833_v33, %v2480_v35 }
 0x1c8   :  { %v2695_v6 = vpop.f32.mrf.mxu0 }
 0x1c9   :  { %v2808_v42 = vpop.f32.mrf.mxu1  ;;  %v2807_v22 = vadd.f32 %v2806_v47, %v2694_v1  ;;  %v2696_v38 = vadd.f32 %v2695_v6, %v2583_v5  ;;  %v2884_v56 = vmul.f32 0.2, %v2805_v28  ;;  %v2947_v47 = vmax.f32 %v2803_v0, %v2883_v12 }
 0x1ca   :  { %v2699_v23 = vpop.f32.mrf.mxu0 }
 0x1cb   :  { %v2812_v50 = vpop.f32.mrf.mxu1  ;;  %v2887_v3 = vmul.f32 0.2, %v2807_v22  ;;  %v2809_v24 = vadd.f32 %v2808_v42, %v2696_v38  ;;  %v2700_v55 = vadd.f32 %v2699_v23, %v6825_v11  ;;  %v2948_v46 = vmax.f32 %v2805_v28, %v2884_v56 }
 0x1cc   :  { %v2701_v18 = vpop.f32.mrf.mxu0  ;;  %v2490_v23 = vadd.f32 %v6844_v37, %v6808_v59 }
 0x1cd   :  { %v2814_v32 = vpop.f32.mrf.mxu1  ;;  %v2888_v54 = vmul.f32 0.2, %v2809_v24  ;;  %v2702_v21 = vadd.f32 %v2701_v18, %v6828_v30  ;;  %v2951_v44 = vmax.f32 %v2807_v22, %v2887_v3  ;;  %v2813_v52 = vadd.f32 %v2812_v50, %v2700_v55 }
 0x1ce   :  { %v2703_v20 = vpop.f32.mrf.mxu0  ;;  %v2603_v37 = vadd.f32 %v6846_v49, %v2490_v23 }
 0x1cf   :  { %v2816_v53 = vpop.f32.mrf.mxu1  ;;  %v2952_v58 = vmax.f32 %v2809_v24, %v2888_v54  ;;  %v2815_v5 = vadd.f32 %v2814_v32, %v2702_v21  ;;  %v2704_v1 = vadd.f32 %v2703_v20, %v6835_v40  ;;  %v3011_v30 = vpack.c.bf16 %v2951_v44, %v2947_v47 }
 0x1d0   :  { %v2705_v6 = vpop.f32.mrf.mxu0  ;;  %v2891_v22 = vmul.f32 0.2, %v2813_v52 }
 0x1d1   :  { %v2818_v11 = vpop.f32.mrf.mxu1  ;;  %v2706_v42 = vadd.f32 %v2705_v6, %v2593_v7  ;;  %v3012_v38 = vpack.c.bf16 %v2952_v58, %v2948_v46  ;;  %v2817_v50 = vadd.f32 %v2816_v53, %v2704_v1  ;;  %v2892_v28 = vmul.f32 0.2, %v2815_v5  ;;  %v5153_v58 = vld [vmem:[%s7176_s5 + $0x38] sm:$0xff]  }
 0x1d2   :  { %v2709_v3 = vpop.f32.mrf.mxu0  ;;  %v2955_v32 = vmax.f32 %v2813_v52, %v2891_v22 }
 0x1d3   :  { %v2822_v55 = vpop.f32.mrf.mxu1  ;;  %v2819_v18 = vadd.f32 %v2818_v11, %v2706_v42  ;;  %v2710_v33 = vadd.f32 %v2709_v3, %v6838_v27  ;;  %3582 = vmatprep.mubr.bf16.mxu1 %v3012_v38  ;;  %v2895_v0 = vmul.f32 0.2, %v2817_v50  ;;  %v5152_v27 = vld [vmem:[%s7176_s5 + $0x78] sm:$0xff]   ;;  %v2956_v49 = vmax.f32 %v2815_v5, %v2892_v28  ;;  %v5156_v42 = vld [vmem:[%s7176_s5 + $0x68] sm:$0xff]  }
 0x1d4   :  { %v2711_v35 = vpop.f32.mrf.mxu0  ;;  %3583 = vmatmul.mubr.bf16.vlgmr.msra.gmra.mxu1 %v3011_v30  ;;  %4589 = vmatprep.subr.bf16.mxu0 %v5152_v27  ;;  %v2500_v5 = vadd.f32 %v6857_v61, %v6808_v59  ;;  %v5157_v61 = vld [vmem:[%s7176_s5 + $0x28] sm:$0xff]  }
 0x1d5   :  { %v2824_v40 = vpop.f32.mrf.mxu1  ;;  %v2896_v56 = vmul.f32 0.2, %v2819_v18  ;;  %v2823_v24 = vadd.f32 %v2822_v55, %v2710_v33  ;;  %v2712_v12 = vadd.f32 %v2711_v35, %v6841_v57  ;;  %v2959_v54 = vmax.f32 %v2817_v50, %v2895_v0  ;;  %v5154_v57 = vld [vmem:[%s7176_s5 + $0x70] sm:$0xff]   ;;  %4653 = vmatprep.subr.bf16.mxu1 %v5152_v27  ;;  %4590 = vmatpush3.bf16.msra.mxu0 %v5153_v58 }
 0x1d6   :  { %v2713_v21 = vpop.f32.mrf.mxu0  ;;  %4661 = vmatpush3.bf16.msra.mxu1 %v5153_v58  ;;  %4591 = vmatprep.subr.bf16.mxu0 %v5154_v57 }
 0x1d7   :  { %v2826_v44 = vpop.f32.mrf.mxu1  ;;  %v2960_v20 = vmax.f32 %v2819_v18, %v2896_v56  ;;  %v2899_v53 = vmul.f32 0.2, %v2823_v24  ;;  %v2825_v7 = vadd.f32 %v2824_v40, %v2712_v12  ;;  %v2714_v46 = vadd.f32 %v2713_v21, %v6848_v29  ;;  %v5155_v29 = vld [vmem:[%s7176_s5 + $0x30] sm:$0xff]   ;;  %4654 = vmatprep.subr.bf16.mxu1 %v5154_v57  ;;  %v5158_v12 = vld [vmem:[%s7176_s5 + $0x60] sm:$0xff]  }
 0x1d8   :  { %v3015_v52 = vpack.c.bf16 %v2959_v54, %v2955_v32  ;;  %v2715_v47 = vpop.f32.mrf.mxu0  ;;  %v5159_v57 = vld [vmem:[%s7176_s5 + $0x20] sm:$0xff]  }
 0x1d9   :  { %v2828_v1 = vpop.f32.mrf.mxu1  ;;  %v2827_v6 = vadd.f32 %v2826_v44, %v2714_v46  ;;  %v2716_v11 = vadd.f32 %v2715_v47, %v2603_v37  ;;  %v3016_v30 = vpack.c.bf16 %v2960_v20, %v2956_v49  ;;  %v2900_v22 = vmul.f32 0.2, %v2825_v7  ;;  %4592 = vmatpush3.bf16.msra.mxu0 %v5155_v29 }
 0x1da   :  { %v2719_v38 = vpop.f32.mrf.mxu0  ;;  %v2963_v18 = vmax.f32 %v2823_v24, %v2899_v53  ;;  %4593 = vmatprep.subr.bf16.mxu0 %v5156_v42  ;;  %4662 = vmatpush3.bf16.msra.mxu1 %v5155_v29  ;;  %v2613_v37 = vadd.f32 %v6859_v48, %v2500_v5  ;;  %v5160_v48 = vld [vmem:[%s7176_s5 + $0x58] sm:$0xff]  }
 0x1db   :  { %v2832_v23 = vpop.f32.mrf.mxu1  ;;  %v2903_v50 = vmul.f32 0.2, %v2827_v6  ;;  %v2829_v3 = vadd.f32 %v2828_v1, %v2716_v11  ;;  %v2720_v55 = vadd.f32 %v2719_v38, %v6851_v36  ;;  %3592 = vmatprep.mubr.bf16.mxu1 %v3016_v30  ;;  %v2964_v32 = vmax.f32 %v2825_v7, %v2900_v22  ;;  %4655 = vmatprep.subr.bf16.mxu1 %v5156_v42  ;;  %v5161_v30 = vld [vmem:[%s7176_s5 + $0x18] sm:$0xff]  }
 0x1dc   :  { %v2721_v33 = vpop.f32.mrf.mxu0  ;;  %3593 = vmatmul.mubr.bf16.gmra.mxu1 %v3015_v52 }
 0x1dd   :  { %v2834_v28 = vpop.f32.mrf.mxu1  ;;  %v2967_v0 = vmax.f32 %v2827_v6, %v2903_v50  ;;  %v2904_v35 = vmul.f32 0.2, %v2829_v3  ;;  %v2833_v40 = vadd.f32 %v2832_v23, %v2720_v55  ;;  %v2722_v56 = vadd.f32 %v2721_v33, %v6854_v10  ;;  %4594 = vmatpush3.bf16.msra.mxu0 %v5157_v61 }
 0x1de   :  { %v2723_v36 = vpop.f32.mrf.mxu0  ;;  %4595 = vmatprep.subr.bf16.mxu0 %v5158_v12  ;;  %4663 = vmatpush3.bf16.msra.mxu1 %v5157_v61 }
 0x1df   :  { %v2836_v24 = vpop.f32.mrf.mxu1  ;;  %v3019_v54 = vpack.c.bf16 %v2967_v0, %v2963_v18  ;;  %v2968_v21 = vmax.f32 %v2829_v3, %v2904_v35  ;;  %v2835_v10 = vadd.f32 %v2834_v28, %v2722_v56  ;;  %v2724_v44 = vadd.f32 %v2723_v36, %v6861_v51  ;;  %4656 = vmatprep.subr.bf16.mxu1 %v5158_v12  ;;  %v5162_v3 = vld [vmem:[%s7176_s5 + $0x50] sm:$0xff]  }
 0x1e0   :  { %v2725_v27 = vpop.f32.mrf.mxu0  ;;  %v2907_v53 = vmul.f32 0.2, %v2833_v40  ;;  %v2510_v51 = vadd.f32 %v6870_v2, %v6808_v59  ;;  %v5163_v36 = vld [vmem:[%s7176_s5 + $0x10] sm:$0xff]  }
 0x1e1   :  { %v2838_v20 = vpop.f32.mrf.mxu1  ;;  %v2726_v46 = vadd.f32 %v2725_v27, %v2613_v37  ;;  %v3020_v58 = vpack.c.bf16 %v2968_v21, %v2964_v32  ;;  %v2837_v7 = vadd.f32 %v2836_v24, %v2724_v44  ;;  %v2908_v6 = vmul.f32 0.2, %v2835_v10  ;;  %4596 = vmatpush3.bf16.msra.mxu0 %v5159_v57 }
 0x1e2   :  { %v2729_v49 = vpop.f32.mrf.mxu0  ;;  %v2971_v2 = vmax.f32 %v2833_v40, %v2907_v53  ;;  %4597 = vmatprep.subr.bf16.mxu0 %v5160_v48  ;;  %4664 = vmatpush3.bf16.msra.mxu1 %v5159_v57  ;;  %v2623_v55 = vadd.f32 %v6872_v26, %v2510_v51  ;;  %v2520_v26 = vadd.f32 %v6883_v39, %v6808_v59 }
 0x1e3   :  { %v2842_v52 = vpop.f32.mrf.mxu1  ;;  %v2839_v47 = vadd.f32 %v2838_v20, %v2726_v46  ;;  %v2730_v1 = vadd.f32 %v2729_v49, %v6864_v19  ;;  %3602 = vmatprep.mubr.bf16.mxu1 %v3020_v58  ;;  %v2911_v11 = vmul.f32 0.2, %v2837_v7  ;;  %4657 = vmatprep.subr.bf16.mxu1 %v5160_v48  ;;  %v2972_v28 = vmax.f32 %v2835_v10, %v2908_v6 }
 0x1e4   :  { %v2731_v29 = vpop.f32.mrf.mxu0  ;;  %3603 = vmatmul.mubr.bf16.gmra.mxu1 %v3019_v54 }
 0x1e5   :  { %v2844_v42 = vpop.f32.mrf.mxu1  ;;  %v2912_v5 = vmul.f32 0.2, %v2839_v47  ;;  %v2843_v38 = vadd.f32 %v2842_v52, %v2730_v1  ;;  %v2732_v23 = vadd.f32 %v2731_v29, %v6867_v15  ;;  %v2975_v22 = vmax.f32 %v2837_v7, %v2911_v11  ;;  %4598 = vmatpush3.bf16.msra.mxu0 %v5161_v30 }
 0x1e6   :  { %v2733_v50 = vpop.f32.mrf.mxu0  ;;  %4599 = vmatprep.subr.bf16.mxu0 %v5162_v3  ;;  %4665 = vmatpush3.bf16.msra.mxu1 %v5161_v30  ;;  %v2633_v7 = vadd.f32 %v6885_v45, %v2520_v26 }
 0x1e7   :  { %v2846_v19 = vpop.f32.mrf.mxu1  ;;  %v2976_v18 = vmax.f32 %v2839_v47, %v2912_v5  ;;  %v2845_v15 = vadd.f32 %v2844_v42, %v2732_v23  ;;  %v2734_v33 = vadd.f32 %v2733_v50, %v6874_v4  ;;  %v3023_v0 = vpack.c.bf16 %v2975_v22, %v2971_v2  ;;  %4658 = vmatprep.subr.bf16.mxu1 %v5162_v3 }
 0x1e8   :  { %v2735_v35 = vpop.f32.mrf.mxu0  ;;  %v2915_v56 = vmul.f32 0.2, %v2843_v38  ;;  %v2530_v23 = vadd.f32 %v6896_v60, %v6808_v59 }
 0x1e9   :  { %v2848_v40 = vpop.f32.mrf.mxu1  ;;  %v2847_v61 = vadd.f32 %v2846_v19, %v2734_v33  ;;  %v2736_v12 = vadd.f32 %v2735_v35, %v2623_v55  ;;  %v3024_v32 = vpack.c.bf16 %v2976_v18, %v2972_v28  ;;  %v2916_v4 = vmul.f32 0.2, %v2845_v15  ;;  %4600 = vmatpush3.bf16.msra.mxu0 %v5163_v36 }
 0x1ea   :  { %v2739_v24 = vpop.f32.mrf.mxu0  ;;  %v2979_v20 = vmax.f32 %v2843_v38, %v2915_v56  ;;  %4666 = vmatpush3.bf16.msra.mxu1 %v5163_v36 }
 0x1eb   :  { %v2852_v37 = vpop.f32.mrf.mxu1  ;;  %v2919_v54 = vmul.f32 0.2, %v2847_v61  ;;  %v2849_v21 = vadd.f32 %v2848_v40, %v2736_v12  ;;  %v2740_v10 = vadd.f32 %v2739_v24, %v6877_v13  ;;  %3612 = vmatprep.mubr.bf16.mxu1 %v3024_v32  ;;  %v2980_v49 = vmax.f32 %v2845_v15, %v2916_v4 }
 0x1ec   :  { %v2741_v44 = vpop.f32.mrf.mxu0  ;;  %3613 = vmatmul.mubr.bf16.gmra.mxu1 %v3023_v0  ;;  %v2643_v0 = vadd.f32 %v6898_v43, %v2530_v23 }
 0x1ed   :  { %v2854_v27 = vpop.f32.mrf.mxu1  ;;  %v2983_v53 = vmax.f32 %v2847_v61, %v2919_v54  ;;  %v2920_v46 = vmul.f32 0.2, %v2849_v21  ;;  %v2742_v58 = vadd.f32 %v2741_v44, %v6880_v62  ;;  %v2853_v39 = vadd.f32 %v2852_v37, %v2740_v10 }
 0x1ee   :  { %v2743_v57 = vpop.f32.mrf.mxu0 }
 0x1ef   :  { %v2856_v48 = vpop.f32.mrf.mxu1  ;;  %v3027_v52 = vpack.c.bf16 %v2983_v53, %v2979_v20  ;;  %v2984_v13 = vmax.f32 %v2849_v21, %v2920_v46  ;;  %v2855_v51 = vadd.f32 %v2854_v27, %v2742_v58  ;;  %v2744_v47 = vadd.f32 %v2743_v57, %v6887_v41 }
 0x1f0   :  { %v2745_v1 = vpop.f32.mrf.mxu0  ;;  %v2923_v42 = vmul.f32 0.2, %v2853_v39 }
 0x1f1   :  { %v2858_v6 = vpop.f32.mrf.mxu1  ;;  %v2746_v11 = vadd.f32 %v2745_v1, %v2633_v7  ;;  %v3028_v29 = vpack.c.bf16 %v2984_v13, %v2980_v49  ;;  %v2857_v62 = vadd.f32 %v2856_v48, %v2744_v47  ;;  %v2924_v2 = vmul.f32 0.2, %v2855_v51 }
 0x1f2   :  { %v2749_v5 = vpop.f32.mrf.mxu0  ;;  %v2987_v18 = vmax.f32 %v2853_v39, %v2923_v42 }
 0x1f3   :  { %v2862_v38 = vpop.f32.mrf.mxu1  ;;  %v2859_v30 = vadd.f32 %v2858_v6, %v2746_v11  ;;  %v2750_v45 = vadd.f32 %v2749_v5, %v6890_v31  ;;  %3622 = vmatprep.mubr.bf16.mxu1 %v3028_v29  ;;  %v2927_v22 = vmul.f32 0.2, %v2857_v62  ;;  %v2988_v40 = vmax.f32 %v2855_v51, %v2924_v2  ;;  %v5166_v2 = vld [vmem:[%s7176_s5 + $0x40] sm:$0xff]  }
 0x1f4   :  { %v2751_v50 = vpop.f32.mrf.mxu0  ;;  %3623 = vmatmul.mubr.bf16.gmra.mxu1 %v3027_v52 }
 0x1f5   :  { %v2864_v19 = vpop.f32.mrf.mxu1  ;;  %v2928_v41 = vmul.f32 0.2, %v2859_v30  ;;  %v2863_v3 = vadd.f32 %v2862_v38, %v2750_v45  ;;  %v2752_v55 = vadd.f32 %v2751_v50, %v6893_v25  ;;  %v2991_v15 = vmax.f32 %v2857_v62, %v2927_v22  ;;  %v5165_v45 = vld [vmem:[%s7176_s5 + $0x8] sm:$0xff]   ;;  %v5167_v22 = vld [vmem:[%s7176_s5] sm:$0xff]  }
 0x1f6   :  { %v2753_v33 = vpop.f32.mrf.mxu0  ;;  %v2540_v25 = vadd.f32 %v6909_v63, %v6808_v59 }
 0x1f7   :  { %v2866_v28 = vpop.f32.mrf.mxu1  ;;  %v2992_v60 = vmax.f32 %v2859_v30, %v2928_v41  ;;  %v2865_v35 = vadd.f32 %v2864_v19, %v2752_v55  ;;  %v2754_v31 = vadd.f32 %v2753_v33, %v6900_v8  ;;  %v3031_v56 = vpack.c.bf16 %v2991_v15, %v2987_v18  ;;  %v4039_v55 = vld [vmem:[%s7177_s7] sm:$0xff]  ;;  %v4040_v15 = vld [vmem:[%s7177_s7 + $0x8] sm:$0xff] }
 0x1f8   :  { %v2755_v61 = vpop.f32.mrf.mxu0  ;;  %v2931_v36 = vmul.f32 0.2, %v2863_v3  ;;  %v2653_v58 = vadd.f32 %v6911_v17, %v2540_v25 }
 0x1f9   :  { %v2868_v12 = vpop.f32.mrf.mxu1  ;;  %v2867_v26 = vadd.f32 %v2866_v28, %v2754_v31  ;;  %v2756_v24 = vadd.f32 %v2755_v61, %v2643_v0  ;;  %v3032_v4 = vpack.c.bf16 %v2992_v60, %v2988_v40  ;;  %v2932_v54 = vmul.f32 0.2, %v2865_v35  ;;  %v4041_v28 = vld [vmem:[%s7177_s7 + $0x10] sm:$0xff]  ;;  %v4042_v60 = vld [vmem:[%s7177_s7 + $0x18] sm:$0xff]  ;;  %v4043_v31 = vld [vmem:[%s7177_s7 + $0x20] sm:$0xff] }
 0x1fa   :  { %v2759_v37 = vpop.f32.mrf.mxu0  ;;  %v2995_v27 = vmax.f32 %v2863_v3, %v2931_v36  ;;  %v5168_v3 = vmov 0  }
 0x1fb   :  { %v2872_v32 = vpop.f32.mrf.mxu1  ;;  %v2935_v21 = vmul.f32 0.2, %v2867_v26  ;;  %v2869_v43 = vadd.f32 %v2868_v12, %v2756_v24  ;;  %v2760_v10 = vadd.f32 %v2759_v37, %v6903_v9  ;;  %3632 = vmatprep.mubr.bf16.mxu1 %v3032_v4  ;;  %v2996_v57 = vmax.f32 %v2865_v35, %v2932_v54  ;;  %4670 = vset.pattern.permute.xlu1 %v5168_v3 }
 0x1fc   :  { %v2761_v8 = vpop.f32.mrf.mxu0  ;;  %3633 = vmatmul.mubr.bf16.gmra.mxu1 %v3031_v56  ;;  %4057 = vperm.xlu1 %4670, %v4039_v55   ;;  %v4044_v56 = vld [vmem:[%s7177_s7 + $0x28] sm:$0xff]  ;;  %v7224_v54 = vsub.s32 1, %v6389_v34 }
 0x1fd   :  { %v2874_v44 = vpop.f32.mrf.mxu1  ;;  %v2999_v20 = vmax.f32 %v2867_v26, %v2935_v21  ;;  %v2936_v53 = vmul.f32 0.2, %v2869_v43  ;;  %v2762_v46 = vadd.f32 %v2761_v8, %v6906_v14  ;;  %v2873_v59 = vadd.f32 %v2872_v32, %v2760_v10  ;;  %v3105_v32 = vld [vmem:[%s7178_s4] sm:$0x3] }
 0x1fe   :  { %v2763_v63 = vpop.f32.mrf.mxu0  ;;  %v7047_v21 = vrot.slane %v3105_v32, %v7224_v54 }
 0x1ff   :  { %v2876_v39 = vpop.f32.mrf.mxu1  ;;  %v3035_v48 = vpack.c.bf16 %v2999_v20, %v2995_v27  ;;  %v3000_v7 = vmax.f32 %v2869_v43, %v2936_v53  ;;  %v2875_v49 = vadd.f32 %v2874_v44, %v2762_v46  ;;  %v2764_v9 = vadd.f32 %v2763_v63, %v6915_v16  ;;  %v5164_v16 = vld [vmem:[%s7176_s5 + $0x48] sm:$0xff]  }
 0x200   :  { %v2765_v52 = vpop.f32.mrf.mxu0  ;;  %v2939_v47 = vmul.f32 0.2, %v2873_v59  ;;  %4601 = vmatprep.subr.bf16.mxu0 %v5164_v16  ;;  %4659 = vmatprep.subr.bf16.mxu1 %v5164_v16  ;;  %v7225_v43 = vld [vmem:[#allocation15_spill] sm:$0xff] }
 0x201   :  { %v2766_v13 = vadd.f32 %v2765_v52, %v2653_v58  ;;  %v3036_v51 = vpack.c.bf16 %v3000_v7, %v2996_v57  ;;  %v2877_v1 = vadd.f32 %v2876_v39, %v2764_v9  ;;  %v2878_v6 = vpop.f32.mrf.mxu1  ;;  %v2940_v11 = vmul.f32 0.2, %v2875_v49  ;;  %4602 = vmatpush3.bf16.msra.mxu0 %v5165_v45  ;;  %4667 = vmatpush3.bf16.msra.mxu1 %v5165_v45 }
 0x202   :  { %v3003_v42 = vmax.f32 %v2873_v59, %v2939_v47  ;;  %4603 = vmatprep.subr.bf16.mxu0 %v5166_v2  ;;  %4660 = vmatprep.subr.bf16.mxu1 %v5166_v2  ;;  %v7050_v10 = vrot.slane %v3105_v32, %v7225_v43 }
 0x203   :  { %v2879_v14 = vadd.f32 %v2878_v6, %v2766_v13  ;;  %3642 = vmatprep.mubr.bf16.mxu1 %v3036_v51  ;;  %v2943_v29 = vmul.f32 0.2, %v2877_v1  ;;  %v3004_v5 = vmax.f32 %v2875_v49, %v2940_v11  ;;  %4062 = vperm.xlu1 %4670, %v4040_v15  }
 0x204   :  { %3643 = vmatmul.mubr.bf16.gmra.mxu1 %v3035_v48 }
 0x205   :  { %v2944_v17 = vmul.f32 0.2, %v2879_v14  ;;  %v3007_v62 = vmax.f32 %v2877_v1, %v2943_v29  ;;  %4604 = vmatpush3.bf16.msra.mxu0 %v5167_v22  ;;  %4668 = vmatpush3.bf16.msra.mxu1 %v5167_v22 }
 0x207   :  { %v3008_v38 = vmax.f32 %v2879_v14, %v2944_v17  ;;  %v3039_v23 = vpack.c.bf16 %v3007_v62, %v3003_v42  ;;  %4067 = vperm.xlu1 %4670, %v4041_v28  }
 0x209   :  { %v3040_v30 = vpack.c.bf16 %v3008_v38, %v3004_v5 }
 0x20b   :  { %3652 = vmatprep.mubr.bf16.mxu1 %v3040_v30  ;;  %4072 = vperm.xlu1 %4670, %v4042_v60  }
 0x20c   :  { %3653 = vmatmul.mubr.bf16.gmra.mxu1 %v3039_v23 }
 0x20f   :  { %4077 = vperm.xlu1 %4670, %v4043_v31  }
 0x213   :  { %4082 = vperm.xlu1 %4670, %v4044_v56  }
 0x214   :  { %v3471_v50 = vpop.f32.mrf.mxu0 }
 0x215   :  { %v3472_v20 = vadd.f32 %v3471_v50, %v7050_v10 }
 0x216   :  { %v3473_v19 = vpop.f32.mrf.mxu0 }
 0x217   :  { %v3474_v27 = vadd.f32 %v3473_v19, %v7047_v21 }
 0x218   :  { %v3475_v41 = vpop.f32.mrf.mxu0 }
 0x219   :  { %v3476_v46 = vadd.f32 %v3475_v41, %v7050_v10 }
 0x21a   :  { %v3477_v18 = vpop.f32.mrf.mxu0 }
 0x21b   :  { %v3478_v39 = vadd.f32 %v3477_v18, %v7047_v21 }
 0x21c   :  { %v3481_v33 = vpop.f32.mrf.mxu0 }
 0x21d   :  { %v3482_v11 = vadd.f32 %v3481_v33, %v7050_v10 }
 0x21e   :  { %v3483_v0 = vpop.f32.mrf.mxu0 }
 0x21f   :  { %v3484_v1 = vadd.f32 %v3483_v0, %v7047_v21 }
 0x220   :  { %v3485_v35 = vpop.f32.mrf.mxu0 }
 0x221   :  { %v3486_v62 = vadd.f32 %v3485_v35, %v7050_v10 }
 0x222   :  { %v3487_v40 = vpop.f32.mrf.mxu0 }
 0x223   :  { %v3488_v45 = vadd.f32 %v3487_v40, %v7047_v21 }
 0x224   :  { %v3491_v61 = vpop.f32.mrf.mxu0 }
 0x225   :  { %v3492_v60 = vadd.f32 %v3491_v61, %v7050_v10 }
 0x226   :  { %v3493_v12 = vpop.f32.mrf.mxu0 }
 0x227   :  { %v3494_v28 = vadd.f32 %v3493_v12, %v7047_v21 }
 0x228   :  { %v3495_v36 = vpop.f32.mrf.mxu0 }
 0x229   :  { %v3496_v56 = vadd.f32 %v3495_v36, %v7050_v10 }
 0x22a   :  { %v7032_v26 = vpop.f32.mrf.mxu0 }
 0x22c   :  { %v7034_v24 = vpop.f32.mrf.mxu0 }
 0x22e   :  { %v7036_v25 = vpop.f32.mrf.mxu0 }
 0x230   :  { %v7038_v37 = vpop.f32.mrf.mxu0 }
 0x232   :  { %v7043_v4 = vpop.f32.mrf.mxu0 }
 0x234   :  { %v7052_v8 = vpop.f32.mrf.mxu0 }
 0x236   :  { %v7057_v58 = vpop.f32.mrf.mxu0 }
 0x238   :  { %v7060_v7 = vpop.f32.mrf.mxu0 }
 0x23a   :  { %v7064_v14 = vpop.f32.mrf.mxu0 }
 0x23c   :  { %v7068_v50 = vpop.f32.mrf.mxu0 }
 0x23e   :  { %v7072_v35 = vpop.f32.mrf.mxu0 }
 0x294   :  { %v3584_v44 = vpop.f32.mrf.mxu1 }
 0x295   :  { %v3585_v63 = vadd.f32 %v3584_v44, %v3472_v20 }
 0x296   :  { %v3586_v53 = vpop.f32.mrf.mxu1 }
 0x297   :  { %v3587_v59 = vadd.f32 %v3586_v53, %v3474_v27  ;;  %v3663_v13 = vmul.f32 0.2, %v3585_v63 }
 0x298   :  { %v3588_v34 = vpop.f32.mrf.mxu1 }
 0x299   :  { %v3589_v57 = vadd.f32 %v3588_v34, %v3476_v46  ;;  %v3664_v49 = vmul.f32 0.2, %v3587_v59  ;;  %v3695_v5 = vmax.f32 %v3585_v63, %v3663_v13  ;;  %v3498_v46 = vadd.f32 %v7032_v26, %v7047_v21  ;;  %v7077_v63 = vpop.f32.mrf.mxu0 }
 0x29a   :  { %v3590_v48 = vpop.f32.mrf.mxu1  ;;  %v3502_v26 = vadd.f32 %v7034_v24, %v7050_v10 }
 0x29b   :  { %v3665_v9 = vmul.f32 0.2, %v3589_v57  ;;  %v3591_v52 = vadd.f32 %v3590_v48, %v3478_v39  ;;  %v3696_v29 = vmax.f32 %v3587_v59, %v3664_v49  ;;  %v3527_v13 = vpop.f32.mrf.mxu0 }
 0x29c   :  { %v3594_v47 = vpop.f32.mrf.mxu1 }
 0x29d   :  { %v3666_v51 = vmul.f32 0.2, %v3591_v52  ;;  %v3697_v6 = vmax.f32 %v3589_v57, %v3665_v9  ;;  %v3595_v23 = vadd.f32 %v3594_v47, %v3482_v11  ;;  %v3504_v9 = vadd.f32 %v7036_v25, %v7047_v21 }
 0x29e   :  { %v3596_v42 = vpop.f32.mrf.mxu1 }
 0x29f   :  { %v3698_v17 = vmax.f32 %v3591_v52, %v3666_v51  ;;  %v3597_v38 = vadd.f32 %v3596_v42, %v3484_v1  ;;  %v3727_v2 = vpack.c.bf16 %v3697_v6, %v3695_v5  ;;  %v3667_v15 = vmul.f32 0.2, %v3595_v23 }
 0x2a0   :  { %v3598_v30 = vpop.f32.mrf.mxu1  ;;  %v3506_v1 = vadd.f32 %v7038_v37, %v7050_v10  ;;  %v3508_v5 = vadd.f32 %v7043_v4, %v7047_v21  ;;  %v3512_v4 = vadd.f32 %v7052_v8, %v7050_v10 }
 0x2a1   :  { %v3728_v16 = vpack.c.bf16 %v3698_v17, %v3696_v29  ;;  %v3599_v22 = vadd.f32 %v3598_v30, %v3486_v62  ;;  %v3668_v41 = vmul.f32 0.2, %v3597_v38  ;;  %v3699_v27 = vmax.f32 %v3595_v23, %v3667_v15  ;;  %v7087_v23 = vpop.f32.mrf.mxu0 }
 0x2a2   :  { %v3600_v19 = vpop.f32.mrf.mxu1 }
 0x2a3   :  { %3910 = vmatprep.mubr.bf16.mxu0 %v3728_v16  ;;  %v3669_v55 = vmul.f32 0.2, %v3599_v22  ;;  %v3601_v18 = vadd.f32 %v3600_v19, %v3488_v45  ;;  %v3700_v32 = vmax.f32 %v3597_v38, %v3668_v41  ;;  %v3514_v19 = vadd.f32 %v7057_v58, %v7047_v21 }
 0x2a4   :  { %3911 = vmatmul.mubr.bf16.vlgmr.msra.gmra.mxu0 %v3727_v2  ;;  %v3604_v33 = vpop.f32.mrf.mxu1 }
 0x2a5   :  { %v3670_v0 = vmul.f32 0.2, %v3601_v18  ;;  %v3701_v31 = vmax.f32 %v3599_v22, %v3669_v55  ;;  %v3605_v20 = vadd.f32 %v3604_v33, %v3492_v60  ;;  %v3533_v55 = vpop.f32.mrf.mxu0  ;;  %v3516_v33 = vadd.f32 %v7060_v7, %v7050_v10 }
 0x2a6   :  { %v3606_v40 = vpop.f32.mrf.mxu1 }
 0x2a7   :  { %v3702_v54 = vmax.f32 %v3601_v18, %v3670_v0  ;;  %v3607_v44 = vadd.f32 %v3606_v40, %v3494_v28  ;;  %v3729_v61 = vpack.c.bf16 %v3701_v31, %v3699_v27  ;;  %v3671_v36 = vmul.f32 0.2, %v3605_v20 }
 0x2a8   :  { %v3608_v53 = vpop.f32.mrf.mxu1 }
 0x2a9   :  { %v3609_v59 = vadd.f32 %v3608_v53, %v3496_v56  ;;  %v3730_v12 = vpack.c.bf16 %v3702_v54, %v3700_v32  ;;  %v3672_v39 = vmul.f32 0.2, %v3607_v44  ;;  %v3703_v17 = vmax.f32 %v3605_v20, %v3671_v36 }
 0x2aa   :  { %v3610_v34 = vpop.f32.mrf.mxu1  ;;  %v3518_v32 = vadd.f32 %v7064_v14, %v7047_v21 }
 0x2ab   :  { %v3673_v57 = vmul.f32 0.2, %v3609_v59  ;;  %v3611_v48 = vadd.f32 %v3610_v34, %v3498_v46  ;;  %3918 = vmatprep.mubr.bf16.mxu0 %v3730_v12  ;;  %v3704_v6 = vmax.f32 %v3607_v44, %v3672_v39  ;;  %v3535_v44 = vpop.f32.mrf.mxu0  ;;  %v3524_v12 = vadd.f32 %v7072_v35, %v7047_v21 }
 0x2ac   :  { %v3614_v49 = vpop.f32.mrf.mxu1  ;;  %3919 = vmatmul.mubr.bf16.gmra.mxu0 %v3729_v61  ;;  %v3522_v34 = vadd.f32 %v7068_v50, %v7050_v10 }
 0x2ad   :  { %v3674_v52 = vmul.f32 0.2, %v3611_v48  ;;  %v3705_v51 = vmax.f32 %v3609_v59, %v3673_v57  ;;  %v3615_v42 = vadd.f32 %v3614_v49, %v3502_v26  ;;  %v3537_v14 = vpop.f32.mrf.mxu0 }
 0x2ae   :  { %v3616_v47 = vpop.f32.mrf.mxu1 }
 0x2af   :  { %v3706_v11 = vmax.f32 %v3611_v48, %v3674_v52  ;;  %v3617_v29 = vadd.f32 %v3616_v47, %v3504_v9  ;;  %v3731_v24 = vpack.c.bf16 %v3705_v51, %v3703_v17  ;;  %v3675_v37 = vmul.f32 0.2, %v3615_v42 }
 0x2b0   :  { %v3618_v62 = vpop.f32.mrf.mxu1  ;;  %v3526_v48 = vadd.f32 %v7077_v63, %v7050_v10  ;;  %v3528_v47 = vadd.f32 %v3527_v13, %v7047_v21  ;;  %v3534_v63 = vadd.f32 %v3533_v55, %v7047_v21 }
 0x2b1   :  { %v3619_v25 = vadd.f32 %v3618_v62, %v3506_v1  ;;  %v3732_v38 = vpack.c.bf16 %v3706_v11, %v3704_v6  ;;  %v3676_v16 = vmul.f32 0.2, %v3617_v29  ;;  %v3707_v31 = vmax.f32 %v3615_v42, %v3675_v37  ;;  %v3541_v6 = vpop.f32.mrf.mxu0 }
 0x2b2   :  { %v3620_v30 = vpop.f32.mrf.mxu1 }
 0x2b3   :  { %v3677_v45 = vmul.f32 0.2, %v3619_v25  ;;  %v3621_v2 = vadd.f32 %v3620_v30, %v3508_v5  ;;  %3926 = vmatprep.mubr.bf16.mxu0 %v3732_v38  ;;  %v3708_v28 = vmax.f32 %v3617_v29, %v3676_v16  ;;  %v3532_v38 = vadd.f32 %v7087_v23, %v7050_v10 }
 0x2b4   :  { %v3624_v22 = vpop.f32.mrf.mxu1  ;;  %3927 = vmatmul.mubr.bf16.gmra.mxu0 %v3731_v24  ;;  %v3543_v24 = vpop.f32.mrf.mxu0  ;;  %v3536_v16 = vadd.f32 %v3535_v44, %v7050_v10 }
 0x2b5   :  { %v3678_v41 = vmul.f32 0.2, %v3621_v2  ;;  %v3709_v18 = vmax.f32 %v3619_v25, %v3677_v45  ;;  %v3625_v40 = vadd.f32 %v3624_v22, %v3512_v4  ;;  %v3538_v4 = vadd.f32 %v3537_v14, %v7047_v21 }
 0x2b6   :  { %v3626_v15 = vpop.f32.mrf.mxu1  ;;  %v3545_v55 = vpop.f32.mrf.mxu0 }
 0x2b7   :  { %v3710_v0 = vmax.f32 %v3621_v2, %v3678_v41  ;;  %v3627_v60 = vadd.f32 %v3626_v15, %v3514_v19  ;;  %v3733_v27 = vpack.c.bf16 %v3709_v18, %v3707_v31  ;;  %v3679_v59 = vmul.f32 0.2, %v3625_v40 }
 0x2b8   :  { %v3628_v56 = vpop.f32.mrf.mxu1 }
 0x2b9   :  { %v3629_v58 = vadd.f32 %v3628_v56, %v3516_v33  ;;  %v3734_v54 = vpack.c.bf16 %v3710_v0, %v3708_v28  ;;  %v3680_v20 = vmul.f32 0.2, %v3627_v60  ;;  %v3711_v52 = vmax.f32 %v3625_v40, %v3679_v59 }
 0x2ba   :  { %v3630_v8 = vpop.f32.mrf.mxu1  ;;  %v3544_v56 = vadd.f32 %v3543_v24, %v7047_v21 }
 0x2bb   :  { %v3681_v53 = vmul.f32 0.2, %v3629_v58  ;;  %v3631_v46 = vadd.f32 %v3630_v8, %v3518_v32  ;;  %3934 = vmatprep.mubr.bf16.mxu0 %v3734_v54  ;;  %v3712_v36 = vmax.f32 %v3627_v60, %v3680_v20  ;;  %v3547_v54 = vpop.f32.mrf.mxu0  ;;  %v3546_v8 = vadd.f32 %v3545_v55, %v7050_v10 }
 0x2bc   :  { %v3634_v7 = vpop.f32.mrf.mxu1  ;;  %3935 = vmatmul.mubr.bf16.gmra.mxu0 %v3733_v27 }
 0x2bd   :  { %v3682_v61 = vmul.f32 0.2, %v3631_v46  ;;  %v3713_v39 = vmax.f32 %v3629_v58, %v3681_v53  ;;  %v3635_v26 = vadd.f32 %v3634_v7, %v3522_v34  ;;  %v3542_v58 = vadd.f32 %v3541_v6, %v7050_v10  ;;  %v4046_v6 = vld [vmem:[%s7177_s7 + $0x38] sm:$0xff] }
 0x2be   :  { %v3636_v57 = vpop.f32.mrf.mxu1 }
 0x2bf   :  { %v3714_v49 = vmax.f32 %v3631_v46, %v3682_v61  ;;  %v3637_v9 = vadd.f32 %v3636_v57, %v3524_v12  ;;  %v3735_v11 = vpack.c.bf16 %v3713_v39, %v3711_v52  ;;  %v3683_v62 = vmul.f32 0.2, %v3635_v26 }
 0x2c0   :  { %v3638_v51 = vpop.f32.mrf.mxu1  ;;  %v3548_v61 = vadd.f32 %v3547_v54, %v7047_v21  ;;  %v4045_v21 = vld [vmem:[%s7177_s7 + $0x30] sm:$0xff] }
 0x2c1   :  { %v3639_v1 = vadd.f32 %v3638_v51, %v3526_v48  ;;  %v3736_v35 = vpack.c.bf16 %v3714_v49, %v3712_v36  ;;  %v3684_v50 = vmul.f32 0.2, %v3637_v9  ;;  %v3715_v22 = vmax.f32 %v3635_v26, %v3683_v62  ;;  %4087 = vperm.xlu1 %4670, %v4045_v21   ;;  %v4052_v62 = vld [vmem:[%s7177_s7 + $0x68] sm:$0xff] }
 0x2c2   :  { %v3640_v29 = vpop.f32.mrf.mxu1 }
 0x2c3   :  { %v3685_v17 = vmul.f32 0.2, %v3639_v1  ;;  %v3641_v42 = vadd.f32 %v3640_v29, %v3528_v47  ;;  %3942 = vmatprep.mubr.bf16.mxu1 %v3736_v35  ;;  %v3716_v45 = vmax.f32 %v3637_v9, %v3684_v50  ;;  %v4048_v29 = vld [vmem:[%s7177_s7 + $0x48] sm:$0xff]  ;;  %v4049_v50 = vld [vmem:[%s7177_s7 + $0x50] sm:$0xff] }
 0x2c4   :  { %v3644_v5 = vpop.f32.mrf.mxu1  ;;  %3943 = vmatmul.mubr.bf16.vlgmr.msra.gmra.mxu1 %v3735_v11  ;;  %v4047_v11 = vld [vmem:[%s7177_s7 + $0x40] sm:$0xff] }
 0x2c5   :  { %v3686_v25 = vmul.f32 0.2, %v3641_v42  ;;  %v3717_v13 = vmax.f32 %v3639_v1, %v3685_v17  ;;  %v3645_v19 = vadd.f32 %v3644_v5, %v3532_v38  ;;  %4092 = vperm.xlu1 %4670, %v4046_v6   ;;  %v4050_v17 = vld [vmem:[%s7177_s7 + $0x58] sm:$0xff]  ;;  %v4053_v5 = vld [vmem:[%s7177_s7 + $0x70] sm:$0xff] }
 0x2c6   :  { %v3646_v30 = vpop.f32.mrf.mxu1 }
 0x2c7   :  { %v3718_v2 = vmax.f32 %v3641_v42, %v3686_v25  ;;  %v3647_v37 = vadd.f32 %v3646_v30, %v3534_v63  ;;  %v3737_v33 = vpack.c.bf16 %v3717_v13, %v3715_v22  ;;  %v3687_v31 = vmul.f32 0.2, %v3645_v19  ;;  %v4051_v42 = vld [vmem:[%s7177_s7 + $0x60] sm:$0xff]  ;;  %v4054_v63 = vld [vmem:[%s7177_s7 + $0x78] sm:$0xff] }
 0x2c8   :  { %v3648_v41 = vpop.f32.mrf.mxu1  ;;  %v14_v25 = vstv %s7179_s8  ;;  %v7149_v13 = vld [vmem:[%s7180_s6] ss:$0 sm:$0xff] }
 0x2c9   :  { %v3649_v18 = vadd.f32 %v3648_v41, %v3536_v16  ;;  %v3738_v15 = vpack.c.bf16 %v3718_v2, %v3716_v45  ;;  %v3688_v0 = vmul.f32 0.2, %v3647_v37  ;;  %v3719_v59 = vmax.f32 %v3645_v19, %v3687_v31  ;;  %4097 = vperm.xlu1 %4670, %v4047_v11   ;;  %15 = vst [vmem:[#allocation2] sm:$0x1] %v14_v25 }
 0x2ca   :  { %v3650_v28 = vpop.f32.mrf.mxu1 }
 0x2cb   :  { %v3689_v23 = vmul.f32 0.2, %v3649_v18  ;;  %v3651_v60 = vadd.f32 %v3650_v28, %v3538_v4  ;;  %3950 = vmatprep.mubr.bf16.mxu1 %v3738_v15  ;;  %v3720_v20 = vmax.f32 %v3647_v37, %v3688_v0 }
 0x2cc   :  { %v3654_v40 = vpop.f32.mrf.mxu1  ;;  %3951 = vmatmul.mubr.bf16.gmra.mxu1 %v3737_v33 }
 0x2cd   :  { %v3690_v32 = vmul.f32 0.2, %v3651_v60  ;;  %v3721_v44 = vmax.f32 %v3649_v18, %v3689_v23  ;;  %v3655_v7 = vadd.f32 %v3654_v40, %v3542_v58  ;;  %4102 = vperm.xlu1 %4670, %v4048_v29  }
 0x2ce   :  { %v3656_v27 = vpop.f32.mrf.mxu1 }
 0x2cf   :  { %v3722_v53 = vmax.f32 %v3651_v60, %v3690_v32  ;;  %v3657_v46 = vadd.f32 %v3656_v27, %v3544_v56  ;;  %v3739_v39 = vpack.c.bf16 %v3721_v44, %v3719_v59  ;;  %v3691_v9 = vmul.f32 0.2, %v3655_v7 }
 0x2d0   :  { %v3658_v12 = vpop.f32.mrf.mxu1 }
 0x2d1   :  { %v3659_v34 = vadd.f32 %v3658_v12, %v3546_v8  ;;  %v3740_v14 = vpack.c.bf16 %v3722_v53, %v3720_v20  ;;  %v3692_v48 = vmul.f32 0.2, %v3657_v46  ;;  %v3723_v47 = vmax.f32 %v3655_v7, %v3691_v9  ;;  %4107 = vperm.xlu1 %4670, %v4049_v50  }
 0x2d2   :  { %v3660_v57 = vpop.f32.mrf.mxu1 }
 0x2d3   :  { %v3693_v36 = vmul.f32 0.2, %v3659_v34  ;;  %v3661_v49 = vadd.f32 %v3660_v57, %v3548_v61  ;;  %3958 = vmatprep.mubr.bf16.mxu1 %v3740_v14  ;;  %v3724_v26 = vmax.f32 %v3657_v46, %v3692_v48 }
 0x2d4   :  { %3959 = vmatmul.mubr.bf16.gmra.mxu1 %v3739_v39 }
 0x2d5   :  { %v3694_v52 = vmul.f32 0.2, %v3661_v49  ;;  %v3725_v10 = vmax.f32 %v3659_v34, %v3693_v36  ;;  %4112 = vperm.xlu1 %4670, %v4050_v17  }
 0x2d7   :  { %v3726_v51 = vmax.f32 %v3661_v49, %v3694_v52  ;;  %v3741_v35 = vpack.c.bf16 %v3725_v10, %v3723_v47 }
 0x2d9   :  { %v3742_v1 = vpack.c.bf16 %v3726_v51, %v3724_v26  ;;  %4117 = vperm.xlu1 %4670, %v4051_v42  }
 0x2db   :  { %3966 = vmatprep.mubr.bf16.mxu1 %v3742_v1 }
 0x2dc   :  { %3967 = vmatmul.mubr.bf16.gmra.mxu1 %v3741_v35 }
 0x2dd   :  { %4122 = vperm.xlu1 %4670, %v4052_v62  }
 0x2e1   :  { %4127 = vperm.xlu1 %4670, %v4053_v5  }
 0x2e5   :  { %4132 = vperm.xlu1 %4670, %v4054_v63  }
 0x364   :  { %v4605_v38 = vpop.f32.mrf.mxu0 }
 0x366   :  { %v4606_v24 = vpop.f32.mrf.mxu0 }
 0x367   :  { %v4607_v30 = vadd.f32 %v4606_v24, %v4605_v38 }
 0x368   :  { %v4608_v16 = vpop.f32.mrf.mxu0 }
 0x369   :  { %v3913_v45 = vadd.f32 %v4607_v30, %v7149_v13 }
 0x36a   :  { %v4609_v2 = vpop.f32.mrf.mxu0 }
 0x36b   :  { %v4610_v37 = vadd.f32 %v4609_v2, %v4608_v16  ;;  %v3975_v22 = vmul.f32 0.2, %v3913_v45 }
 0x36c   :  { %v4611_v41 = vpop.f32.mrf.mxu0 }
 0x36d   :  { %v3916_v19 = vadd.f32 %v4610_v37, %v7149_v13  ;;  %v3991_v4 = vmax.f32 %v3913_v45, %v3975_v22 }
 0x36e   :  { %v4612_v18 = vpop.f32.mrf.mxu0 }
 0x36f   :  { %4007 = vxpose.xlu0.b32.start [1/16] %v3991_v4, 128  ;;  %v3976_v15 = vmul.f32 0.2, %v3916_v19  ;;  %v4613_v55 = vadd.f32 %v4612_v18, %v4611_v41 }
 0x370   :  { %v4614_v33 = vpop.f32.mrf.mxu0 }
 0x371   :  { %v3992_v28 = vmax.f32 %v3916_v19, %v3976_v15  ;;  %v3921_v0 = vadd.f32 %v4613_v55, %v7149_v13 }
 0x372   :  { %v4615_v23 = vpop.f32.mrf.mxu0 }
 0x373   :  { %4008 = vxpose.xlu0.b32.cont [2/16] %v3992_v28, 128  ;;  %v4616_v60 = vadd.f32 %v4615_v23, %v4614_v33  ;;  %v3977_v31 = vmul.f32 0.2, %v3921_v0 }
 0x374   :  { %v4617_v40 = vpop.f32.mrf.mxu0 }
 0x375   :  { %v3924_v56 = vadd.f32 %v4616_v60, %v7149_v13  ;;  %v3993_v32 = vmax.f32 %v3921_v0, %v3977_v31 }
 0x376   :  { %v4618_v58 = vpop.f32.mrf.mxu0 }
 0x377   :  { %v4619_v54 = vadd.f32 %v4618_v58, %v4617_v40  ;;  %4009 = vxpose.xlu0.b32.cont [3/16] %v3993_v32, 128  ;;  %v3978_v44 = vmul.f32 0.2, %v3924_v56 }
 0x378   :  { %v4620_v27 = vpop.f32.mrf.mxu0 }
 0x379   :  { %v3929_v8 = vadd.f32 %v4619_v54, %v7149_v13  ;;  %v3994_v20 = vmax.f32 %v3924_v56, %v3978_v44 }
 0x37a   :  { %v4621_v53 = vpop.f32.mrf.mxu0 }
 0x37b   :  { %v4622_v46 = vadd.f32 %v4621_v53, %v4620_v27  ;;  %4010 = vxpose.xlu0.b32.cont [4/16] %v3994_v20, 128  ;;  %v3979_v59 = vmul.f32 0.2, %v3929_v8 }
 0x37c   :  { %v4623_v7 = vpop.f32.mrf.mxu0 }
 0x37d   :  { %v3932_v12 = vadd.f32 %v4622_v46, %v7149_v13  ;;  %v3995_v61 = vmax.f32 %v3929_v8, %v3979_v59 }
 0x37e   :  { %v4624_v34 = vpop.f32.mrf.mxu0 }
 0x37f   :  { %v4625_v14 = vadd.f32 %v4624_v34, %v4623_v7  ;;  %4011 = vxpose.xlu0.b32.cont [5/16] %v3995_v61, 128  ;;  %v3980_v39 = vmul.f32 0.2, %v3932_v12  ;;  %v4172_v34 = vld [vmem:[#allocation2] sm:$0x1] }
 0x380   :  { %v4626_v57 = vpop.f32.mrf.mxu0 }
 0x381   :  { %v3937_v48 = vadd.f32 %v4625_v14, %v7149_v13  ;;  %v3996_v36 = vmax.f32 %v3932_v12, %v3980_v39  ;;  %v4058_v14 = vpop.permute.xlu1 %4057 }
 0x382   :  { %v4627_v49 = vpop.f32.mrf.mxu0 }
 0x383   :  { %v4628_v9 = vadd.f32 %v4627_v49, %v4626_v57  ;;  %4012 = vxpose.xlu0.b32.cont [6/16] %v3996_v36, 128  ;;  %v3981_v52 = vmul.f32 0.2, %v3937_v48 }
 0x384   :  { %v4629_v10 = vpop.f32.mrf.mxu1 }
 0x385   :  { %v3940_v26 = vadd.f32 %v4628_v9, %v7149_v13  ;;  %v3997_v51 = vmax.f32 %v3937_v48, %v3981_v52  ;;  %v4063_v39 = vpop.permute.xlu1 %4062 }
 0x386   :  { %v4630_v47 = vpop.f32.mrf.mxu1 }
 0x387   :  { %v4631_v1 = vadd.f32 %v4630_v47, %v4629_v10  ;;  %4013 = vxpose.xlu0.b32.cont [7/16] %v3997_v51, 128  ;;  %v3982_v35 = vmul.f32 0.2, %v3940_v26 }
 0x388   :  { %v4632_v21 = vpop.f32.mrf.mxu1 }
 0x389   :  { %v3945_v6 = vadd.f32 %v4631_v1, %v7149_v13  ;;  %v3998_v11 = vmax.f32 %v3940_v26, %v3982_v35  ;;  %v4068_v57 = vpop.permute.xlu1 %4067 }
 0x38a   :  { %v4633_v29 = vpop.f32.mrf.mxu1 }
 0x38b   :  { %v4634_v50 = vadd.f32 %v4633_v29, %v4632_v21  ;;  %4014 = vxpose.xlu0.b32.cont [8/16] %v3998_v11, 128  ;;  %v3983_v17 = vmul.f32 0.2, %v3945_v6 }
 0x38c   :  { %v4635_v42 = vpop.f32.mrf.mxu1 }
 0x38d   :  { %v3948_v62 = vadd.f32 %v4634_v50, %v7149_v13  ;;  %v3999_v5 = vmax.f32 %v3945_v6, %v3983_v17  ;;  %v4073_v36 = vpop.permute.xlu1 %4072 }
 0x38e   :  { %v4636_v63 = vpop.f32.mrf.mxu1 }
 0x38f   :  { %v4637_v25 = vadd.f32 %v4636_v63, %v4635_v42  ;;  %4015 = vxpose.xlu0.b32.cont [9/16] %v3999_v5, 128  ;;  %v3984_v38 = vmul.f32 0.2, %v3948_v62 }
 0x390   :  { %v4638_v24 = vpop.f32.mrf.mxu1 }
 0x391   :  { %v3953_v30 = vadd.f32 %v4637_v25, %v7149_v13  ;;  %v4000_v16 = vmax.f32 %v3948_v62, %v3984_v38  ;;  %v4078_v9 = vpop.permute.xlu1 %4077 }
 0x392   :  { %v4639_v45 = vpop.f32.mrf.mxu1 }
 0x393   :  { %v4640_v2 = vadd.f32 %v4639_v45, %v4638_v24  ;;  %4016 = vxpose.xlu0.b32.cont [10/16] %v4000_v16, 128  ;;  %v3985_v37 = vmul.f32 0.2, %v3953_v30 }
 0x394   :  { %v4641_v22 = vpop.f32.mrf.mxu1 }
 0x395   :  { %v3956_v19 = vadd.f32 %v4640_v2, %v7149_v13  ;;  %v4001_v41 = vmax.f32 %v3953_v30, %v3985_v37  ;;  %v4083_v26 = vpop.permute.xlu1 %4082 }
 0x396   :  { %v4642_v4 = vpop.f32.mrf.mxu1 }
 0x397   :  { %v4643_v18 = vadd.f32 %v4642_v4, %v4641_v22  ;;  %4017 = vxpose.xlu0.b32.cont [11/16] %v4001_v41, 128  ;;  %v3986_v15 = vmul.f32 0.2, %v3956_v19 }
 0x398   :  { %v4644_v55 = vpop.f32.mrf.mxu1 }
 0x399   :  { %v3961_v33 = vadd.f32 %v4643_v18, %v7149_v13  ;;  %v4002_v28 = vmax.f32 %v3956_v19, %v3986_v15  ;;  %v4088_v51 = vpop.permute.xlu1 %4087 }
 0x39a   :  { %v4645_v0 = vpop.f32.mrf.mxu1 }
 0x39b   :  { %v4646_v23 = vadd.f32 %v4645_v0, %v4644_v55  ;;  %4018 = vxpose.xlu0.b32.cont [12/16] %v4002_v28, 128  ;;  %v3987_v60 = vmul.f32 0.2, %v3961_v33 }
 0x39c   :  { %v4647_v31 = vpop.f32.mrf.mxu1 }
 0x39d   :  { %v3964_v40 = vadd.f32 %v4646_v23, %v7149_v13  ;;  %v4003_v56 = vmax.f32 %v3961_v33, %v3987_v60  ;;  %v4093_v35 = vpop.permute.xlu1 %4092 }
 0x39e   :  { %v4648_v32 = vpop.f32.mrf.mxu1 }
 0x39f   :  { %v4649_v58 = vadd.f32 %v4648_v32, %v4647_v31  ;;  %4019 = vxpose.xlu0.b32.cont [13/16] %v4003_v56, 128  ;;  %v3988_v54 = vmul.f32 0.2, %v3964_v40 }
 0x3a0   :  { %v4650_v44 = vpop.f32.mrf.mxu1 }
 0x3a1   :  { %v3969_v27 = vadd.f32 %v4649_v58, %v7149_v13  ;;  %v4004_v8 = vmax.f32 %v3964_v40, %v3988_v54  ;;  %v4098_v6 = vpop.permute.xlu1 %4097 }
 0x3a2   :  { %v4651_v20 = vpop.f32.mrf.mxu1 }
 0x3a3   :  { %v4652_v53 = vadd.f32 %v4651_v20, %v4650_v44  ;;  %4020 = vxpose.xlu0.b32.cont [14/16] %v4004_v8, 128  ;;  %v3989_v46 = vmul.f32 0.2, %v3969_v27 }
 0x3a5   :  { %v3972_v59 = vadd.f32 %v4652_v53, %v7149_v13  ;;  %v4005_v7 = vmax.f32 %v3969_v27, %v3989_v46  ;;  %v4103_v17 = vpop.permute.xlu1 %4102 }
 0x3a7   :  { %4021 = vxpose.xlu0.b32.cont [15/16] %v4005_v7, 128  ;;  %v3990_v12 = vmul.f32 0.2, %v3972_v59 }
 0x3a9   :  { %v4006_v61 = vmax.f32 %v3972_v59, %v3990_v12  ;;  %v4108_v38 = vpop.permute.xlu1 %4107 }
 0x3ab   :  { %4022 = vxpose.xlu0.b32.end [16/16] %v4006_v61, 128 }
 0x3ad   :  { %v4113_v45 = vpop.permute.xlu1 %4112 }
 0x3b1   :  { %v4118_v4 = vpop.permute.xlu1 %4117 }
 0x3b5   :  { %v4123_v28 = vpop.permute.xlu1 %4122 }
 0x3b9   :  { %v4128_v58 = vpop.permute.xlu1 %4127 }
 0x3bd   :  { %v4133_v59 = vpop.permute.xlu1 %4132 }
 0x3d4   :  { %4671 = vset.pattern.permute.xlu0 %v5168_v3 }
 0x3d5   :  { %4175 = vperm.xlu0 %4671, %v4172_v34  }
 0x3eb   :  { %v4023_v48 = vpop.trf.xlu0 }
 0x3ec   :  { %v4135_v3 = vmul.f32 %v4058_v14, %v4023_v48 }
 0x3ef   :  { %v4024_v49 = vpop.trf.xlu0 }
 0x3f0   :  { %v4136_v29 = vmul.f32 %v4063_v39, %v4024_v49 }
 0x3f2   :  { %v4151_v42 = vadd.f32 %v4136_v29, %v4135_v3 }
 0x3f3   :  { %v4025_v52 = vpop.trf.xlu0 }
 0x3f4   :  { %v4137_v62 = vmul.f32 %v4068_v57, %v4025_v52 }
 0x3f6   :  { %v4152_v63 = vadd.f32 %v4151_v42, %v4137_v62 }
 0x3f7   :  { %v4026_v10 = vpop.trf.xlu0 }
 0x3f8   :  { %v4138_v25 = vmul.f32 %v4073_v36, %v4026_v10 }
 0x3fa   :  { %v4153_v24 = vadd.f32 %v4152_v63, %v4138_v25 }
 0x3fb   :  { %v4027_v13 = vpop.trf.xlu0 }
 0x3fc   :  { %v4139_v30 = vmul.f32 %v4078_v9, %v4027_v13 }
 0x3fe   :  { %v4154_v2 = vadd.f32 %v4153_v24, %v4139_v30 }
 0x3ff   :  { %v4028_v47 = vpop.trf.xlu0 }
 0x400   :  { %v4140_v37 = vmul.f32 %v4083_v26, %v4028_v47 }
 0x402   :  { %v4155_v19 = vadd.f32 %v4154_v2, %v4140_v37 }
 0x403   :  { %v4029_v1 = vpop.trf.xlu0 }
 0x404   :  { %v4141_v41 = vmul.f32 %v4088_v51, %v4029_v1 }
 0x406   :  { %v4156_v18 = vadd.f32 %v4155_v19, %v4141_v41 }
 0x407   :  { %v4030_v21 = vpop.trf.xlu0 }
 0x408   :  { %v4142_v15 = vmul.f32 %v4093_v35, %v4030_v21 }
 0x40a   :  { %v4157_v0 = vadd.f32 %v4156_v18, %v4142_v15 }
 0x40b   :  { %v4031_v11 = vpop.trf.xlu0 }
 0x40c   :  { %v4143_v33 = vmul.f32 %v4098_v6, %v4031_v11 }
 0x40e   :  { %v4158_v60 = vadd.f32 %v4157_v0, %v4143_v33 }
 0x40f   :  { %v4032_v50 = vpop.trf.xlu0 }
 0x410   :  { %v4144_v23 = vmul.f32 %v4103_v17, %v4032_v50 }
 0x412   :  { %v4159_v56 = vadd.f32 %v4158_v60, %v4144_v23 }
 0x413   :  { %v4033_v5 = vpop.trf.xlu0 }
 0x414   :  { %v4145_v31 = vmul.f32 %v4108_v38, %v4033_v5 }
 0x416   :  { %v4160_v54 = vadd.f32 %v4159_v56, %v4145_v31 }
 0x417   :  { %v4034_v16 = vpop.trf.xlu0 }
 0x418   :  { %v4146_v32 = vmul.f32 %v4113_v45, %v4034_v16 }
 0x41a   :  { %v4161_v27 = vadd.f32 %v4160_v54, %v4146_v32 }
 0x41b   :  { %v4035_v22 = vpop.trf.xlu0 }
 0x41c   :  { %v4147_v44 = vmul.f32 %v4118_v4, %v4035_v22 }
 0x41e   :  { %v4162_v53 = vadd.f32 %v4161_v27, %v4147_v44 }
 0x41f   :  { %v4036_v55 = vpop.trf.xlu0 }
 0x420   :  { %v4148_v8 = vmul.f32 %v4123_v28, %v4036_v55 }
 0x422   :  { %v4163_v7 = vadd.f32 %v4162_v53, %v4148_v8 }
 0x423   :  { %v4037_v40 = vpop.trf.xlu0 }
 0x424   :  { %v4149_v46 = vmul.f32 %v4128_v58, %v4037_v40 }
 0x426   :  { %v4164_v61 = vadd.f32 %v4163_v7, %v4149_v46 }
 0x427   :  { %v4038_v20 = vpop.trf.xlu0 }
 0x428   :  { %v4150_v12 = vmul.f32 %v4133_v59, %v4038_v20 }
 0x42a   :  { %v4165_v34 = vadd.f32 %v4164_v61, %v4150_v12 }
 0x42c   :  { %v4166_v14 = vrot.slane %v4165_v34, 4 }
 0x42e   :  { %v4167_v39 = vadd.f32 %v4166_v14, %v4165_v34 }
 0x430   :  { %v4168_v57 = vrot.slane %v4167_v39, 2 }
 0x432   :  { %v4169_v48 = vadd.f32 %v4168_v57, %v4167_v39 }
 0x434   :  { %v4170_v36 = vrot.slane %v4169_v48, 1 }
 0x436   :  { %v4171_v9 = vadd.f32 %v4170_v36, %v4169_v48 }
 0x450   :  { %v4176_v49 = vpop.permute.xlu0 %4175 }
 0x451   :  { %v4181_v52 = vrot.slane %v4176_v49, %v7225_v43 }
 0x453   :  { %v4182_v10 = vadd.f32 %v4181_v52, %v4171_v9 }
 0x455   :  { %4183 = vst [vmem:[%s7181_s9] sm:$0x1] %v4182_v10 }

</bundles_post_ra>
